<compile_context>
chip_gen: v7x
topology: tpu7x:2x2x1
jax: 0.10.0
libtpu: 0.0.40
codegen_flags: <defaults>
</compile_context>

<pallas_src>
import functools

import jax
import jax.numpy as jnp
from jax import lax
from jax.experimental import pallas as pl
from jax.experimental.pallas import tpu as pltpu

HIDDEN = 32   # np.HiddenSize
LAYERS = 2    # np.LayerSize
HEADS = 4     # x, y, w, h


# ----------------------------- Pallas kernel --------------------------------

def fused_lstm_kernel(x_ref, wih1_ref, b1_ref, whh1_ref, w2_ref, b2_ref,
                      wfc_ref, bfc_ref, o_ref, pre_sc, y2_sc, *, seq_len, bp):
    """Fused 4-head, 2-layer LSTM + Linear.  Single invocation, no grid.

    Packed layouts:
      x_ref   : (T*Bp, 8)   bf16   columns [2j, 2j+1] = (coord_j, p)
      wih1    : (8, 512)    bf16   block-structured input->gates, layer 1
      whh1    : (128, 512)  bf16   block-diagonal hidden->gates, layer 1
      w2      : (256, 512)  bf16   rows[:128]=wih2 (h1), rows[128:]=whh2 (h2)
      b1, b2  : (1, 512)    f32    bih+bhh, packed
      wfc     : (128, 4)    f32    block-diagonal per-head Linear(H,1)
      bfc     : (1, 4)      f32
      gates   : [ i(128) | f(128) | g(128) | o(128) ], 4 heads x 32 lanes each
      pre_sc  : (T*Bp, 512) f32    hoisted layer-1 input pre-gates (+bias)
      y2_sc   : (T*Bp, 128) f32    layer-2 hidden outputs
    """
    H4 = y2_sc.shape[1]                      # 4 * HIDDEN = 128

    # Hoisted layer-1 input projection for the whole sequence (one matmul,
    # bias folded in) -- removes the tiny-K matmul from the serial recurrence.
    pre_sc[...] = (jnp.dot(x_ref[...], wih1_ref[...],
                           preferred_element_type=jnp.float32)
                   + b1_ref[...])

    def cell(gates, c):
        i = jax.nn.sigmoid(gates[:, 0:H4])
        f = jax.nn.sigmoid(gates[:, H4:2 * H4])
        g = jnp.tanh(gates[:, 2 * H4:3 * H4])
        o = jax.nn.sigmoid(gates[:, 3 * H4:4 * H4])
        c_new = f * c + i * g
        return o * jnp.tanh(c_new), c_new

    def step(t, carry):
        # States are carried in vregs (no VMEM bounce on the critical path).
        h1_bf, h2_bf, c1, c2 = carry
        row = pl.multiple_of(t * bp, bp)

        # Layer 1: precomputed input gates + one lane-dense recurrent matmul.
        g1 = pre_sc[pl.ds(row, bp), :] + jnp.dot(
            h1_bf, whh1_ref[...], preferred_element_type=jnp.float32)
        h1, c1 = cell(g1, c1)
        h1_bf = h1.astype(jnp.bfloat16)

        # Layer 2: single fused matmul on [h1(t) | h2(t-1)] against (256,512).
        h12 = jnp.concatenate([h1_bf, h2_bf], axis=1)          # (Bp, 256)
        g2 = jnp.dot(h12, w2_ref[...],
                     preferred_element_type=jnp.float32) + b2_ref[...]
        h2, c2 = cell(g2, c2)
        h2_bf = h2.astype(jnp.bfloat16)

        # Only per-step VMEM write; off the recurrence critical path.
        y2_sc[pl.ds(row, bp), :] = h2
        return (h1_bf, h2_bf, c1, c2)

    carry0 = (jnp.zeros((bp, H4), jnp.bfloat16),
              jnp.zeros((bp, H4), jnp.bfloat16),
              jnp.zeros((bp, H4), jnp.float32),
              jnp.zeros((bp, H4), jnp.float32))
    unroll = True if seq_len <= 32 else 8
    lax.fori_loop(0, seq_len, step, carry0, unroll=unroll)

    # Fused 4-head Linear(H,1): one (T*Bp,128)@(128,4) matmul on the
    # VMEM-resident hidden outputs.  Last dim 4 < 128 => masked store; the
    # output is tiny so this is accepted.
    o_ref[...] = (jnp.dot(y2_sc[...], wfc_ref[...],
                          preferred_element_type=jnp.float32) + bfc_ref[...])


# ------------------------------ wrapper --------------------------------------

def _vmem_limit_bytes(seq_len, bp):
    """Size the scoped-VMEM request to the actual weights + scratch."""
    G = 4 * HEADS * HIDDEN        # 512
    H4 = HEADS * HIDDEN           # 128
    TB = seq_len * bp

    def padded(rows, cols, itemsize):
        sub = 8 if itemsize == 4 else 16
        r = -(-rows // sub) * sub
        c = -(-cols // 128) * 128
        return r * c * itemsize

    total = (padded(TB, 2 * HEADS, 2)          # x (bf16, lane-padded)
             + padded(2 * HEADS, G, 2)         # wih1
             + padded(H4, G, 2)                # whh1
             + padded(2 * H4, G, 2)            # w2
             + 2 * padded(1, G, 4)             # b1, b2
             + padded(H4, HEADS, 4)            # wfc
             + padded(1, HEADS, 4)             # bfc
             + padded(TB, HEADS, 4)            # output
             + padded(TB, G, 4)                # pre_sc scratch
             + padded(TB, H4, 4))              # y2_sc scratch
    # 2x headroom for compiler temporaries; keep within sane bounds.
    return int(min(100 * 2**20, max(16 * 2**20, 2 * total + (4 << 20))))


def fused_call(x_flat, pk, seq_len, bp):
    """x_flat: (T*Bp, 8) bf16, batch already padded to a multiple of 8."""
    H4 = pk["whh1"].shape[0]      # 128
    G = pk["whh1"].shape[1]       # 512
    TB = seq_len * bp
    vmem = lambda: pl.BlockSpec(memory_space=pltpu.MemorySpace.VMEM)
    kernel = functools.partial(fused_lstm_kernel, seq_len=seq_len, bp=bp)
    return pl.pallas_call(
        kernel,
        out_shape=jax.ShapeDtypeStruct((TB, HEADS), jnp.float32),
        in_specs=[vmem() for _ in range(8)],
        out_specs=vmem(),
        scratch_shapes=[
            pltpu.VMEM((TB, G), jnp.float32),    # hoisted layer-1 pre-gates
            pltpu.VMEM((TB, H4), jnp.float32),   # layer-2 hidden outputs
        ],
        compiler_params=pltpu.CompilerParams(
            vmem_limit_bytes=_vmem_limit_bytes(seq_len, bp)),
    )(x_flat, pk["wih1"], pk["b1"], pk["whh1"], pk["w2"], pk["b2"],
      pk["wfc"], pk["bfc"])


def mlp_lnet_forward(l, packed):
    """l: (B, T, N>=5) -> (B, T, 4)."""
    B, T, _ = l.shape
    coords = l[:, :, :4].astype(jnp.float32)                    # (B, T, 4)
    p = l[:, :, 4:5].astype(jnp.float32)                        # (B, T, 1)
    x = jnp.stack([coords, jnp.broadcast_to(p, coords.shape)], axis=-1)
    x = x.reshape(B, T, 2 * HEADS)                               # (B, T, 8)
    x = jnp.transpose(x, (1, 0, 2))                              # (T, B, 8)
    Bp = ((B + 7) // 8) * 8                                      # full sublanes
    if Bp != B:
        x = jnp.pad(x, ((0, 0), (0, Bp - B), (0, 0)))
    # Flatten in the wrapper (no in-kernel reshape); bf16 MXU operand.
    x = x.reshape(T * Bp, 2 * HEADS).astype(jnp.bfloat16)
    out = fused_call(x, packed, T, Bp)                           # (T*Bp, 4)
    out = out.reshape(T, Bp, 4)[:, :B, :]
    return jnp.transpose(out, (1, 0, 2))                         # (B, T, 4)


# ------------------------------ parameters ----------------------------------

def init_params(key, hidden=HIDDEN, layers=LAYERS):
    """Deterministic init mimicking PyTorch's U(-1/sqrt(H), 1/sqrt(H))."""
    k = 1.0 / float(hidden) ** 0.5
    names = ["x", "y", "w", "h"]
    params = {}
    for name, nk in zip(names, jax.random.split(key, len(names))):
        lkeys = jax.random.split(nk, layers * 4 + 2)
        lstm_p = []
        in_size = 2
        for li in range(layers):
            wih = jax.random.uniform(lkeys[li * 4 + 0], (4 * hidden, in_size),
                                     jnp.float32, -k, k)
            whh = jax.random.uniform(lkeys[li * 4 + 1], (4 * hidden, hidden),
                                     jnp.float32, -k, k)
            bih = jax.random.uniform(lkeys[li * 4 + 2], (4 * hidden,),
                                     jnp.float32, -k, k)
            bhh = jax.random.uniform(lkeys[li * 4 + 3], (4 * hidden,),
                                     jnp.float32, -k, k)
            lstm_p.append((wih, whh, bih, bhh))
            in_size = hidden
        fc_w = jax.random.uniform(lkeys[-2], (1, hidden), jnp.float32, -k, k)
        fc_b = jax.random.uniform(lkeys[-1], (1,), jnp.float32, -k, k)
        params[name] = {"lstm": lstm_p, "fc_w": fc_w, "fc_b": fc_b}
    return params


def pack_params(params, hidden=HIDDEN):
    """One-time packing of the 4 heads into block-diagonal fused weights.

    Layer-2 input and recurrent weights are fused into a single (256, 512)
    matrix so the recurrence does ONE matmul per layer-2 step.  Big matmul
    operands are stored in bf16 (f32 accumulation in-kernel); biases and the
    tiny output head stay f32.
    """
    H = hidden
    H4 = HEADS * H                 # 128
    G = 4 * H4                     # 512 packed gate lanes: [i|f|g|o] x 4 heads
    names = ["x", "y", "w", "h"]
    wih1 = jnp.zeros((2 * HEADS, G), jnp.float32)
    whh1 = jnp.zeros((H4, G), jnp.float32)
    b1 = jnp.zeros((1, G), jnp.float32)
    w2 = jnp.zeros((2 * H4, G), jnp.float32)   # rows[:H4]=wih2, rows[H4:]=whh2
    b2 = jnp.zeros((1, G), jnp.float32)
    wfc = jnp.zeros((H4, HEADS), jnp.float32)
    bfc = jnp.zeros((1, HEADS), jnp.float32)
    for j, name in enumerate(names):
        lstm = params[name]["lstm"]
        assert len(lstm) == 2, "fused kernel is specialized for LayerSize=2"
        (wih_a, whh_a, bih_a, bhh_a), (wih_b, whh_b, bih_b, bhh_b) = lstm
        for g in range(4):  # PyTorch gate order: i, f, g, o
            rows = slice(g * H, (g + 1) * H)
            col = slice(g * H4 + j * H, g * H4 + (j + 1) * H)
            wih1 = wih1.at[2 * j:2 * j + 2, col].set(wih_a[rows, :].T)
            whh1 = whh1.at[j * H:(j + 1) * H, col].set(whh_a[rows, :].T)
            b1 = b1.at[0, col].set(bih_a[rows] + bhh_a[rows])
            w2 = w2.at[j * H:(j + 1) * H, col].set(wih_b[rows, :].T)
            w2 = w2.at[H4 + j * H:H4 + (j + 1) * H, col].set(whh_b[rows, :].T)
            b2 = b2.at[0, col].set(bih_b[rows] + bhh_b[rows])
        wfc = wfc.at[j * H:(j + 1) * H, j].set(params[name]["fc_w"][0])
        bfc = bfc.at[0, j].set(params[name]["fc_b"][0])
    return dict(wih1=wih1.astype(jnp.bfloat16),
                whh1=whh1.astype(jnp.bfloat16),
                w2=w2.astype(jnp.bfloat16),
                b1=b1, b2=b2, wfc=wfc, bfc=bfc)


# --------------------------- pure-JAX reference -------------------------------

def _lstm_ref(x_tbi, wih, whh, bih, bhh):
    H = whh.shape[1]
    B = x_tbi.shape[1]

    def step(carry, x):
        h, c = carry
        gates = x @ wih.T + h @ whh.T + bih + bhh
        i = jax.nn.sigmoid(gates[:, :H])
        f = jax.nn.sigmoid(gates[:, H:2 * H])
        g = jnp.tanh(gates[:, 2 * H:3 * H])
        o = jax.nn.sigmoid(gates[:, 3 * H:])
        c = f * c + i * g
        h = o * jnp.tanh(c)
        return (h, c), h

    carry0 = (jnp.zeros((B, H), jnp.float32), jnp.zeros((B, H), jnp.float32))
    _, ys = lax.scan(step, carry0, x_tbi)
    return ys


def mlp_lnet_reference(l, params):
    B, T, _ = l.shape
    p_chan = l[:, :, 4]
    outs = []
    for idx, name in enumerate(["x", "y", "w", "h"]):
        inp = jnp.stack([l[:, :, idx], p_chan], axis=-1)
        xt = jnp.transpose(inp, (1, 0, 2)).astype(jnp.float32)
        for (wih, whh, bih, bhh) in params[name]["lstm"]:
            xt = _lstm_ref(xt, wih, whh, bih, bhh)
        o = xt @ params[name]["fc_w"][0] + params[name]["fc_b"][0]  # (T, B)
        outs.append(o.transpose(1, 0)[..., None])                   # (B, T, 1)
    return jnp.concatenate(outs, axis=2)


# --------------------------------- main ---------------------------------------

if __name__ == "__main__":
    key = jax.random.PRNGKey(0)
    pkey, dkey = jax.random.split(key)

    batch, seq, nfeat = 2, 8, 5
    params = init_params(pkey)
    packed = pack_params(params)        # hoisted one-time weight packing
    l = jax.random.normal(dkey, (batch, seq, nfeat), jnp.float32)

    out = jax.block_until_ready(mlp_lnet_forward(l, packed))
    ref = jax.block_until_ready(mlp_lnet_reference(l, params))

    assert out.shape == (batch, seq, 4), out.shape
    # Tolerance relaxed vs the f32-only version because MXU operands are bf16
    # (gate math, c-state and accumulation remain f32).
    assert jnp.allclose(out, ref, atol=3e-2, rtol=3e-2), (
        float(jnp.max(jnp.abs(out - ref))))
    print("KERNEL_OK")
</pallas_src>

<mosaic_0001>
module attributes {stable_mosaic.version = 11 : i64} {
  func.func @fused_lstm_kernel(%arg0: memref<64x8xbf16, #tpu.memory_space<vmem>>, %arg1: memref<8x512xbf16, #tpu.memory_space<vmem>>, %arg2: memref<1x512xf32, #tpu.memory_space<vmem>>, %arg3: memref<128x512xbf16, #tpu.memory_space<vmem>>, %arg4: memref<256x512xbf16, #tpu.memory_space<vmem>>, %arg5: memref<1x512xf32, #tpu.memory_space<vmem>>, %arg6: memref<128x4xf32, #tpu.memory_space<vmem>>, %arg7: memref<1x4xf32, #tpu.memory_space<vmem>>, %arg8: memref<64x4xf32, #tpu.memory_space<vmem>>, %arg9: memref<64x512xf32, #tpu.memory_space<vmem>>, %arg10: memref<64x128xf32, #tpu.memory_space<vmem>>) attributes {dimension_semantics = [], scalar_prefetch = 0 : i64, scratch_operands = 2 : i64, tpu.core_type = #tpu.core_type<tc>} {
    %c0 = arith.constant 0 : index
    %c0_0 = arith.constant 0 : index
    %0 = vector.load %arg0[%c0, %c0_0] : memref<64x8xbf16, #tpu.memory_space<vmem>>, vector<64x8xbf16>
    %c0_1 = arith.constant 0 : index
    %c0_2 = arith.constant 0 : index
    %1 = vector.load %arg1[%c0_1, %c0_2] : memref<8x512xbf16, #tpu.memory_space<vmem>>, vector<8x512xbf16>
    %cst = arith.constant dense<0.000000e+00> : vector<64x512xf32>
    %2 = tpu.matmul %0, %1, %cst {dimension_numbers = #tpu.dot_dimension_numbers<[1], [0], [0], [1], [0, 0, 1, 1], [], []>} : vector<64x8xbf16>, vector<8x512xbf16>, vector<64x512xf32> -> vector<64x512xf32>
    %c0_3 = arith.constant 0 : index
    %c0_4 = arith.constant 0 : index
    %3 = vector.load %arg2[%c0_3, %c0_4] : memref<1x512xf32, #tpu.memory_space<vmem>>, vector<1x512xf32>
    %4 = vector.broadcast %3 : vector<1x512xf32> to vector<64x512xf32>
    %5 = arith.addf %2, %4 : vector<64x512xf32>
    %c0_5 = arith.constant 0 : index
    %c0_6 = arith.constant 0 : index
    %6 = vector.load %arg9[%c0_5, %c0_6] : memref<64x512xf32, #tpu.memory_space<vmem>>, vector<64x512xf32>
    tpu.vector_store %arg9[%c0_5, %c0_6], %5 {strides = array<i32>} : memref<64x512xf32, #tpu.memory_space<vmem>>, vector<64x512xf32>,
    %cst_7 = arith.constant 0.000000e+00 : bf16
    %7 = vector.broadcast %cst_7 : bf16 to vector<8x128xbf16>
    %cst_8 = arith.constant 0.000000e+00 : bf16
    %8 = vector.broadcast %cst_8 : bf16 to vector<8x128xbf16>
    %cst_9 = arith.constant 0.000000e+00 : f32
    %9 = vector.broadcast %cst_9 : f32 to vector<8x128xf32>
    %cst_10 = arith.constant 0.000000e+00 : f32
    %10 = vector.broadcast %cst_10 : f32 to vector<8x128xf32>
    %c0_i32 = arith.constant 0 : i32
    %c8_i32 = arith.constant 8 : i32
    %11 = arith.muli %c0_i32, %c8_i32 : i32
    %12 = tpu.assume_multiple %11, 8 : i32
    %13 = arith.index_cast %12 : i32 to index
    %c0_11 = arith.constant 0 : index
    %14 = vector.load %arg9[%13, %c0_11] : memref<64x512xf32, #tpu.memory_space<vmem>>, vector<8x512xf32>
    %c0_12 = arith.constant 0 : index
    %c0_13 = arith.constant 0 : index
    %15 = vector.load %arg3[%c0_12, %c0_13] : memref<128x512xbf16, #tpu.memory_space<vmem>>, vector<128x512xbf16>
    %cst_14 = arith.constant dense<0.000000e+00> : vector<8x512xf32>
    %16 = tpu.matmul %7, %15, %cst_14 {dimension_numbers = #tpu.dot_dimension_numbers<[1], [0], [0], [1], [0, 0, 1, 1], [], []>} : vector<8x128xbf16>, vector<128x512xbf16>, vector<8x512xf32> -> vector<8x512xf32>
    %17 = arith.addf %14, %16 : vector<8x512xf32>
    %18 = vector.extract_strided_slice %17 {offsets = [0, 0], sizes = [8, 128], strides = [1, 1]} : vector<8x512xf32> to vector<8x128xf32>
    %19 = arith.negf %18 : vector<8x128xf32>
    %20 = math.exp %19 : vector<8x128xf32>
    %cst_15 = arith.constant 1.000000e+00 : f32
    %21 = vector.broadcast %cst_15 : f32 to vector<8x128xf32>
    %22 = arith.addf %21, %20 : vector<8x128xf32>
    %23 = arith.divf %21, %22 : vector<8x128xf32>
    %24 = vector.extract_strided_slice %17 {offsets = [0, 128], sizes = [8, 128], strides = [1, 1]} : vector<8x512xf32> to vector<8x128xf32>
    %25 = arith.negf %24 : vector<8x128xf32>
    %26 = math.exp %25 : vector<8x128xf32>
    %cst_16 = arith.constant 1.000000e+00 : f32
    %27 = vector.broadcast %cst_16 : f32 to vector<8x128xf32>
    %28 = arith.addf %27, %26 : vector<8x128xf32>
    %29 = arith.divf %27, %28 : vector<8x128xf32>
    %30 = vector.extract_strided_slice %17 {offsets = [0, 256], sizes = [8, 128], strides = [1, 1]} : vector<8x512xf32> to vector<8x128xf32>
    %31 = math.tanh %30 : vector<8x128xf32>
    %32 = vector.extract_strided_slice %17 {offsets = [0, 384], sizes = [8, 128], strides = [1, 1]} : vector<8x512xf32> to vector<8x128xf32>
    %33 = arith.negf %32 : vector<8x128xf32>
    %34 = math.exp %33 : vector<8x128xf32>
    %cst_17 = arith.constant 1.000000e+00 : f32
    %35 = vector.broadcast %cst_17 : f32 to vector<8x128xf32>
    %36 = arith.addf %35, %34 : vector<8x128xf32>
    %37 = arith.divf %35, %36 : vector<8x128xf32>
    %38 = arith.mulf %29, %9 : vector<8x128xf32>
    %39 = arith.mulf %23, %31 : vector<8x128xf32>
    %40 = arith.addf %38, %39 : vector<8x128xf32>
    %41 = math.tanh %40 : vector<8x128xf32>
    %42 = arith.mulf %37, %41 : vector<8x128xf32>
    %43 = arith.truncf %42 : vector<8x128xf32> to vector<8x128xbf16>
    %44 = tpu.concatenate %43, %8 in 1 : vector<8x128xbf16>, vector<8x128xbf16> -> vector<8x256xbf16>
    %c0_18 = arith.constant 0 : index
    %c0_19 = arith.constant 0 : index
    %45 = vector.load %arg4[%c0_18, %c0_19] : memref<256x512xbf16, #tpu.memory_space<vmem>>, vector<256x512xbf16>
    %cst_20 = arith.constant dense<0.000000e+00> : vector<8x512xf32>
    %46 = tpu.matmul %44, %45, %cst_20 {dimension_numbers = #tpu.dot_dimension_numbers<[1], [0], [0], [1], [0, 0, 1, 1], [], []>} : vector<8x256xbf16>, vector<256x512xbf16>, vector<8x512xf32> -> vector<8x512xf32>
    %c0_21 = arith.constant 0 : index
    %c0_22 = arith.constant 0 : index
    %47 = vector.load %arg5[%c0_21, %c0_22] : memref<1x512xf32, #tpu.memory_space<vmem>>, vector<1x512xf32>
    %48 = vector.broadcast %47 : vector<1x512xf32> to vector<8x512xf32>
    %49 = arith.addf %46, %48 : vector<8x512xf32>
    %50 = vector.extract_strided_slice %49 {offsets = [0, 0], sizes = [8, 128], strides = [1, 1]} : vector<8x512xf32> to vector<8x128xf32>
    %51 = arith.negf %50 : vector<8x128xf32>
    %52 = math.exp %51 : vector<8x128xf32>
    %cst_23 = arith.constant 1.000000e+00 : f32
    %53 = vector.broadcast %cst_23 : f32 to vector<8x128xf32>
    %54 = arith.addf %53, %52 : vector<8x128xf32>
    %55 = arith.divf %53, %54 : vector<8x128xf32>
    %56 = vector.extract_strided_slice %49 {offsets = [0, 128], sizes = [8, 128], strides = [1, 1]} : vector<8x512xf32> to vector<8x128xf32>
    %57 = arith.negf %56 : vector<8x128xf32>
    %58 = math.exp %57 : vector<8x128xf32>
    %cst_24 = arith.constant 1.000000e+00 : f32
    %59 = vector.broadcast %cst_24 : f32 to vector<8x128xf32>
    %60 = arith.addf %59, %58 : vector<8x128xf32>
    %61 = arith.divf %59, %60 : vector<8x128xf32>
    %62 = vector.extract_strided_slice %49 {offsets = [0, 256], sizes = [8, 128], strides = [1, 1]} : vector<8x512xf32> to vector<8x128xf32>
    %63 = math.tanh %62 : vector<8x128xf32>
    %64 = vector.extract_strided_slice %49 {offsets = [0, 384], sizes = [8, 128], strides = [1, 1]} : vector<8x512xf32> to vector<8x128xf32>
    %65 = arith.negf %64 : vector<8x128xf32>
    %66 = math.exp %65 : vector<8x128xf32>
    %cst_25 = arith.constant 1.000000e+00 : f32
    %67 = vector.broadcast %cst_25 : f32 to vector<8x128xf32>
    %68 = arith.addf %67, %66 : vector<8x128xf32>
    %69 = arith.divf %67, %68 : vector<8x128xf32>
    %70 = arith.mulf %61, %10 : vector<8x128xf32>
    %71 = arith.mulf %55, %63 : vector<8x128xf32>
    %72 = arith.addf %70, %71 : vector<8x128xf32>
    %73 = math.tanh %72 : vector<8x128xf32>
    %74 = arith.mulf %69, %73 : vector<8x128xf32>
    %75 = arith.truncf %74 : vector<8x128xf32> to vector<8x128xbf16>
    %76 = arith.index_cast %12 : i32 to index
    %c0_26 = arith.constant 0 : index
    %77 = vector.load %arg10[%76, %c0_26] : memref<64x128xf32, #tpu.memory_space<vmem>>, vector<8x128xf32>
    tpu.vector_store %arg10[%76, %c0_26], %74 {strides = array<i32>} : memref<64x128xf32, #tpu.memory_space<vmem>>, vector<8x128xf32>,
    %c1_i32 = arith.constant 1 : i32
    %c8_i32_27 = arith.constant 8 : i32
    %78 = arith.muli %c1_i32, %c8_i32_27 : i32
    %79 = tpu.assume_multiple %78, 8 : i32
    %80 = arith.index_cast %79 : i32 to index
    %c0_28 = arith.constant 0 : index
    %81 = vector.load %arg9[%80, %c0_28] : memref<64x512xf32, #tpu.memory_space<vmem>>, vector<8x512xf32>
    %c0_29 = arith.constant 0 : index
    %c0_30 = arith.constant 0 : index
    %82 = vector.load %arg3[%c0_29, %c0_30] : memref<128x512xbf16, #tpu.memory_space<vmem>>, vector<128x512xbf16>
    %cst_31 = arith.constant dense<0.000000e+00> : vector<8x512xf32>
    %83 = tpu.matmul %43, %82, %cst_31 {dimension_numbers = #tpu.dot_dimension_numbers<[1], [0], [0], [1], [0, 0, 1, 1], [], []>} : vector<8x128xbf16>, vector<128x512xbf16>, vector<8x512xf32> -> vector<8x512xf32>
    %84 = arith.addf %81, %83 : vector<8x512xf32>
    %85 = vector.extract_strided_slice %84 {offsets = [0, 0], sizes = [8, 128], strides = [1, 1]} : vector<8x512xf32> to vector<8x128xf32>
    %86 = arith.negf %85 : vector<8x128xf32>
    %87 = math.exp %86 : vector<8x128xf32>
    %cst_32 = arith.constant 1.000000e+00 : f32
    %88 = vector.broadcast %cst_32 : f32 to vector<8x128xf32>
    %89 = arith.addf %88, %87 : vector<8x128xf32>
    %90 = arith.divf %88, %89 : vector<8x128xf32>
    %91 = vector.extract_strided_slice %84 {offsets = [0, 128], sizes = [8, 128], strides = [1, 1]} : vector<8x512xf32> to vector<8x128xf32>
    %92 = arith.negf %91 : vector<8x128xf32>
    %93 = math.exp %92 : vector<8x128xf32>
    %cst_33 = arith.constant 1.000000e+00 : f32
    %94 = vector.broadcast %cst_33 : f32 to vector<8x128xf32>
    %95 = arith.addf %94, %93 : vector<8x128xf32>
    %96 = arith.divf %94, %95 : vector<8x128xf32>
    %97 = vector.extract_strided_slice %84 {offsets = [0, 256], sizes = [8, 128], strides = [1, 1]} : vector<8x512xf32> to vector<8x128xf32>
    %98 = math.tanh %97 : vector<8x128xf32>
    %99 = vector.extract_strided_slice %84 {offsets = [0, 384], sizes = [8, 128], strides = [1, 1]} : vector<8x512xf32> to vector<8x128xf32>
    %100 = arith.negf %99 : vector<8x128xf32>
    %101 = math.exp %100 : vector<8x128xf32>
    %cst_34 = arith.constant 1.000000e+00 : f32
    %102 = vector.broadcast %cst_34 : f32 to vector<8x128xf32>
    %103 = arith.addf %102, %101 : vector<8x128xf32>
    %104 = arith.divf %102, %103 : vector<8x128xf32>
    %105 = arith.mulf %96, %40 : vector<8x128xf32>
    %106 = arith.mulf %90, %98 : vector<8x128xf32>
    %107 = arith.addf %105, %106 : vector<8x128xf32>
    %108 = math.tanh %107 : vector<8x128xf32>
    %109 = arith.mulf %104, %108 : vector<8x128xf32>
    %110 = arith.truncf %109 : vector<8x128xf32> to vector<8x128xbf16>
    %111 = tpu.concatenate %110, %75 in 1 : vector<8x128xbf16>, vector<8x128xbf16> -> vector<8x256xbf16>
    %c0_35 = arith.constant 0 : index
    %c0_36 = arith.constant 0 : index
    %112 = vector.load %arg4[%c0_35, %c0_36] : memref<256x512xbf16, #tpu.memory_space<vmem>>, vector<256x512xbf16>
    %cst_37 = arith.constant dense<0.000000e+00> : vector<8x512xf32>
    %113 = tpu.matmul %111, %112, %cst_37 {dimension_numbers = #tpu.dot_dimension_numbers<[1], [0], [0], [1], [0, 0, 1, 1], [], []>} : vector<8x256xbf16>, vector<256x512xbf16>, vector<8x512xf32> -> vector<8x512xf32>
    %c0_38 = arith.constant 0 : index
    %c0_39 = arith.constant 0 : index
    %114 = vector.load %arg5[%c0_38, %c0_39] : memref<1x512xf32, #tpu.memory_space<vmem>>, vector<1x512xf32>
    %115 = vector.broadcast %114 : vector<1x512xf32> to vector<8x512xf32>
    %116 = arith.addf %113, %115 : vector<8x512xf32>
    %117 = vector.extract_strided_slice %116 {offsets = [0, 0], sizes = [8, 128], strides = [1, 1]} : vector<8x512xf32> to vector<8x128xf32>
    %118 = arith.negf %117 : vector<8x128xf32>
    %119 = math.exp %118 : vector<8x128xf32>
    %cst_40 = arith.constant 1.000000e+00 : f32
    %120 = vector.broadcast %cst_40 : f32 to vector<8x128xf32>
    %121 = arith.addf %120, %119 : vector<8x128xf32>
    %122 = arith.divf %120, %121 : vector<8x128xf32>
    %123 = vector.extract_strided_slice %116 {offsets = [0, 128], sizes = [8, 128], strides = [1, 1]} : vector<8x512xf32> to vector<8x128xf32>
    %124 = arith.negf %123 : vector<8x128xf32>
    %125 = math.exp %124 : vector<8x128xf32>
    %cst_41 = arith.constant 1.000000e+00 : f32
    %126 = vector.broadcast %cst_41 : f32 to vector<8x128xf32>
    %127 = arith.addf %126, %125 : vector<8x128xf32>
    %128 = arith.divf %126, %127 : vector<8x128xf32>
    %129 = vector.extract_strided_slice %116 {offsets = [0, 256], sizes = [8, 128], strides = [1, 1]} : vector<8x512xf32> to vector<8x128xf32>
    %130 = math.tanh %129 : vector<8x128xf32>
    %131 = vector.extract_strided_slice %116 {offsets = [0, 384], sizes = [8, 128], strides = [1, 1]} : vector<8x512xf32> to vector<8x128xf32>
    %132 = arith.negf %131 : vector<8x128xf32>
    %133 = math.exp %132 : vector<8x128xf32>
    %cst_42 = arith.constant 1.000000e+00 : f32
    %134 = vector.broadcast %cst_42 : f32 to vector<8x128xf32>
    %135 = arith.addf %134, %133 : vector<8x128xf32>
    %136 = arith.divf %134, %135 : vector<8x128xf32>
    %137 = arith.mulf %128, %72 : vector<8x128xf32>
    %138 = arith.mulf %122, %130 : vector<8x128xf32>
    %139 = arith.addf %137, %138 : vector<8x128xf32>
    %140 = math.tanh %139 : vector<8x128xf32>
    %141 = arith.mulf %136, %140 : vector<8x128xf32>
    %142 = arith.truncf %141 : vector<8x128xf32> to vector<8x128xbf16>
    %143 = arith.index_cast %79 : i32 to index
    %c0_43 = arith.constant 0 : index
    %144 = vector.load %arg10[%143, %c0_43] : memref<64x128xf32, #tpu.memory_space<vmem>>, vector<8x128xf32>
    tpu.vector_store %arg10[%143, %c0_43], %141 {strides = array<i32>} : memref<64x128xf32, #tpu.memory_space<vmem>>, vector<8x128xf32>,
    %c2_i32 = arith.constant 2 : i32
    %c8_i32_44 = arith.constant 8 : i32
    %145 = arith.muli %c2_i32, %c8_i32_44 : i32
    %146 = tpu.assume_multiple %145, 8 : i32
    %147 = arith.index_cast %146 : i32 to index
    %c0_45 = arith.constant 0 : index
    %148 = vector.load %arg9[%147, %c0_45] : memref<64x512xf32, #tpu.memory_space<vmem>>, vector<8x512xf32>
    %c0_46 = arith.constant 0 : index
    %c0_47 = arith.constant 0 : index
    %149 = vector.load %arg3[%c0_46, %c0_47] : memref<128x512xbf16, #tpu.memory_space<vmem>>, vector<128x512xbf16>
    %cst_48 = arith.constant dense<0.000000e+00> : vector<8x512xf32>
    %150 = tpu.matmul %110, %149, %cst_48 {dimension_numbers = #tpu.dot_dimension_numbers<[1], [0], [0], [1], [0, 0, 1, 1], [], []>} : vector<8x128xbf16>, vector<128x512xbf16>, vector<8x512xf32> -> vector<8x512xf32>
    %151 = arith.addf %148, %150 : vector<8x512xf32>
    %152 = vector.extract_strided_slice %151 {offsets = [0, 0], sizes = [8, 128], strides = [1, 1]} : vector<8x512xf32> to vector<8x128xf32>
    %153 = arith.negf %152 : vector<8x128xf32>
    %154 = math.exp %153 : vector<8x128xf32>
    %cst_49 = arith.constant 1.000000e+00 : f32
    %155 = vector.broadcast %cst_49 : f32 to vector<8x128xf32>
    %156 = arith.addf %155, %154 : vector<8x128xf32>
    %157 = arith.divf %155, %156 : vector<8x128xf32>
    %158 = vector.extract_strided_slice %151 {offsets = [0, 128], sizes = [8, 128], strides = [1, 1]} : vector<8x512xf32> to vector<8x128xf32>
    %159 = arith.negf %158 : vector<8x128xf32>
    %160 = math.exp %159 : vector<8x128xf32>
    %cst_50 = arith.constant 1.000000e+00 : f32
    %161 = vector.broadcast %cst_50 : f32 to vector<8x128xf32>
    %162 = arith.addf %161, %160 : vector<8x128xf32>
    %163 = arith.divf %161, %162 : vector<8x128xf32>
    %164 = vector.extract_strided_slice %151 {offsets = [0, 256], sizes = [8, 128], strides = [1, 1]} : vector<8x512xf32> to vector<8x128xf32>
    %165 = math.tanh %164 : vector<8x128xf32>
    %166 = vector.extract_strided_slice %151 {offsets = [0, 384], sizes = [8, 128], strides = [1, 1]} : vector<8x512xf32> to vector<8x128xf32>
    %167 = arith.negf %166 : vector<8x128xf32>
    %168 = math.exp %167 : vector<8x128xf32>
    %cst_51 = arith.constant 1.000000e+00 : f32
    %169 = vector.broadcast %cst_51 : f32 to vector<8x128xf32>
    %170 = arith.addf %169, %168 : vector<8x128xf32>
    %171 = arith.divf %169, %170 : vector<8x128xf32>
    %172 = arith.mulf %163, %107 : vector<8x128xf32>
    %173 = arith.mulf %157, %165 : vector<8x128xf32>
    %174 = arith.addf %172, %173 : vector<8x128xf32>
    %175 = math.tanh %174 : vector<8x128xf32>
    %176 = arith.mulf %171, %175 : vector<8x128xf32>
    %177 = arith.truncf %176 : vector<8x128xf32> to vector<8x128xbf16>
    %178 = tpu.concatenate %177, %142 in 1 : vector<8x128xbf16>, vector<8x128xbf16> -> vector<8x256xbf16>
    %c0_52 = arith.constant 0 : index
    %c0_53 = arith.constant 0 : index
    %179 = vector.load %arg4[%c0_52, %c0_53] : memref<256x512xbf16, #tpu.memory_space<vmem>>, vector<256x512xbf16>
    %cst_54 = arith.constant dense<0.000000e+00> : vector<8x512xf32>
    %180 = tpu.matmul %178, %179, %cst_54 {dimension_numbers = #tpu.dot_dimension_numbers<[1], [0], [0], [1], [0, 0, 1, 1], [], []>} : vector<8x256xbf16>, vector<256x512xbf16>, vector<8x512xf32> -> vector<8x512xf32>
    %c0_55 = arith.constant 0 : index
    %c0_56 = arith.constant 0 : index
    %181 = vector.load %arg5[%c0_55, %c0_56] : memref<1x512xf32, #tpu.memory_space<vmem>>, vector<1x512xf32>
    %182 = vector.broadcast %181 : vector<1x512xf32> to vector<8x512xf32>
    %183 = arith.addf %180, %182 : vector<8x512xf32>
    %184 = vector.extract_strided_slice %183 {offsets = [0, 0], sizes = [8, 128], strides = [1, 1]} : vector<8x512xf32> to vector<8x128xf32>
    %185 = arith.negf %184 : vector<8x128xf32>
    %186 = math.exp %185 : vector<8x128xf32>
    %cst_57 = arith.constant 1.000000e+00 : f32
    %187 = vector.broadcast %cst_57 : f32 to vector<8x128xf32>
    %188 = arith.addf %187, %186 : vector<8x128xf32>
    %189 = arith.divf %187, %188 : vector<8x128xf32>
    %190 = vector.extract_strided_slice %183 {offsets = [0, 128], sizes = [8, 128], strides = [1, 1]} : vector<8x512xf32> to vector<8x128xf32>
    %191 = arith.negf %190 : vector<8x128xf32>
    %192 = math.exp %191 : vector<8x128xf32>
    %cst_58 = arith.constant 1.000000e+00 : f32
    %193 = vector.broadcast %cst_58 : f32 to vector<8x128xf32>
    %194 = arith.addf %193, %192 : vector<8x128xf32>
    %195 = arith.divf %193, %194 : vector<8x128xf32>
    %196 = vector.extract_strided_slice %183 {offsets = [0, 256], sizes = [8, 128], strides = [1, 1]} : vector<8x512xf32> to vector<8x128xf32>
    %197 = math.tanh %196 : vector<8x128xf32>
    %198 = vector.extract_strided_slice %183 {offsets = [0, 384], sizes = [8, 128], strides = [1, 1]} : vector<8x512xf32> to vector<8x128xf32>
    %199 = arith.negf %198 : vector<8x128xf32>
    %200 = math.exp %199 : vector<8x128xf32>
    %cst_59 = arith.constant 1.000000e+00 : f32
    %201 = vector.broadcast %cst_59 : f32 to vector<8x128xf32>
    %202 = arith.addf %201, %200 : vector<8x128xf32>
    %203 = arith.divf %201, %202 : vector<8x128xf32>
    %204 = arith.mulf %195, %139 : vector<8x128xf32>
    %205 = arith.mulf %189, %197 : vector<8x128xf32>
    %206 = arith.addf %204, %205 : vector<8x128xf32>
    %207 = math.tanh %206 : vector<8x128xf32>
    %208 = arith.mulf %203, %207 : vector<8x128xf32>
    %209 = arith.truncf %208 : vector<8x128xf32> to vector<8x128xbf16>
    %210 = arith.index_cast %146 : i32 to index
    %c0_60 = arith.constant 0 : index
    %211 = vector.load %arg10[%210, %c0_60] : memref<64x128xf32, #tpu.memory_space<vmem>>, vector<8x128xf32>
    tpu.vector_store %arg10[%210, %c0_60], %208 {strides = array<i32>} : memref<64x128xf32, #tpu.memory_space<vmem>>, vector<8x128xf32>,
    %c3_i32 = arith.constant 3 : i32
    %c8_i32_61 = arith.constant 8 : i32
    %212 = arith.muli %c3_i32, %c8_i32_61 : i32
    %213 = tpu.assume_multiple %212, 8 : i32
    %214 = arith.index_cast %213 : i32 to index
    %c0_62 = arith.constant 0 : index
    %215 = vector.load %arg9[%214, %c0_62] : memref<64x512xf32, #tpu.memory_space<vmem>>, vector<8x512xf32>
    %c0_63 = arith.constant 0 : index
    %c0_64 = arith.constant 0 : index
    %216 = vector.load %arg3[%c0_63, %c0_64] : memref<128x512xbf16, #tpu.memory_space<vmem>>, vector<128x512xbf16>
    %cst_65 = arith.constant dense<0.000000e+00> : vector<8x512xf32>
    %217 = tpu.matmul %177, %216, %cst_65 {dimension_numbers = #tpu.dot_dimension_numbers<[1], [0], [0], [1], [0, 0, 1, 1], [], []>} : vector<8x128xbf16>, vector<128x512xbf16>, vector<8x512xf32> -> vector<8x512xf32>
    %218 = arith.addf %215, %217 : vector<8x512xf32>
    %219 = vector.extract_strided_slice %218 {offsets = [0, 0], sizes = [8, 128], strides = [1, 1]} : vector<8x512xf32> to vector<8x128xf32>
    %220 = arith.negf %219 : vector<8x128xf32>
    %221 = math.exp %220 : vector<8x128xf32>
    %cst_66 = arith.constant 1.000000e+00 : f32
    %222 = vector.broadcast %cst_66 : f32 to vector<8x128xf32>
    %223 = arith.addf %222, %221 : vector<8x128xf32>
    %224 = arith.divf %222, %223 : vector<8x128xf32>
    %225 = vector.extract_strided_slice %218 {offsets = [0, 128], sizes = [8, 128], strides = [1, 1]} : vector<8x512xf32> to vector<8x128xf32>
    %226 = arith.negf %225 : vector<8x128xf32>
    %227 = math.exp %226 : vector<8x128xf32>
    %cst_67 = arith.constant 1.000000e+00 : f32
    %228 = vector.broadcast %cst_67 : f32 to vector<8x128xf32>
    %229 = arith.addf %228, %227 : vector<8x128xf32>
    %230 = arith.divf %228, %229 : vector<8x128xf32>
    %231 = vector.extract_strided_slice %218 {offsets = [0, 256], sizes = [8, 128], strides = [1, 1]} : vector<8x512xf32> to vector<8x128xf32>
    %232 = math.tanh %231 : vector<8x128xf32>
    %233 = vector.extract_strided_slice %218 {offsets = [0, 384], sizes = [8, 128], strides = [1, 1]} : vector<8x512xf32> to vector<8x128xf32>
    %234 = arith.negf %233 : vector<8x128xf32>
    %235 = math.exp %234 : vector<8x128xf32>
    %cst_68 = arith.constant 1.000000e+00 : f32
    %236 = vector.broadcast %cst_68 : f32 to vector<8x128xf32>
    %237 = arith.addf %236, %235 : vector<8x128xf32>
    %238 = arith.divf %236, %237 : vector<8x128xf32>
    %239 = arith.mulf %230, %174 : vector<8x128xf32>
    %240 = arith.mulf %224, %232 : vector<8x128xf32>
    %241 = arith.addf %239, %240 : vector<8x128xf32>
    %242 = math.tanh %241 : vector<8x128xf32>
    %243 = arith.mulf %238, %242 : vector<8x128xf32>
    %244 = arith.truncf %243 : vector<8x128xf32> to vector<8x128xbf16>
    %245 = tpu.concatenate %244, %209 in 1 : vector<8x128xbf16>, vector<8x128xbf16> -> vector<8x256xbf16>
    %c0_69 = arith.constant 0 : index
    %c0_70 = arith.constant 0 : index
    %246 = vector.load %arg4[%c0_69, %c0_70] : memref<256x512xbf16, #tpu.memory_space<vmem>>, vector<256x512xbf16>
    %cst_71 = arith.constant dense<0.000000e+00> : vector<8x512xf32>
    %247 = tpu.matmul %245, %246, %cst_71 {dimension_numbers = #tpu.dot_dimension_numbers<[1], [0], [0], [1], [0, 0, 1, 1], [], []>} : vector<8x256xbf16>, vector<256x512xbf16>, vector<8x512xf32> -> vector<8x512xf32>
    %c0_72 = arith.constant 0 : index
    %c0_73 = arith.constant 0 : index
    %248 = vector.load %arg5[%c0_72, %c0_73] : memref<1x512xf32, #tpu.memory_space<vmem>>, vector<1x512xf32>
    %249 = vector.broadcast %248 : vector<1x512xf32> to vector<8x512xf32>
    %250 = arith.addf %247, %249 : vector<8x512xf32>
    %251 = vector.extract_strided_slice %250 {offsets = [0, 0], sizes = [8, 128], strides = [1, 1]} : vector<8x512xf32> to vector<8x128xf32>
    %252 = arith.negf %251 : vector<8x128xf32>
    %253 = math.exp %252 : vector<8x128xf32>
    %cst_74 = arith.constant 1.000000e+00 : f32
    %254 = vector.broadcast %cst_74 : f32 to vector<8x128xf32>
    %255 = arith.addf %254, %253 : vector<8x128xf32>
    %256 = arith.divf %254, %255 : vector<8x128xf32>
    %257 = vector.extract_strided_slice %250 {offsets = [0, 128], sizes = [8, 128], strides = [1, 1]} : vector<8x512xf32> to vector<8x128xf32>
    %258 = arith.negf %257 : vector<8x128xf32>
    %259 = math.exp %258 : vector<8x128xf32>
    %cst_75 = arith.constant 1.000000e+00 : f32
    %260 = vector.broadcast %cst_75 : f32 to vector<8x128xf32>
    %261 = arith.addf %260, %259 : vector<8x128xf32>
    %262 = arith.divf %260, %261 : vector<8x128xf32>
    %263 = vector.extract_strided_slice %250 {offsets = [0, 256], sizes = [8, 128], strides = [1, 1]} : vector<8x512xf32> to vector<8x128xf32>
    %264 = math.tanh %263 : vector<8x128xf32>
    %265 = vector.extract_strided_slice %250 {offsets = [0, 384], sizes = [8, 128], strides = [1, 1]} : vector<8x512xf32> to vector<8x128xf32>
    %266 = arith.negf %265 : vector<8x128xf32>
    %267 = math.exp %266 : vector<8x128xf32>
    %cst_76 = arith.constant 1.000000e+00 : f32
    %268 = vector.broadcast %cst_76 : f32 to vector<8x128xf32>
    %269 = arith.addf %268, %267 : vector<8x128xf32>
    %270 = arith.divf %268, %269 : vector<8x128xf32>
    %271 = arith.mulf %262, %206 : vector<8x128xf32>
    %272 = arith.mulf %256, %264 : vector<8x128xf32>
    %273 = arith.addf %271, %272 : vector<8x128xf32>
    %274 = math.tanh %273 : vector<8x128xf32>
    %275 = arith.mulf %270, %274 : vector<8x128xf32>
    %276 = arith.truncf %275 : vector<8x128xf32> to vector<8x128xbf16>
    %277 = arith.index_cast %213 : i32 to index
    %c0_77 = arith.constant 0 : index
    %278 = vector.load %arg10[%277, %c0_77] : memref<64x128xf32, #tpu.memory_space<vmem>>, vector<8x128xf32>
    tpu.vector_store %arg10[%277, %c0_77], %275 {strides = array<i32>} : memref<64x128xf32, #tpu.memory_space<vmem>>, vector<8x128xf32>,
    %c4_i32 = arith.constant 4 : i32
    %c8_i32_78 = arith.constant 8 : i32
    %279 = arith.muli %c4_i32, %c8_i32_78 : i32
    %280 = tpu.assume_multiple %279, 8 : i32
    %281 = arith.index_cast %280 : i32 to index
    %c0_79 = arith.constant 0 : index
    %282 = vector.load %arg9[%281, %c0_79] : memref<64x512xf32, #tpu.memory_space<vmem>>, vector<8x512xf32>
    %c0_80 = arith.constant 0 : index
    %c0_81 = arith.constant 0 : index
    %283 = vector.load %arg3[%c0_80, %c0_81] : memref<128x512xbf16, #tpu.memory_space<vmem>>, vector<128x512xbf16>
    %cst_82 = arith.constant dense<0.000000e+00> : vector<8x512xf32>
    %284 = tpu.matmul %244, %283, %cst_82 {dimension_numbers = #tpu.dot_dimension_numbers<[1], [0], [0], [1], [0, 0, 1, 1], [], []>} : vector<8x128xbf16>, vector<128x512xbf16>, vector<8x512xf32> -> vector<8x512xf32>
    %285 = arith.addf %282, %284 : vector<8x512xf32>
    %286 = vector.extract_strided_slice %285 {offsets = [0, 0], sizes = [8, 128], strides = [1, 1]} : vector<8x512xf32> to vector<8x128xf32>
    %287 = arith.negf %286 : vector<8x128xf32>
    %288 = math.exp %287 : vector<8x128xf32>
    %cst_83 = arith.constant 1.000000e+00 : f32
    %289 = vector.broadcast %cst_83 : f32 to vector<8x128xf32>
    %290 = arith.addf %289, %288 : vector<8x128xf32>
    %291 = arith.divf %289, %290 : vector<8x128xf32>
    %292 = vector.extract_strided_slice %285 {offsets = [0, 128], sizes = [8, 128], strides = [1, 1]} : vector<8x512xf32> to vector<8x128xf32>
    %293 = arith.negf %292 : vector<8x128xf32>
    %294 = math.exp %293 : vector<8x128xf32>
    %cst_84 = arith.constant 1.000000e+00 : f32
    %295 = vector.broadcast %cst_84 : f32 to vector<8x128xf32>
    %296 = arith.addf %295, %294 : vector<8x128xf32>
    %297 = arith.divf %295, %296 : vector<8x128xf32>
    %298 = vector.extract_strided_slice %285 {offsets = [0, 256], sizes = [8, 128], strides = [1, 1]} : vector<8x512xf32> to vector<8x128xf32>
    %299 = math.tanh %298 : vector<8x128xf32>
    %300 = vector.extract_strided_slice %285 {offsets = [0, 384], sizes = [8, 128], strides = [1, 1]} : vector<8x512xf32> to vector<8x128xf32>
    %301 = arith.negf %300 : vector<8x128xf32>
    %302 = math.exp %301 : vector<8x128xf32>
    %cst_85 = arith.constant 1.000000e+00 : f32
    %303 = vector.broadcast %cst_85 : f32 to vector<8x128xf32>
    %304 = arith.addf %303, %302 : vector<8x128xf32>
    %305 = arith.divf %303, %304 : vector<8x128xf32>
    %306 = arith.mulf %297, %241 : vector<8x128xf32>
    %307 = arith.mulf %291, %299 : vector<8x128xf32>
    %308 = arith.addf %306, %307 : vector<8x128xf32>
    %309 = math.tanh %308 : vector<8x128xf32>
    %310 = arith.mulf %305, %309 : vector<8x128xf32>
    %311 = arith.truncf %310 : vector<8x128xf32> to vector<8x128xbf16>
    %312 = tpu.concatenate %311, %276 in 1 : vector<8x128xbf16>, vector<8x128xbf16> -> vector<8x256xbf16>
    %c0_86 = arith.constant 0 : index
    %c0_87 = arith.constant 0 : index
    %313 = vector.load %arg4[%c0_86, %c0_87] : memref<256x512xbf16, #tpu.memory_space<vmem>>, vector<256x512xbf16>
    %cst_88 = arith.constant dense<0.000000e+00> : vector<8x512xf32>
    %314 = tpu.matmul %312, %313, %cst_88 {dimension_numbers = #tpu.dot_dimension_numbers<[1], [0], [0], [1], [0, 0, 1, 1], [], []>} : vector<8x256xbf16>, vector<256x512xbf16>, vector<8x512xf32> -> vector<8x512xf32>
    %c0_89 = arith.constant 0 : index
    %c0_90 = arith.constant 0 : index
    %315 = vector.load %arg5[%c0_89, %c0_90] : memref<1x512xf32, #tpu.memory_space<vmem>>, vector<1x512xf32>
    %316 = vector.broadcast %315 : vector<1x512xf32> to vector<8x512xf32>
    %317 = arith.addf %314, %316 : vector<8x512xf32>
    %318 = vector.extract_strided_slice %317 {offsets = [0, 0], sizes = [8, 128], strides = [1, 1]} : vector<8x512xf32> to vector<8x128xf32>
    %319 = arith.negf %318 : vector<8x128xf32>
    %320 = math.exp %319 : vector<8x128xf32>
    %cst_91 = arith.constant 1.000000e+00 : f32
    %321 = vector.broadcast %cst_91 : f32 to vector<8x128xf32>
    %322 = arith.addf %321, %320 : vector<8x128xf32>
    %323 = arith.divf %321, %322 : vector<8x128xf32>
    %324 = vector.extract_strided_slice %317 {offsets = [0, 128], sizes = [8, 128], strides = [1, 1]} : vector<8x512xf32> to vector<8x128xf32>
    %325 = arith.negf %324 : vector<8x128xf32>
    %326 = math.exp %325 : vector<8x128xf32>
    %cst_92 = arith.constant 1.000000e+00 : f32
    %327 = vector.broadcast %cst_92 : f32 to vector<8x128xf32>
    %328 = arith.addf %327, %326 : vector<8x128xf32>
    %329 = arith.divf %327, %328 : vector<8x128xf32>
    %330 = vector.extract_strided_slice %317 {offsets = [0, 256], sizes = [8, 128], strides = [1, 1]} : vector<8x512xf32> to vector<8x128xf32>
    %331 = math.tanh %330 : vector<8x128xf32>
    %332 = vector.extract_strided_slice %317 {offsets = [0, 384], sizes = [8, 128], strides = [1, 1]} : vector<8x512xf32> to vector<8x128xf32>
    %333 = arith.negf %332 : vector<8x128xf32>
    %334 = math.exp %333 : vector<8x128xf32>
    %cst_93 = arith.constant 1.000000e+00 : f32
    %335 = vector.broadcast %cst_93 : f32 to vector<8x128xf32>
    %336 = arith.addf %335, %334 : vector<8x128xf32>
    %337 = arith.divf %335, %336 : vector<8x128xf32>
    %338 = arith.mulf %329, %273 : vector<8x128xf32>
    %339 = arith.mulf %323, %331 : vector<8x128xf32>
    %340 = arith.addf %338, %339 : vector<8x128xf32>
    %341 = math.tanh %340 : vector<8x128xf32>
    %342 = arith.mulf %337, %341 : vector<8x128xf32>
    %343 = arith.truncf %342 : vector<8x128xf32> to vector<8x128xbf16>
    %344 = arith.index_cast %280 : i32 to index
    %c0_94 = arith.constant 0 : index
    %345 = vector.load %arg10[%344, %c0_94] : memref<64x128xf32, #tpu.memory_space<vmem>>, vector<8x128xf32>
    tpu.vector_store %arg10[%344, %c0_94], %342 {strides = array<i32>} : memref<64x128xf32, #tpu.memory_space<vmem>>, vector<8x128xf32>,
    %c5_i32 = arith.constant 5 : i32
    %c8_i32_95 = arith.constant 8 : i32
    %346 = arith.muli %c5_i32, %c8_i32_95 : i32
    %347 = tpu.assume_multiple %346, 8 : i32
    %348 = arith.index_cast %347 : i32 to index
    %c0_96 = arith.constant 0 : index
    %349 = vector.load %arg9[%348, %c0_96] : memref<64x512xf32, #tpu.memory_space<vmem>>, vector<8x512xf32>
    %c0_97 = arith.constant 0 : index
    %c0_98 = arith.constant 0 : index
    %350 = vector.load %arg3[%c0_97, %c0_98] : memref<128x512xbf16, #tpu.memory_space<vmem>>, vector<128x512xbf16>
    %cst_99 = arith.constant dense<0.000000e+00> : vector<8x512xf32>
    %351 = tpu.matmul %311, %350, %cst_99 {dimension_numbers = #tpu.dot_dimension_numbers<[1], [0], [0], [1], [0, 0, 1, 1], [], []>} : vector<8x128xbf16>, vector<128x512xbf16>, vector<8x512xf32> -> vector<8x512xf32>
    %352 = arith.addf %349, %351 : vector<8x512xf32>
    %353 = vector.extract_strided_slice %352 {offsets = [0, 0], sizes = [8, 128], strides = [1, 1]} : vector<8x512xf32> to vector<8x128xf32>
    %354 = arith.negf %353 : vector<8x128xf32>
    %355 = math.exp %354 : vector<8x128xf32>
    %cst_100 = arith.constant 1.000000e+00 : f32
    %356 = vector.broadcast %cst_100 : f32 to vector<8x128xf32>
    %357 = arith.addf %356, %355 : vector<8x128xf32>
    %358 = arith.divf %356, %357 : vector<8x128xf32>
    %359 = vector.extract_strided_slice %352 {offsets = [0, 128], sizes = [8, 128], strides = [1, 1]} : vector<8x512xf32> to vector<8x128xf32>
    %360 = arith.negf %359 : vector<8x128xf32>
    %361 = math.exp %360 : vector<8x128xf32>
    %cst_101 = arith.constant 1.000000e+00 : f32
    %362 = vector.broadcast %cst_101 : f32 to vector<8x128xf32>
    %363 = arith.addf %362, %361 : vector<8x128xf32>
    %364 = arith.divf %362, %363 : vector<8x128xf32>
    %365 = vector.extract_strided_slice %352 {offsets = [0, 256], sizes = [8, 128], strides = [1, 1]} : vector<8x512xf32> to vector<8x128xf32>
    %366 = math.tanh %365 : vector<8x128xf32>
    %367 = vector.extract_strided_slice %352 {offsets = [0, 384], sizes = [8, 128], strides = [1, 1]} : vector<8x512xf32> to vector<8x128xf32>
    %368 = arith.negf %367 : vector<8x128xf32>
    %369 = math.exp %368 : vector<8x128xf32>
    %cst_102 = arith.constant 1.000000e+00 : f32
    %370 = vector.broadcast %cst_102 : f32 to vector<8x128xf32>
    %371 = arith.addf %370, %369 : vector<8x128xf32>
    %372 = arith.divf %370, %371 : vector<8x128xf32>
    %373 = arith.mulf %364, %308 : vector<8x128xf32>
    %374 = arith.mulf %358, %366 : vector<8x128xf32>
    %375 = arith.addf %373, %374 : vector<8x128xf32>
    %376 = math.tanh %375 : vector<8x128xf32>
    %377 = arith.mulf %372, %376 : vector<8x128xf32>
    %378 = arith.truncf %377 : vector<8x128xf32> to vector<8x128xbf16>
    %379 = tpu.concatenate %378, %343 in 1 : vector<8x128xbf16>, vector<8x128xbf16> -> vector<8x256xbf16>
    %c0_103 = arith.constant 0 : index
    %c0_104 = arith.constant 0 : index
    %380 = vector.load %arg4[%c0_103, %c0_104] : memref<256x512xbf16, #tpu.memory_space<vmem>>, vector<256x512xbf16>
    %cst_105 = arith.constant dense<0.000000e+00> : vector<8x512xf32>
    %381 = tpu.matmul %379, %380, %cst_105 {dimension_numbers = #tpu.dot_dimension_numbers<[1], [0], [0], [1], [0, 0, 1, 1], [], []>} : vector<8x256xbf16>, vector<256x512xbf16>, vector<8x512xf32> -> vector<8x512xf32>
    %c0_106 = arith.constant 0 : index
    %c0_107 = arith.constant 0 : index
    %382 = vector.load %arg5[%c0_106, %c0_107] : memref<1x512xf32, #tpu.memory_space<vmem>>, vector<1x512xf32>
    %383 = vector.broadcast %382 : vector<1x512xf32> to vector<8x512xf32>
    %384 = arith.addf %381, %383 : vector<8x512xf32>
    %385 = vector.extract_strided_slice %384 {offsets = [0, 0], sizes = [8, 128], strides = [1, 1]} : vector<8x512xf32> to vector<8x128xf32>
    %386 = arith.negf %385 : vector<8x128xf32>
    %387 = math.exp %386 : vector<8x128xf32>
    %cst_108 = arith.constant 1.000000e+00 : f32
    %388 = vector.broadcast %cst_108 : f32 to vector<8x128xf32>
    %389 = arith.addf %388, %387 : vector<8x128xf32>
    %390 = arith.divf %388, %389 : vector<8x128xf32>
    %391 = vector.extract_strided_slice %384 {offsets = [0, 128], sizes = [8, 128], strides = [1, 1]} : vector<8x512xf32> to vector<8x128xf32>
    %392 = arith.negf %391 : vector<8x128xf32>
    %393 = math.exp %392 : vector<8x128xf32>
    %cst_109 = arith.constant 1.000000e+00 : f32
    %394 = vector.broadcast %cst_109 : f32 to vector<8x128xf32>
    %395 = arith.addf %394, %393 : vector<8x128xf32>
    %396 = arith.divf %394, %395 : vector<8x128xf32>
    %397 = vector.extract_strided_slice %384 {offsets = [0, 256], sizes = [8, 128], strides = [1, 1]} : vector<8x512xf32> to vector<8x128xf32>
    %398 = math.tanh %397 : vector<8x128xf32>
    %399 = vector.extract_strided_slice %384 {offsets = [0, 384], sizes = [8, 128], strides = [1, 1]} : vector<8x512xf32> to vector<8x128xf32>
    %400 = arith.negf %399 : vector<8x128xf32>
    %401 = math.exp %400 : vector<8x128xf32>
    %cst_110 = arith.constant 1.000000e+00 : f32
    %402 = vector.broadcast %cst_110 : f32 to vector<8x128xf32>
    %403 = arith.addf %402, %401 : vector<8x128xf32>
    %404 = arith.divf %402, %403 : vector<8x128xf32>
    %405 = arith.mulf %396, %340 : vector<8x128xf32>
    %406 = arith.mulf %390, %398 : vector<8x128xf32>
    %407 = arith.addf %405, %406 : vector<8x128xf32>
    %408 = math.tanh %407 : vector<8x128xf32>
    %409 = arith.mulf %404, %408 : vector<8x128xf32>
    %410 = arith.truncf %409 : vector<8x128xf32> to vector<8x128xbf16>
    %411 = arith.index_cast %347 : i32 to index
    %c0_111 = arith.constant 0 : index
    %412 = vector.load %arg10[%411, %c0_111] : memref<64x128xf32, #tpu.memory_space<vmem>>, vector<8x128xf32>
    tpu.vector_store %arg10[%411, %c0_111], %409 {strides = array<i32>} : memref<64x128xf32, #tpu.memory_space<vmem>>, vector<8x128xf32>,
    %c6_i32 = arith.constant 6 : i32
    %c8_i32_112 = arith.constant 8 : i32
    %413 = arith.muli %c6_i32, %c8_i32_112 : i32
    %414 = tpu.assume_multiple %413, 8 : i32
    %415 = arith.index_cast %414 : i32 to index
    %c0_113 = arith.constant 0 : index
    %416 = vector.load %arg9[%415, %c0_113] : memref<64x512xf32, #tpu.memory_space<vmem>>, vector<8x512xf32>
    %c0_114 = arith.constant 0 : index
    %c0_115 = arith.constant 0 : index
    %417 = vector.load %arg3[%c0_114, %c0_115] : memref<128x512xbf16, #tpu.memory_space<vmem>>, vector<128x512xbf16>
    %cst_116 = arith.constant dense<0.000000e+00> : vector<8x512xf32>
    %418 = tpu.matmul %378, %417, %cst_116 {dimension_numbers = #tpu.dot_dimension_numbers<[1], [0], [0], [1], [0, 0, 1, 1], [], []>} : vector<8x128xbf16>, vector<128x512xbf16>, vector<8x512xf32> -> vector<8x512xf32>
    %419 = arith.addf %416, %418 : vector<8x512xf32>
    %420 = vector.extract_strided_slice %419 {offsets = [0, 0], sizes = [8, 128], strides = [1, 1]} : vector<8x512xf32> to vector<8x128xf32>
    %421 = arith.negf %420 : vector<8x128xf32>
    %422 = math.exp %421 : vector<8x128xf32>
    %cst_117 = arith.constant 1.000000e+00 : f32
    %423 = vector.broadcast %cst_117 : f32 to vector<8x128xf32>
    %424 = arith.addf %423, %422 : vector<8x128xf32>
    %425 = arith.divf %423, %424 : vector<8x128xf32>
    %426 = vector.extract_strided_slice %419 {offsets = [0, 128], sizes = [8, 128], strides = [1, 1]} : vector<8x512xf32> to vector<8x128xf32>
    %427 = arith.negf %426 : vector<8x128xf32>
    %428 = math.exp %427 : vector<8x128xf32>
    %cst_118 = arith.constant 1.000000e+00 : f32
    %429 = vector.broadcast %cst_118 : f32 to vector<8x128xf32>
    %430 = arith.addf %429, %428 : vector<8x128xf32>
    %431 = arith.divf %429, %430 : vector<8x128xf32>
    %432 = vector.extract_strided_slice %419 {offsets = [0, 256], sizes = [8, 128], strides = [1, 1]} : vector<8x512xf32> to vector<8x128xf32>
    %433 = math.tanh %432 : vector<8x128xf32>
    %434 = vector.extract_strided_slice %419 {offsets = [0, 384], sizes = [8, 128], strides = [1, 1]} : vector<8x512xf32> to vector<8x128xf32>
    %435 = arith.negf %434 : vector<8x128xf32>
    %436 = math.exp %435 : vector<8x128xf32>
    %cst_119 = arith.constant 1.000000e+00 : f32
    %437 = vector.broadcast %cst_119 : f32 to vector<8x128xf32>
    %438 = arith.addf %437, %436 : vector<8x128xf32>
    %439 = arith.divf %437, %438 : vector<8x128xf32>
    %440 = arith.mulf %431, %375 : vector<8x128xf32>
    %441 = arith.mulf %425, %433 : vector<8x128xf32>
    %442 = arith.addf %440, %441 : vector<8x128xf32>
    %443 = math.tanh %442 : vector<8x128xf32>
    %444 = arith.mulf %439, %443 : vector<8x128xf32>
    %445 = arith.truncf %444 : vector<8x128xf32> to vector<8x128xbf16>
    %446 = tpu.concatenate %445, %410 in 1 : vector<8x128xbf16>, vector<8x128xbf16> -> vector<8x256xbf16>
    %c0_120 = arith.constant 0 : index
    %c0_121 = arith.constant 0 : index
    %447 = vector.load %arg4[%c0_120, %c0_121] : memref<256x512xbf16, #tpu.memory_space<vmem>>, vector<256x512xbf16>
    %cst_122 = arith.constant dense<0.000000e+00> : vector<8x512xf32>
    %448 = tpu.matmul %446, %447, %cst_122 {dimension_numbers = #tpu.dot_dimension_numbers<[1], [0], [0], [1], [0, 0, 1, 1], [], []>} : vector<8x256xbf16>, vector<256x512xbf16>, vector<8x512xf32> -> vector<8x512xf32>
    %c0_123 = arith.constant 0 : index
    %c0_124 = arith.constant 0 : index
    %449 = vector.load %arg5[%c0_123, %c0_124] : memref<1x512xf32, #tpu.memory_space<vmem>>, vector<1x512xf32>
    %450 = vector.broadcast %449 : vector<1x512xf32> to vector<8x512xf32>
    %451 = arith.addf %448, %450 : vector<8x512xf32>
    %452 = vector.extract_strided_slice %451 {offsets = [0, 0], sizes = [8, 128], strides = [1, 1]} : vector<8x512xf32> to vector<8x128xf32>
    %453 = arith.negf %452 : vector<8x128xf32>
    %454 = math.exp %453 : vector<8x128xf32>
    %cst_125 = arith.constant 1.000000e+00 : f32
    %455 = vector.broadcast %cst_125 : f32 to vector<8x128xf32>
    %456 = arith.addf %455, %454 : vector<8x128xf32>
    %457 = arith.divf %455, %456 : vector<8x128xf32>
    %458 = vector.extract_strided_slice %451 {offsets = [0, 128], sizes = [8, 128], strides = [1, 1]} : vector<8x512xf32> to vector<8x128xf32>
    %459 = arith.negf %458 : vector<8x128xf32>
    %460 = math.exp %459 : vector<8x128xf32>
    %cst_126 = arith.constant 1.000000e+00 : f32
    %461 = vector.broadcast %cst_126 : f32 to vector<8x128xf32>
    %462 = arith.addf %461, %460 : vector<8x128xf32>
    %463 = arith.divf %461, %462 : vector<8x128xf32>
    %464 = vector.extract_strided_slice %451 {offsets = [0, 256], sizes = [8, 128], strides = [1, 1]} : vector<8x512xf32> to vector<8x128xf32>
    %465 = math.tanh %464 : vector<8x128xf32>
    %466 = vector.extract_strided_slice %451 {offsets = [0, 384], sizes = [8, 128], strides = [1, 1]} : vector<8x512xf32> to vector<8x128xf32>
    %467 = arith.negf %466 : vector<8x128xf32>
    %468 = math.exp %467 : vector<8x128xf32>
    %cst_127 = arith.constant 1.000000e+00 : f32
    %469 = vector.broadcast %cst_127 : f32 to vector<8x128xf32>
    %470 = arith.addf %469, %468 : vector<8x128xf32>
    %471 = arith.divf %469, %470 : vector<8x128xf32>
    %472 = arith.mulf %463, %407 : vector<8x128xf32>
    %473 = arith.mulf %457, %465 : vector<8x128xf32>
    %474 = arith.addf %472, %473 : vector<8x128xf32>
    %475 = math.tanh %474 : vector<8x128xf32>
    %476 = arith.mulf %471, %475 : vector<8x128xf32>
    %477 = arith.truncf %476 : vector<8x128xf32> to vector<8x128xbf16>
    %478 = arith.index_cast %414 : i32 to index
    %c0_128 = arith.constant 0 : index
    %479 = vector.load %arg10[%478, %c0_128] : memref<64x128xf32, #tpu.memory_space<vmem>>, vector<8x128xf32>
    tpu.vector_store %arg10[%478, %c0_128], %476 {strides = array<i32>} : memref<64x128xf32, #tpu.memory_space<vmem>>, vector<8x128xf32>,
    %c7_i32 = arith.constant 7 : i32
    %c8_i32_129 = arith.constant 8 : i32
    %480 = arith.muli %c7_i32, %c8_i32_129 : i32
    %481 = tpu.assume_multiple %480, 8 : i32
    %482 = arith.index_cast %481 : i32 to index
    %c0_130 = arith.constant 0 : index
    %483 = vector.load %arg9[%482, %c0_130] : memref<64x512xf32, #tpu.memory_space<vmem>>, vector<8x512xf32>
    %c0_131 = arith.constant 0 : index
    %c0_132 = arith.constant 0 : index
    %484 = vector.load %arg3[%c0_131, %c0_132] : memref<128x512xbf16, #tpu.memory_space<vmem>>, vector<128x512xbf16>
    %cst_133 = arith.constant dense<0.000000e+00> : vector<8x512xf32>
    %485 = tpu.matmul %445, %484, %cst_133 {dimension_numbers = #tpu.dot_dimension_numbers<[1], [0], [0], [1], [0, 0, 1, 1], [], []>} : vector<8x128xbf16>, vector<128x512xbf16>, vector<8x512xf32> -> vector<8x512xf32>
    %486 = arith.addf %483, %485 : vector<8x512xf32>
    %487 = vector.extract_strided_slice %486 {offsets = [0, 0], sizes = [8, 128], strides = [1, 1]} : vector<8x512xf32> to vector<8x128xf32>
    %488 = arith.negf %487 : vector<8x128xf32>
    %489 = math.exp %488 : vector<8x128xf32>
    %cst_134 = arith.constant 1.000000e+00 : f32
    %490 = vector.broadcast %cst_134 : f32 to vector<8x128xf32>
    %491 = arith.addf %490, %489 : vector<8x128xf32>
    %492 = arith.divf %490, %491 : vector<8x128xf32>
    %493 = vector.extract_strided_slice %486 {offsets = [0, 128], sizes = [8, 128], strides = [1, 1]} : vector<8x512xf32> to vector<8x128xf32>
    %494 = arith.negf %493 : vector<8x128xf32>
    %495 = math.exp %494 : vector<8x128xf32>
    %cst_135 = arith.constant 1.000000e+00 : f32
    %496 = vector.broadcast %cst_135 : f32 to vector<8x128xf32>
    %497 = arith.addf %496, %495 : vector<8x128xf32>
    %498 = arith.divf %496, %497 : vector<8x128xf32>
    %499 = vector.extract_strided_slice %486 {offsets = [0, 256], sizes = [8, 128], strides = [1, 1]} : vector<8x512xf32> to vector<8x128xf32>
    %500 = math.tanh %499 : vector<8x128xf32>
    %501 = vector.extract_strided_slice %486 {offsets = [0, 384], sizes = [8, 128], strides = [1, 1]} : vector<8x512xf32> to vector<8x128xf32>
    %502 = arith.negf %501 : vector<8x128xf32>
    %503 = math.exp %502 : vector<8x128xf32>
    %cst_136 = arith.constant 1.000000e+00 : f32
    %504 = vector.broadcast %cst_136 : f32 to vector<8x128xf32>
    %505 = arith.addf %504, %503 : vector<8x128xf32>
    %506 = arith.divf %504, %505 : vector<8x128xf32>
    %507 = arith.mulf %498, %442 : vector<8x128xf32>
    %508 = arith.mulf %492, %500 : vector<8x128xf32>
    %509 = arith.addf %507, %508 : vector<8x128xf32>
    %510 = math.tanh %509 : vector<8x128xf32>
    %511 = arith.mulf %506, %510 : vector<8x128xf32>
    %512 = arith.truncf %511 : vector<8x128xf32> to vector<8x128xbf16>
    %513 = tpu.concatenate %512, %477 in 1 : vector<8x128xbf16>, vector<8x128xbf16> -> vector<8x256xbf16>
    %c0_137 = arith.constant 0 : index
    %c0_138 = arith.constant 0 : index
    %514 = vector.load %arg4[%c0_137, %c0_138] : memref<256x512xbf16, #tpu.memory_space<vmem>>, vector<256x512xbf16>
    %cst_139 = arith.constant dense<0.000000e+00> : vector<8x512xf32>
    %515 = tpu.matmul %513, %514, %cst_139 {dimension_numbers = #tpu.dot_dimension_numbers<[1], [0], [0], [1], [0, 0, 1, 1], [], []>} : vector<8x256xbf16>, vector<256x512xbf16>, vector<8x512xf32> -> vector<8x512xf32>
    %c0_140 = arith.constant 0 : index
    %c0_141 = arith.constant 0 : index
    %516 = vector.load %arg5[%c0_140, %c0_141] : memref<1x512xf32, #tpu.memory_space<vmem>>, vector<1x512xf32>
    %517 = vector.broadcast %516 : vector<1x512xf32> to vector<8x512xf32>
    %518 = arith.addf %515, %517 : vector<8x512xf32>
    %519 = vector.extract_strided_slice %518 {offsets = [0, 0], sizes = [8, 128], strides = [1, 1]} : vector<8x512xf32> to vector<8x128xf32>
    %520 = arith.negf %519 : vector<8x128xf32>
    %521 = math.exp %520 : vector<8x128xf32>
    %cst_142 = arith.constant 1.000000e+00 : f32
    %522 = vector.broadcast %cst_142 : f32 to vector<8x128xf32>
    %523 = arith.addf %522, %521 : vector<8x128xf32>
    %524 = arith.divf %522, %523 : vector<8x128xf32>
    %525 = vector.extract_strided_slice %518 {offsets = [0, 128], sizes = [8, 128], strides = [1, 1]} : vector<8x512xf32> to vector<8x128xf32>
    %526 = arith.negf %525 : vector<8x128xf32>
    %527 = math.exp %526 : vector<8x128xf32>
    %cst_143 = arith.constant 1.000000e+00 : f32
    %528 = vector.broadcast %cst_143 : f32 to vector<8x128xf32>
    %529 = arith.addf %528, %527 : vector<8x128xf32>
    %530 = arith.divf %528, %529 : vector<8x128xf32>
    %531 = vector.extract_strided_slice %518 {offsets = [0, 256], sizes = [8, 128], strides = [1, 1]} : vector<8x512xf32> to vector<8x128xf32>
    %532 = math.tanh %531 : vector<8x128xf32>
    %533 = vector.extract_strided_slice %518 {offsets = [0, 384], sizes = [8, 128], strides = [1, 1]} : vector<8x512xf32> to vector<8x128xf32>
    %534 = arith.negf %533 : vector<8x128xf32>
    %535 = math.exp %534 : vector<8x128xf32>
    %cst_144 = arith.constant 1.000000e+00 : f32
    %536 = vector.broadcast %cst_144 : f32 to vector<8x128xf32>
    %537 = arith.addf %536, %535 : vector<8x128xf32>
    %538 = arith.divf %536, %537 : vector<8x128xf32>
    %539 = arith.mulf %530, %474 : vector<8x128xf32>
    %540 = arith.mulf %524, %532 : vector<8x128xf32>
    %541 = arith.addf %539, %540 : vector<8x128xf32>
    %542 = math.tanh %541 : vector<8x128xf32>
    %543 = arith.mulf %538, %542 : vector<8x128xf32>
    %544 = arith.truncf %543 : vector<8x128xf32> to vector<8x128xbf16>
    %545 = arith.index_cast %481 : i32 to index
    %c0_145 = arith.constant 0 : index
    %546 = vector.load %arg10[%545, %c0_145] : memref<64x128xf32, #tpu.memory_space<vmem>>, vector<8x128xf32>
    tpu.vector_store %arg10[%545, %c0_145], %543 {strides = array<i32>} : memref<64x128xf32, #tpu.memory_space<vmem>>, vector<8x128xf32>,
    %c8_i32_146 = arith.constant 8 : i32
    %c0_147 = arith.constant 0 : index
    %c0_148 = arith.constant 0 : index
    %547 = vector.load %arg10[%c0_147, %c0_148] : memref<64x128xf32, #tpu.memory_space<vmem>>, vector<64x128xf32>
    %c0_149 = arith.constant 0 : index
    %c0_150 = arith.constant 0 : index
    %548 = vector.load %arg6[%c0_149, %c0_150] : memref<128x4xf32, #tpu.memory_space<vmem>>, vector<128x4xf32>
    %cst_151 = arith.constant dense<0.000000e+00> : vector<64x4xf32>
    %549 = tpu.matmul %547, %548, %cst_151 {dimension_numbers = #tpu.dot_dimension_numbers<[1], [0], [0], [1], [0, 0, 1, 1], [], []>} : vector<64x128xf32>, vector<128x4xf32>, vector<64x4xf32> -> vector<64x4xf32>
    %c0_152 = arith.constant 0 : index
    %c0_153 = arith.constant 0 : index
    %550 = vector.load %arg7[%c0_152, %c0_153] : memref<1x4xf32, #tpu.memory_space<vmem>>, vector<1x4xf32>
    %551 = vector.broadcast %550 : vector<1x4xf32> to vector<64x4xf32>
    %552 = arith.addf %549, %551 : vector<64x4xf32>
    %c0_154 = arith.constant 0 : index
    %c0_155 = arith.constant 0 : index
    %553 = vector.load %arg8[%c0_154, %c0_155] : memref<64x4xf32, #tpu.memory_space<vmem>>, vector<64x4xf32>
    tpu.vector_store %arg8[%c0_154, %c0_155], %552 {strides = array<i32>} : memref<64x4xf32, #tpu.memory_space<vmem>>, vector<64x4xf32>,
    return
  }
}

</mosaic_0001>

<bundles_post_ra>
// kernel: tpu_custom_call.1
= control target key start
LH: loop header
LB: loop body
LE: loop exit
PB: predicated region body
PF: predicated region fallthrough
CT: control target
= control target key end

     0   :  { %13 = vsyncpa [#allocation5], 0  ;;  %s10866_s0 = inlined_call_operand.vmem [shape: bf16[64,8], index: 0, kind: input, shape index: {}]   ;;  %s10867_s1 = inlined_call_operand.vmem [shape: bf16[8,512], index: 1, kind: input, shape index: {}]   ;;  %s10868_s2 = inlined_call_operand.vmem [shape: f32[1,512], index: 2, kind: input, shape index: {}]   ;;  %s10869_s3 = inlined_call_operand.hbm [shape: bf16[128,512], index: 3, kind: input, shape index: {}]   ;;  %s10870_s4 = inlined_call_operand.hbm [shape: bf16[256,512], index: 4, kind: input, shape index: {}]   ;;  %s10871_s5 = inlined_call_operand.vmem [shape: f32[1,512], index: 5, kind: input, shape index: {}]   ;;  %s10872_s6 = inlined_call_operand.vmem [shape: f32[128,4], index: 6, kind: input, shape index: {}]   ;;  %s10873_s7 = inlined_call_operand.vmem [shape: f32[1,4], index: 7, kind: input, shape index: {}]   ;;  %s10874_s8 = inlined_call_operand.vmem [shape: f32[64,4], index: 8, kind: output, shape index: {}]  }
   0x1   :  { %14 = vsyncpa [#allocation7], 0  ;;  %s8939_s27 = smov [#allocation4]   ;;  %s8891_s9 = scalar_lea.hbm %s10869_s3, 4096 }
   0x2   :  { %s26_s28 = sshll.u32 %s8939_s27, 4  ;;  %p8892_p0 = scmp.ne.s32.totalorder %s10869_s3, %s8891_s9  ;;  %s27_s28 = int_to_ptr.vmem [resolvable:$true] %s26_s28 }
   0x3   :  { %p8895_p1 = scmp.lt.u32.totalorder %s8891_s9, %s10869_s3 }
   0x5   :  { %p8897_p2 = pnand %p8895_p1, %p8892_p0 }
   0x7   :  { %8900 = shalt.err (!%p8897_p2)
}
   0x8   :  { %s8901_s14 = scalar_lea.vmem %s27_s28, 4096  ;;  %p8906_p4 = scmp.lt.s32.totalorder %s27_s28, %s27_s28 }
   0x9   :  { %p8902_p3 = scmp.ne.s32.totalorder %s27_s28, %s8901_s14  ;;  %p8907_p5 = scmp.lt.s32.totalorder %s8901_s14, %s8901_s14 }
   0xb   :  { %p8908_p6 = por %p8907_p5, %p8906_p4 }
   0xd   :  { %p8909_p7 = pnand %p8908_p6, %p8902_p3 }
   0xf   :  { %8912 = shalt.err (!%p8909_p7)
}
  0x10   :  { %s8940_s15 = smov 256   ;;  %s8941_s16 = smov 16  }
  0x11   :  { %32 = dma.hbm_to_vmem [thread:$0]  %s10869_s3, 4096, %s27_s28, [#allocation5], %s8940_s15, %s8940_s15, %s8941_s16  }
  0x12   :  { %s8942_s19 = smov [#allocation6]   ;;  %s8913_s23 = scalar_lea.hbm %s10870_s4, 8192 }
  0x13   :  { %s38_s20 = sshll.u32 %s8942_s19, 4  ;;  %p8914_p8 = scmp.ne.s32.totalorder %s10870_s4, %s8913_s23  ;;  %s39_s20 = int_to_ptr.vmem [resolvable:$true] %s38_s20 }
  0x14   :  { %p8917_p9 = scmp.lt.u32.totalorder %s8913_s23, %s10870_s4 }
  0x16   :  { %p8919_p10 = pnand %p8917_p9, %p8914_p8 }
  0x18   :  { %8922 = shalt.err (!%p8919_p10)
}
  0x19   :  { %s8923_s29 = scalar_lea.vmem %s39_s20, 8192  ;;  %p8928_p12 = scmp.lt.s32.totalorder %s39_s20, %s39_s20 }
  0x1a   :  { %p8924_p11 = scmp.ne.s32.totalorder %s39_s20, %s8923_s29  ;;  %p8929_p13 = scmp.lt.s32.totalorder %s8923_s29, %s8923_s29 }
  0x1c   :  { %p8930_p0 = por %p8929_p13, %p8928_p12 }
  0x1e   :  { %p8931_p1 = pnand %p8930_p0, %p8924_p11 }
  0x20   :  { %8934 = shalt.err (!%p8931_p1)
}
  0x21   :  { %44 = dma.hbm_to_vmem [thread:$0]  %s10870_s4, 8192, %s39_s20, [#allocation7], %s8940_s15, %s8940_s15, %s8941_s16  }
  0x22   :  { %8935 = dma.done.wait [#allocation5], 4096  }
  0x23   :  { %8936 = vsyncadd [#allocation5], 4294963200 }
  0x24   :  { %8937 = dma.done.wait [#allocation7], 8192  }
  0x25   :  { %8938 = vsyncadd [#allocation7], 4294959104  ;;  %v10875_v0 = vmov 0   ;;  %v67_v1 = vld [vmem:[%s10867_s1 + $0x8] sm:$0xff]  ;;  %vm133_vm0 = vcmask 1043456   ;;  %v8022_v6 = vld [vmem:[%s10866_s0] sm:$0xff]  }
  0x26   :  { %251 = vmatprep.mubr.bf16.mxu1 %v10875_v0  ;;  %178 = vmatprep.mubr.bf16.mxu0 %v10875_v0  ;;  %v7087_v2 = vcombine.high %v67_v1, %v67_v1  ;;  %v7086_v3 = vcombine.low %v67_v1, %v67_v1  ;;  %v8025_v4 = vld [vmem:[#allocation4 + $0x4] ss:$16 sps:$4 sm:$0xff]   ;;  %vm120_vm1 = vcmask 64512   ;;  %v8023_v7 = vld [vmem:[#allocation4] ss:$16 sps:$4 sm:$0xff]   ;;  %v8029_v11 = vld [vmem:[%s10866_s0 + $0x8] sm:$0xff]  }
  0x27   :  { %v8028_v8 = vld [vmem:[#allocation4 + $0x24] ss:$16 sps:$4 sm:$0xff]   ;;  %v8026_v9 = vld [vmem:[#allocation4 + $0x20] ss:$16 sps:$4 sm:$0xff]   ;;  %v8043_v24 = vld [vmem:[%s10866_s0 + $0x18] sm:$0xff]   ;;  %vm7058_vm2 = vcmask 31744  }
  0x28   :  { %7093 = vmatprep.subr.msk.bf16.mxu1 %vm133_vm0, %v7087_v2  ;;  %v141_v5 = vsel %vm133_vm0, %v7086_v3, 0  ;;  %v8032_v10 = vld [vmem:[#allocation4 + $0x44] ss:$16 sps:$4 sm:$0xff]   ;;  %v8030_v12 = vld [vmem:[#allocation4 + $0x40] ss:$16 sps:$4 sm:$0xff]  }
  0x29   :  { %220 = vmatpush1.bf16.msra.mxu1 %v141_v5  ;;  %v8035_v13 = vld [vmem:[#allocation4 + $0x64] ss:$16 sps:$4 sm:$0xff]   ;;  %v8033_v17 = vld [vmem:[#allocation4 + $0x60] ss:$16 sps:$4 sm:$0xff]   ;;  %v9048_v29 = vld [vmem:[#allocation4 + $0xc] ss:$16 sps:$4 sm:$0xff]  }
  0x2a   :  { %523 = vmatprep.subr.bf16.mxu1 %v8025_v4  ;;  %v66_v14 = vld [vmem:[%s10867_s1] sm:$0xff]  ;;  %v8036_v20 = vld [vmem:[%s10866_s0 + $0x10] sm:$0xff]   ;;  %v8052_v30 = vld [vmem:[#allocation4 + $0x8] ss:$16 sps:$4 sm:$0xff]  }
  0x2b   :  { %v7085_v15 = vcombine.high %v66_v14, %v66_v14  ;;  %v7084_v16 = vcombine.low %v66_v14, %v66_v14  ;;  %v8039_v19 = vld [vmem:[#allocation4 + $0x84] ss:$16 sps:$4 sm:$0xff]   ;;  %v8037_v21 = vld [vmem:[#allocation4 + $0x80] ss:$16 sps:$4 sm:$0xff]   ;;  %v8057_v31 = vld [vmem:[#allocation4 + $0x2c] ss:$16 sps:$4 sm:$0xff]  }
  0x2c   :  { %7094 = vmatmul.mubr.msk.bf16.vlgmr.msra.gmra.mrb[0].mxu1 %vm120_vm1, %v8022_v6  ;;  %v8042_v22 = vld [vmem:[#allocation4 + $0xa4] ss:$16 sps:$4 sm:$0xff]   ;;  %v8040_v23 = vld [vmem:[#allocation4 + $0xa0] ss:$16 sps:$4 sm:$0xff]   ;;  %v8055_v32 = vld [vmem:[#allocation4 + $0x28] ss:$16 sps:$4 sm:$0xff]  }
  0x2d   :  { %524 = vmatpush1.bf16.msra.mxu1 %v8023_v7  ;;  %261 = vmatprep.mubr.bf16.mxu1 %v10875_v0  ;;  %v135_v18 = vsel %vm133_vm0, %v7084_v16, 0  ;;  %v8046_v25 = vld [vmem:[#allocation4 + $0xc4] ss:$16 sps:$4 sm:$0xff]   ;;  %v8044_v26 = vld [vmem:[#allocation4 + $0xc0] ss:$16 sps:$4 sm:$0xff]  }
  0x2e   :  { %525 = vmatprep.subr.bf16.mxu1 %v8028_v8  ;;  %7088 = vmatprep.subr.msk.bf16.mxu0 %vm133_vm0, %v7085_v15  ;;  %v8051_v27 = vld [vmem:[#allocation4 + $0xe4] ss:$16 sps:$4 sm:$0xff]   ;;  %v8049_v28 = vld [vmem:[#allocation4 + $0xe0] ss:$16 sps:$4 sm:$0xff]   ;;  %v8060_v33 = vld [vmem:[#allocation4 + $0x4c] ss:$16 sps:$4 sm:$0xff]  }
  0x2f   :  { %147 = vmatpush1.bf16.msra.mxu0 %v135_v18  ;;  %v8058_v34 = vld [vmem:[#allocation4 + $0x48] ss:$16 sps:$4 sm:$0xff]   ;;  %v8063_v35 = vld [vmem:[#allocation4 + $0x6c] ss:$16 sps:$4 sm:$0xff]   ;;  %v9060_v45 = vld [vmem:[#allocation6 + $0x4] ss:$16 sps:$4 sm:$0xff]  }
  0x30   :  { %v8061_v36 = vld [vmem:[#allocation4 + $0x68] ss:$16 sps:$4 sm:$0xff]   ;;  %v8066_v37 = vld [vmem:[#allocation4 + $0x8c] ss:$16 sps:$4 sm:$0xff]   ;;  %v9064_v47 = vld [vmem:[#allocation6] ss:$16 sps:$4 sm:$0xff]   ;;  %1040 = vmatprep.subr.bf16.mxu0 %v9060_v45 }
  0x31   :  { %526 = vmatpush1.bf16.msra.mxu1 %v8026_v9  ;;  %v8064_v38 = vld [vmem:[#allocation4 + $0x88] ss:$16 sps:$4 sm:$0xff]   ;;  %v8069_v39 = vld [vmem:[#allocation4 + $0xac] ss:$16 sps:$4 sm:$0xff]   ;;  %v9072_v49 = vld [vmem:[#allocation6 + $0x24] ss:$16 sps:$4 sm:$0xff]  }
  0x32   :  { %527 = vmatprep.subr.bf16.mxu1 %v8032_v10  ;;  %7089 = vmatmul.mubr.msk.bf16.vlgmr.msra.gmra.mrb[0].mxu0 %vm120_vm1, %v8022_v6  ;;  %v8067_v40 = vld [vmem:[#allocation4 + $0xa8] ss:$16 sps:$4 sm:$0xff]   ;;  %v8072_v41 = vld [vmem:[#allocation4 + $0xcc] ss:$16 sps:$4 sm:$0xff]   ;;  %v9076_v51 = vld [vmem:[#allocation6 + $0x20] ss:$16 sps:$4 sm:$0xff]  }
  0x33   :  { %188 = vmatprep.mubr.bf16.mxu0 %v10875_v0  ;;  %v8070_v42 = vld [vmem:[#allocation4 + $0xc8] ss:$16 sps:$4 sm:$0xff]   ;;  %v8075_v43 = vld [vmem:[#allocation4 + $0xec] ss:$16 sps:$4 sm:$0xff]   ;;  %1041 = vmatpush1.bf16.msra.mxu0 %v9064_v47  ;;  %v9084_v53 = vld [vmem:[#allocation6 + $0x44] ss:$16 sps:$4 sm:$0xff]  }
  0x34   :  { %7095 = vmatmul.mubr.msk.bf16.gmra.mrb[4].mxu1 %vm120_vm1, %v8029_v11  ;;  %v8073_v44 = vld [vmem:[#allocation4 + $0xe8] ss:$16 sps:$4 sm:$0xff]   ;;  %v9062_v46 = vld [vmem:[#allocation6 + $0xc] ss:$16 sps:$4 sm:$0xff]   ;;  %1042 = vmatprep.subr.bf16.mxu0 %v9072_v49  ;;  %v9088_v55 = vld [vmem:[#allocation6 + $0x40] ss:$16 sps:$4 sm:$0xff]  }
  0x35   :  { %528 = vmatpush1.bf16.msra.mxu1 %v8030_v12  ;;  %271 = vmatprep.mubr.bf16.mxu1 %v10875_v0  ;;  %v9066_v48 = vld [vmem:[#allocation6 + $0x8] ss:$16 sps:$4 sm:$0xff]   ;;  %v9074_v50 = vld [vmem:[#allocation6 + $0x2c] ss:$16 sps:$4 sm:$0xff]   ;;  %v9096_v57 = vld [vmem:[#allocation6 + $0x64] ss:$16 sps:$4 sm:$0xff]  }
  0x36   :  { %529 = vmatprep.subr.bf16.mxu1 %v8035_v13  ;;  %v9078_v52 = vld [vmem:[#allocation6 + $0x28] ss:$16 sps:$4 sm:$0xff]   ;;  %v9086_v54 = vld [vmem:[#allocation6 + $0x4c] ss:$16 sps:$4 sm:$0xff]   ;;  %v9100_v59 = vld [vmem:[#allocation6 + $0x60] ss:$16 sps:$4 sm:$0xff]  }
  0x37   :  { %1043 = vmatpush1.bf16.msra.mxu0 %v9076_v51  ;;  %v9090_v56 = vld [vmem:[#allocation6 + $0x48] ss:$16 sps:$4 sm:$0xff]   ;;  %v9098_v58 = vld [vmem:[#allocation6 + $0x6c] ss:$16 sps:$4 sm:$0xff]   ;;  %v9108_v61 = vld [vmem:[#allocation6 + $0x84] ss:$16 sps:$4 sm:$0xff]  }
  0x38   :  { %1044 = vmatprep.subr.bf16.mxu0 %v9084_v53  ;;  %v9102_v60 = vld [vmem:[#allocation6 + $0x68] ss:$16 sps:$4 sm:$0xff]   ;;  %v9110_v62 = vld [vmem:[#allocation6 + $0x8c] ss:$16 sps:$4 sm:$0xff]   ;;  %v9112_v63 = vld [vmem:[#allocation6 + $0x80] ss:$16 sps:$4 sm:$0xff]  }
  0x39   :  { %530 = vmatpush1.bf16.msra.mxu1 %v8033_v17  ;;  %v9114_v1 = vld [vmem:[#allocation6 + $0x88] ss:$16 sps:$4 sm:$0xff]   ;;  %v9120_v2 = vld [vmem:[#allocation6 + $0xa4] ss:$16 sps:$4 sm:$0xff]   ;;  %v9122_v3 = vld [vmem:[#allocation6 + $0xac] ss:$16 sps:$4 sm:$0xff]  }
  0x3a   :  { %531 = vmatprep.subr.bf16.mxu1 %v8039_v19  ;;  %7090 = vmatmul.mubr.msk.bf16.gmra.mrb[4].mxu0 %vm120_vm1, %v8029_v11  ;;  %v9124_v4 = vld [vmem:[#allocation6 + $0xa0] ss:$16 sps:$4 sm:$0xff]   ;;  %v9126_v5 = vld [vmem:[#allocation6 + $0xa8] ss:$16 sps:$4 sm:$0xff]   ;;  %v9132_v6 = vld [vmem:[#allocation6 + $0xc4] ss:$16 sps:$4 sm:$0xff]  }
  0x3b   :  { %198 = vmatprep.mubr.bf16.mxu0 %v10875_v0  ;;  %1045 = vmatpush1.bf16.msra.mxu0 %v9088_v55  ;;  %v9134_v7 = vld [vmem:[#allocation6 + $0xcc] ss:$16 sps:$4 sm:$0xff]   ;;  %v9136_v8 = vld [vmem:[#allocation6 + $0xc0] ss:$16 sps:$4 sm:$0xff]   ;;  %v9138_v9 = vld [vmem:[#allocation6 + $0xc8] ss:$16 sps:$4 sm:$0xff]  }
  0x3c   :  { %7096 = vmatmul.mubr.msk.bf16.gmra.mrb[8].mxu1 %vm120_vm1, %v8036_v20  ;;  %1046 = vmatprep.subr.bf16.mxu0 %v9096_v57  ;;  %v9144_v10 = vld [vmem:[#allocation6 + $0xe4] ss:$16 sps:$4 sm:$0xff]   ;;  %v9146_v11 = vld [vmem:[#allocation6 + $0xec] ss:$16 sps:$4 sm:$0xff]   ;;  %v9148_v12 = vld [vmem:[#allocation6 + $0xe0] ss:$16 sps:$4 sm:$0xff]  }
  0x3d   :  { %532 = vmatpush1.bf16.msra.mxu1 %v8037_v21  ;;  %281 = vmatprep.mubr.bf16.mxu1 %v10875_v0  ;;  %v9150_v13 = vld [vmem:[#allocation6 + $0xe8] ss:$16 sps:$4 sm:$0xff]   ;;  %v9156_v14 = vld [vmem:[#allocation6 + $0x104] ss:$16 sps:$4 sm:$0xff]   ;;  %v9158_v15 = vld [vmem:[#allocation6 + $0x10c] ss:$16 sps:$4 sm:$0xff]  }
  0x3e   :  { %533 = vmatprep.subr.bf16.mxu1 %v8042_v22  ;;  %v9160_v16 = vld [vmem:[#allocation6 + $0x100] ss:$16 sps:$4 sm:$0xff]   ;;  %v9162_v17 = vld [vmem:[#allocation6 + $0x108] ss:$16 sps:$4 sm:$0xff]   ;;  %v9168_v18 = vld [vmem:[#allocation6 + $0x124] ss:$16 sps:$4 sm:$0xff]  }
  0x3f   :  { %1047 = vmatpush1.bf16.msra.mxu0 %v9100_v59  ;;  %v9170_v19 = vld [vmem:[#allocation6 + $0x12c] ss:$16 sps:$4 sm:$0xff]   ;;  %v9174_v21 = vld [vmem:[#allocation6 + $0x128] ss:$16 sps:$4 sm:$0xff]   ;;  %v9180_v22 = vld [vmem:[#allocation6 + $0x144] ss:$16 sps:$4 sm:$0xff]  }
  0x40   :  { %1048 = vmatprep.subr.bf16.mxu0 %v9108_v61  ;;  %11089 = vst [vmem:[#allocation10_spill] sm:$0xff] %v9174_v21  ;;  %11090 = vst [vmem:[#allocation11_spill] sm:$0xff] %v9180_v22 }
  0x41   :  { %534 = vmatpush1.bf16.msra.mxu1 %v8040_v23  ;;  %v9182_v23 = vld [vmem:[#allocation6 + $0x14c] ss:$16 sps:$4 sm:$0xff]  }
  0x42   :  { %535 = vmatprep.subr.bf16.mxu1 %v8046_v25  ;;  %7091 = vmatmul.mubr.msk.bf16.gmra.mrb[8].mxu0 %vm120_vm1, %v8036_v20  ;;  %v9172_v20 = vld [vmem:[#allocation6 + $0x120] ss:$16 sps:$4 sm:$0xff]   ;;  %11091 = vst [vmem:[#allocation12_spill] sm:$0xff] %v9182_v23  ;;  %v9186_v25 = vld [vmem:[#allocation6 + $0x148] ss:$16 sps:$4 sm:$0xff]  }
  0x43   :  { %208 = vmatprep.mubr.bf16.mxu0 %v10875_v0  ;;  %1049 = vmatpush1.bf16.msra.mxu0 %v9112_v63  ;;  %11093 = vst [vmem:[#allocation14_spill] sm:$0xff] %v9186_v25 }
  0x44   :  { %7097 = vmatmul.mubr.msk.bf16.gmra.mrb[12].mxu1 %vm120_vm1, %v8043_v24  ;;  %1050 = vmatprep.subr.bf16.mxu0 %v9120_v2 }
  0x45   :  { %536 = vmatpush1.bf16.msra.mxu1 %v8044_v26  ;;  %555 = vmatprep.mubr.bf16.mxu1 %v10875_v0  ;;  %v9192_v26 = vld [vmem:[#allocation6 + $0x164] ss:$16 sps:$4 sm:$0xff]  }
  0x46   :  { %537 = vmatprep.subr.bf16.mxu1 %v8051_v27  ;;  %11094 = vst [vmem:[#allocation15_spill] sm:$0xff] %v9192_v26  ;;  %v9194_v27 = vld [vmem:[#allocation6 + $0x16c] ss:$16 sps:$4 sm:$0xff]  }
  0x47   :  { %1051 = vmatpush1.bf16.msra.mxu0 %v9124_v4  ;;  %11095 = vst [vmem:[#allocation16_spill] sm:$0xff] %v9194_v27 }
  0x48   :  { %1052 = vmatprep.subr.bf16.mxu0 %v9132_v6 }
  0x49   :  { %538 = vmatpush1.bf16.msra.mxu1 %v8049_v28  ;;  %v9196_v28 = vld [vmem:[#allocation6 + $0x160] ss:$16 sps:$4 sm:$0xff]  }
  0x4a   :  { %564 = vmatprep.subr.bf16.mxu1 %v9048_v29  ;;  %7092 = vmatmul.mubr.msk.bf16.gmra.mrb[12].mxu0 %vm120_vm1, %v8043_v24  ;;  %v9184_v24 = vld [vmem:[#allocation6 + $0x140] ss:$16 sps:$4 sm:$0xff]   ;;  %11096 = vst [vmem:[#allocation17_spill] sm:$0xff] %v9196_v28 }
  0x4b   :  { %1072 = vmatprep.mubr.bf16.mxu0 %v10875_v0  ;;  %1053 = vmatpush1.bf16.msra.mxu0 %v9136_v8  ;;  %11092 = vst [vmem:[#allocation13_spill] sm:$0xff] %v9184_v24 }
  0x4c   :  { %556 = vmatmul.mubr.bf16.vlgmr.msra.gmra.mrb[16].mxu1 %v10875_v0  ;;  %1054 = vmatprep.subr.bf16.mxu0 %v9144_v10 }
  0x4d   :  { %565 = vmatpush1.bf16.msra.mxu1 %v8052_v30  ;;  %596 = vmatprep.mubr.bf16.mxu1 %v10875_v0  ;;  %v9198_v30 = vld [vmem:[#allocation6 + $0x168] ss:$16 sps:$4 sm:$0xff]  }
  0x4e   :  { %566 = vmatprep.subr.bf16.mxu1 %v8057_v31  ;;  %11097 = vst [vmem:[#allocation18_spill] sm:$0xff] %v9198_v30  ;;  %v9204_v31 = vld [vmem:[#allocation6 + $0x184] ss:$16 sps:$4 sm:$0xff]  }
  0x4f   :  { %1055 = vmatpush1.bf16.msra.mxu0 %v9148_v12  ;;  %11098 = vst [vmem:[#allocation19_spill] sm:$0xff] %v9204_v31 }
  0x50   :  { %1056 = vmatprep.subr.bf16.mxu0 %v9156_v14 }
  0x51   :  { %567 = vmatpush1.bf16.msra.mxu1 %v8055_v32  ;;  %v9206_v32 = vld [vmem:[#allocation6 + $0x18c] ss:$16 sps:$4 sm:$0xff]  }
  0x52   :  { %568 = vmatprep.subr.bf16.mxu1 %v8060_v33  ;;  %11099 = vst [vmem:[#allocation20_spill] sm:$0xff] %v9206_v32  ;;  %v9208_v33 = vld [vmem:[#allocation6 + $0x180] ss:$16 sps:$4 sm:$0xff]  }
  0x53   :  { %1057 = vmatpush1.bf16.msra.mxu0 %v9160_v16  ;;  %11100 = vst [vmem:[#allocation21_spill] sm:$0xff] %v9208_v33 }
  0x54   :  { %1058 = vmatprep.subr.bf16.mxu0 %v9168_v18 }
  0x55   :  { %569 = vmatpush1.bf16.msra.mxu1 %v8058_v34  ;;  %v9210_v34 = vld [vmem:[#allocation6 + $0x188] ss:$16 sps:$4 sm:$0xff]  }
  0x56   :  { %570 = vmatprep.subr.bf16.mxu1 %v8063_v35  ;;  %11101 = vst [vmem:[#allocation22_spill] sm:$0xff] %v9210_v34  ;;  %v9216_v35 = vld [vmem:[#allocation6 + $0x1a0] ss:$16 sps:$4 sm:$0xff]  }
  0x57   :  { %1059 = vmatpush1.bf16.msra.mxu0 %v9172_v20  ;;  %11102 = vst [vmem:[#allocation23_spill] sm:$0xff] %v9216_v35 }
  0x58   :  { %1060 = vmatprep.subr.bf16.mxu0 %v9180_v22 }
  0x59   :  { %571 = vmatpush1.bf16.msra.mxu1 %v8061_v36  ;;  %v9218_v36 = vld [vmem:[#allocation6 + $0x1a4] ss:$16 sps:$4 sm:$0xff]  }
  0x5a   :  { %572 = vmatprep.subr.bf16.mxu1 %v8066_v37  ;;  %11103 = vst [vmem:[#allocation24_spill] sm:$0xff] %v9218_v36  ;;  %v9220_v37 = vld [vmem:[#allocation6 + $0x1a8] ss:$16 sps:$4 sm:$0xff]  }
  0x5b   :  { %1061 = vmatpush1.bf16.msra.mxu0 %v9184_v24  ;;  %11104 = vst [vmem:[#allocation25_spill] sm:$0xff] %v9220_v37 }
  0x5c   :  { %1062 = vmatprep.subr.bf16.mxu0 %v9192_v26 }
  0x5d   :  { %573 = vmatpush1.bf16.msra.mxu1 %v8064_v38  ;;  %v9222_v38 = vld [vmem:[#allocation6 + $0x1ac] ss:$16 sps:$4 sm:$0xff]  }
  0x5e   :  { %574 = vmatprep.subr.bf16.mxu1 %v8069_v39  ;;  %11105 = vst [vmem:[#allocation26_spill] sm:$0xff] %v9222_v38  ;;  %v9224_v39 = vld [vmem:[#allocation6 + $0x1c4] ss:$16 sps:$4 sm:$0xff]  }
  0x5f   :  { %1063 = vmatpush1.bf16.msra.mxu0 %v9196_v28  ;;  %11106 = vst [vmem:[#allocation27_spill] sm:$0xff] %v9224_v39 }
  0x60   :  { %1064 = vmatprep.subr.bf16.mxu0 %v9204_v31 }
  0x61   :  { %575 = vmatpush1.bf16.msra.mxu1 %v8067_v40  ;;  %v9227_v40 = vld [vmem:[#allocation6 + $0x1cc] ss:$16 sps:$4 sm:$0xff]  }
  0x62   :  { %576 = vmatprep.subr.bf16.mxu1 %v8072_v41  ;;  %11107 = vst [vmem:[#allocation28_spill] sm:$0xff] %v9227_v40  ;;  %v9231_v41 = vld [vmem:[#allocation6 + $0x1c0] ss:$16 sps:$4 sm:$0xff]  }
  0x63   :  { %1065 = vmatpush1.bf16.msra.mxu0 %v9208_v33  ;;  %11108 = vst [vmem:[#allocation29_spill] sm:$0xff] %v9231_v41 }
  0x64   :  { %1066 = vmatprep.subr.bf16.mxu0 %v9218_v36 }
  0x65   :  { %577 = vmatpush1.bf16.msra.mxu1 %v8070_v42  ;;  %v9235_v42 = vld [vmem:[#allocation6 + $0x1c8] ss:$16 sps:$4 sm:$0xff]  }
  0x66   :  { %578 = vmatprep.subr.bf16.mxu1 %v8075_v43  ;;  %11109 = vst [vmem:[#allocation30_spill] sm:$0xff] %v9235_v42  ;;  %v9237_v43 = vld [vmem:[#allocation6 + $0x1e4] ss:$16 sps:$4 sm:$0xff]  }
  0x67   :  { %1067 = vmatpush1.bf16.msra.mxu0 %v9216_v35  ;;  %11110 = vst [vmem:[#allocation31_spill] sm:$0xff] %v9237_v43  ;;  %v9247_v35 = vld [vmem:[#allocation6 + $0x1e8] ss:$16 sps:$4 sm:$0xff]  }
  0x68   :  { %1068 = vmatprep.subr.bf16.mxu0 %v9224_v39  ;;  %11113 = vst [vmem:[#allocation34_spill] sm:$0xff] %v9247_v35  ;;  %v8860_v39 = vld [vmem:[#allocation4 + $0x4] ss:$16 sps:$4 sm:$0xff]  }
  0x69   :  { %579 = vmatpush1.bf16.msra.mxu1 %v8073_v44  ;;  %v9240_v44 = vld [vmem:[#allocation6 + $0x1ec] ss:$16 sps:$4 sm:$0xff]  }
  0x6a   :  { %1081 = vmatprep.subr.bf16.mxu1 %v9062_v46  ;;  %11111 = vst [vmem:[#allocation32_spill] sm:$0xff] %v9240_v44 }
  0x6b   :  { %1069 = vmatpush1.bf16.msra.mxu0 %v9231_v41 }
  0x6c   :  { %597 = vmatmul.mubr.bf16.vlgmr.msra.gmra.mrb[20].mxu1 %v10875_v0  ;;  %1070 = vmatprep.subr.bf16.mxu0 %v9237_v43  ;;  %v68_v43 = vld [vmem:[%s10868_s2] sm:$0xf] }
  0x6d   :  { %1113 = vmatprep.mubr.bf16.mxu1 %v10875_v0  ;;  %1082 = vmatpush1.bf16.msra.mxu1 %v9066_v48  ;;  %v9243_v0 = vld [vmem:[#allocation6 + $0x1e0] ss:$16 sps:$4 sm:$0xff]  }
  0x6e   :  { %1083 = vmatprep.subr.bf16.mxu1 %v9074_v50  ;;  %11112 = vst [vmem:[#allocation33_spill] sm:$0xff] %v9243_v0 }
  0x6f   :  { %1071 = vmatpush1.bf16.msra.mxu0 %v9243_v0 }
  0x70   :  { %1347 = vmatprep.subr.bf16.mxu0 %v8860_v39 }
  0x71   :  { %1084 = vmatpush1.bf16.msra.mxu1 %v9078_v52 }
  0x72   :  { %1085 = vmatprep.subr.bf16.mxu1 %v9086_v54 }
  0x75   :  { %1086 = vmatpush1.bf16.msra.mxu1 %v9090_v56 }
  0x76   :  { %1087 = vmatprep.subr.bf16.mxu1 %v9098_v58 }
  0x79   :  { %1088 = vmatpush1.bf16.msra.mxu1 %v9102_v60 }
  0x7a   :  { %1089 = vmatprep.subr.bf16.mxu1 %v9110_v62 }
  0x7d   :  { %1090 = vmatpush1.bf16.msra.mxu1 %v9114_v1 }
  0x7e   :  { %1091 = vmatprep.subr.bf16.mxu1 %v9122_v3 }
  0x81   :  { %1092 = vmatpush1.bf16.msra.mxu1 %v9126_v5 }
  0x82   :  { %1093 = vmatprep.subr.bf16.mxu1 %v9134_v7 }
  0x85   :  { %1094 = vmatpush1.bf16.msra.mxu1 %v9138_v9 }
  0x86   :  { %1095 = vmatprep.subr.bf16.mxu1 %v9146_v11 }
  0x89   :  { %1096 = vmatpush1.bf16.msra.mxu1 %v9150_v13 }
  0x8a   :  { %1097 = vmatprep.subr.bf16.mxu1 %v9158_v15 }
  0x8d   :  { %1098 = vmatpush1.bf16.msra.mxu1 %v9162_v17 }
  0x8e   :  { %1099 = vmatprep.subr.bf16.mxu1 %v9170_v19 }
  0x91   :  { %1100 = vmatpush1.bf16.msra.mxu1 %v9174_v21 }
  0x92   :  { %1101 = vmatprep.subr.bf16.mxu1 %v9182_v23 }
  0x95   :  { %1102 = vmatpush1.bf16.msra.mxu1 %v9186_v25 }
  0x96   :  { %1103 = vmatprep.subr.bf16.mxu1 %v9194_v27 }
  0x99   :  { %1104 = vmatpush1.bf16.msra.mxu1 %v9198_v30 }
  0x9a   :  { %1105 = vmatprep.subr.bf16.mxu1 %v9206_v32 }
  0x9d   :  { %1106 = vmatpush1.bf16.msra.mxu1 %v9210_v34 }
  0x9e   :  { %1107 = vmatprep.subr.bf16.mxu1 %v9222_v38 }
  0xa1   :  { %1108 = vmatpush1.bf16.msra.mxu1 %v9220_v37 }
  0xa2   :  { %1109 = vmatprep.subr.bf16.mxu1 %v9227_v40  ;;  %v70_v40 = vlaneseq }
  0xa4   :  { %v71_v41 = vshrl.u32 %v70_v40, 7 }
  0xa5   :  { %1110 = vmatpush1.bf16.msra.mxu1 %v9235_v42 }
  0xa6   :  { %1111 = vmatprep.subr.bf16.mxu1 %v9240_v44  ;;  %v9253_v37 = vsub.s32 2, %v71_v41  ;;  %v9258_v42 = vsub.s32 3, %v71_v41  ;;  %v9285_v28 = vsub.s32 0, %v71_v41 }
  0xa8   :  { %11114 = vst [vmem:[#allocation35_spill] sm:$0xff] %v9253_v37  ;;  %11115 = vst [vmem:[#allocation36_spill] sm:$0xff] %v9258_v42  ;;  %v9261_v44 = vrot.slane %v68_v43, %v9253_v37  ;;  %v9268_v39 = vrot.slane %v68_v43, %v9258_v42 }
  0xa9   :  { %1112 = vmatpush1.bf16.msra.mxu1 %v9247_v35  ;;  %11121 = vst [vmem:[#allocation42_spill] sm:$0xff] %v9285_v28 }
  0xaa   :  { %1388 = vmatprep.subr.bf16.mxu1 %v9048_v29 }
  0xff   :  { %v9263_v0 = vpop.f32.mrb[0].mxu1 }
 0x100   :  { %v9265_v35 = vpop.f32.mrb[1].mxu1 }
 0x101   :  { %v257_v29 = vpop.f32.mrb[2].mxu1 }
 0x102   :  { %v9271_v40 = vadd.f32 %v257_v29, %v9261_v44  ;;  %v259_v38 = vpop.f32.mrb[3].mxu1 }
 0x103   :  { %v9274_v36 = vadd.f32 %v259_v38, %v9268_v39  ;;  %v9290_v38 = vsub.s32 1, %v71_v41 }
 0x104   :  { %11116 = vst [vmem:[#allocation37_spill] sm:$0xff] %v9271_v40 }
 0x105   :  { %11117 = vst [vmem:[#allocation38_spill] sm:$0xff] %v9274_v36  ;;  %11123 = vst [vmem:[#allocation44_spill] sm:$0xff] %v9290_v38  ;;  %v180_v36 = vpop.f32.mrb[0].mxu0 }
 0x107   :  { %v263_v34 = vpop.f32.mrb[4].mxu1 }
 0x108   :  { %v9277_v33 = vadd.f32 %v263_v34, %v9261_v44  ;;  %v265_v37 = vpop.f32.mrb[5].mxu1  ;;  %v73_v34 = vrot.slane %v68_v43, %v9285_v28 }
 0x109   :  { %v9280_v32 = vadd.f32 %v265_v37, %v9268_v39  ;;  %v267_v31 = vpop.f32.mrb[6].mxu1  ;;  %v77_v37 = vrot.slane %v68_v43, %v9290_v38 }
 0x10a   :  { %11118 = vst [vmem:[#allocation39_spill] sm:$0xff] %v9277_v33  ;;  %v9283_v42 = vadd.f32 %v267_v31, %v9261_v44  ;;  %v269_v30 = vpop.f32.mrb[7].mxu1  ;;  %v182_v33 = vpop.f32.mrb[1].mxu0 }
 0x10b   :  { %11119 = vst [vmem:[#allocation40_spill] sm:$0xff] %v9280_v32  ;;  %v9288_v29 = vadd.f32 %v269_v30, %v9268_v39  ;;  %v184_v32 = vpop.f32.mrb[2].mxu0 }
 0x10c   :  { %11120 = vst [vmem:[#allocation41_spill] sm:$0xff] %v9283_v42  ;;  %v9297_v42 = vadd.f32 %v184_v32, %v73_v34  ;;  %v186_v26 = vpop.f32.mrb[3].mxu0 }
 0x10d   :  { %11122 = vst [vmem:[#allocation43_spill] sm:$0xff] %v9288_v29  ;;  %v9302_v29 = vadd.f32 %v186_v26, %v77_v37  ;;  %v190_v38 = vpop.f32.mrb[4].mxu0 }
 0x10e   :  { %11125 = vst [vmem:[#allocation46_spill] sm:$0xff] %v9297_v42 }
 0x10f   :  { %v273_v40 = vpop.f32.mrb[8].mxu1  ;;  %11127 = vst [vmem:[#allocation48_spill] sm:$0xff] %v9302_v29 }
 0x110   :  { %v9295_v27 = vadd.f32 %v273_v40, %v9261_v44  ;;  %v275_v31 = vpop.f32.mrb[9].mxu1  ;;  %v9310_v40 = vadd.f32 %v190_v38, %v73_v34 }
 0x111   :  { %v9300_v30 = vadd.f32 %v275_v31, %v9268_v39  ;;  %v277_v41 = vpop.f32.mrb[10].mxu1 }
 0x112   :  { %11124 = vst [vmem:[#allocation45_spill] sm:$0xff] %v9295_v27  ;;  %v9305_v28 = vadd.f32 %v277_v41, %v9261_v44  ;;  %v279_v25 = vpop.f32.mrb[11].mxu1  ;;  %11130 = vst [vmem:[#allocation51_spill] sm:$0xff] %v9310_v40  ;;  %v192_v27 = vpop.f32.mrb[5].mxu0 }
 0x113   :  { %11126 = vst [vmem:[#allocation47_spill] sm:$0xff] %v9300_v30  ;;  %v9308_v43 = vadd.f32 %v279_v25, %v9268_v39  ;;  %v9312_v42 = vadd.f32 %v192_v27, %v77_v37  ;;  %v194_v24 = vpop.f32.mrb[6].mxu0 }
 0x114   :  { %11128 = vst [vmem:[#allocation49_spill] sm:$0xff] %v9305_v28  ;;  %v9317_v30 = vadd.f32 %v194_v24, %v73_v34  ;;  %v196_v41 = vpop.f32.mrb[7].mxu0 }
 0x115   :  { %11129 = vst [vmem:[#allocation50_spill] sm:$0xff] %v9308_v43  ;;  %11131 = vst [vmem:[#allocation52_spill] sm:$0xff] %v9312_v42  ;;  %v9322_v43 = vadd.f32 %v196_v41, %v77_v37  ;;  %v181_v42 = vadd.f32 %v180_v36, %v73_v34 }
 0x116   :  { %11133 = vst [vmem:[#allocation54_spill] sm:$0xff] %v9317_v30 }
 0x117   :  { %v283_v32 = vpop.f32.mrb[12].mxu1  ;;  %11135 = vst [vmem:[#allocation56_spill] sm:$0xff] %v9322_v43 }
 0x118   :  { %v9315_v31 = vadd.f32 %v283_v32, %v9261_v44  ;;  %v285_v26 = vpop.f32.mrb[13].mxu1  ;;  %v183_v32 = vadd.f32 %v182_v33, %v77_v37 }
 0x119   :  { %v9320_v28 = vadd.f32 %v285_v26, %v9268_v39  ;;  %v287_v25 = vpop.f32.mrb[14].mxu1 }
 0x11a   :  { %11132 = vst [vmem:[#allocation53_spill] sm:$0xff] %v9315_v31  ;;  %v9325_v38 = vadd.f32 %v287_v25, %v9261_v44  ;;  %v289_v40 = vpop.f32.mrb[15].mxu1  ;;  %v200_v31 = vpop.f32.mrb[8].mxu0 }
 0x11b   :  { %11134 = vst [vmem:[#allocation55_spill] sm:$0xff] %v9320_v28  ;;  %v9328_v27 = vadd.f32 %v289_v40, %v9268_v39  ;;  %v9330_v29 = vadd.f32 %v200_v31, %v73_v34  ;;  %v202_v24 = vpop.f32.mrb[9].mxu0 }
 0x11c   :  { %11136 = vst [vmem:[#allocation57_spill] sm:$0xff] %v9325_v38  ;;  %v9332_v23 = vadd.f32 %v202_v24, %v77_v37  ;;  %v204_v26 = vpop.f32.mrb[10].mxu0 }
 0x11d   :  { %11137 = vst [vmem:[#allocation58_spill] sm:$0xff] %v9328_v27  ;;  %11138 = vst [vmem:[#allocation59_spill] sm:$0xff] %v9330_v29  ;;  %v9334_v43 = vadd.f32 %v204_v26, %v73_v34  ;;  %v206_v25 = vpop.f32.mrb[11].mxu0 }
 0x11e   :  { %11139 = vst [vmem:[#allocation60_spill] sm:$0xff] %v9332_v23  ;;  %v9336_v21 = vadd.f32 %v206_v25, %v77_v37  ;;  %v210_v36 = vpop.f32.mrb[12].mxu0 }
 0x11f   :  { %v557_v30 = vpop.f32.mrb[16].mxu1  ;;  %11140 = vst [vmem:[#allocation61_spill] sm:$0xff] %v9334_v43  ;;  %v9338_v33 = vadd.f32 %v210_v36, %v73_v34  ;;  %v212_v31 = vpop.f32.mrb[13].mxu0  ;;  %v256_v36 = vadd.f32 %v9265_v35, %v9268_v39  ;;  %v9623_v43 = vld [vmem:[#allocation6 + $0xc4] ss:$16 sps:$4 sm:$0xff]  }
 0x120   :  { %v605_v28 = vadd.f32 %v557_v30, %v181_v42  ;;  %v559_v41 = vpop.f32.mrb[17].mxu1  ;;  %11141 = vst [vmem:[#allocation62_spill] sm:$0xff] %v9336_v21  ;;  %v9340_v27 = vadd.f32 %v212_v31, %v77_v37  ;;  %v214_v29 = vpop.f32.mrb[14].mxu0  ;;  %v9617_v21 = vld [vmem:[#allocation6 + $0xa8] ss:$16 sps:$4 sm:$0xff]  }
 0x121   :  { %v606_v38 = vadd.f32 %v559_v41, %v183_v32  ;;  %v561_v22 = vpop.f32.mrb[18].mxu1  ;;  %11142 = vst [vmem:[#allocation63_spill] sm:$0xff] %v9338_v33  ;;  %v9342_v24 = vadd.f32 %v214_v29, %v73_v34  ;;  %v216_v23 = vpop.f32.mrb[15].mxu0  ;;  %v9615_v33 = vld [vmem:[#allocation6 + $0xa0] ss:$16 sps:$4 sm:$0xff]  }
 0x122   :  { %v562_v40 = vpop.f32.mrb[19].mxu1  ;;  %11143 = vst [vmem:[#allocation64_spill] sm:$0xff] %v9340_v27  ;;  %v9344_v42 = vadd.f32 %v216_v23, %v77_v37  ;;  %v7130_v26 = vmul.f32 -1.442695, %v605_v28  ;;  %v9613_v27 = vld [vmem:[#allocation6 + $0xac] ss:$16 sps:$4 sm:$0xff]  }
 0x123   :  { %11144 = vst [vmem:[#allocation65_spill] sm:$0xff] %v9342_v24  ;;  %v7131_v30 = vmul.f32 -1.442695, %v606_v38  ;;  %v254_v40 = vadd.f32 %v9263_v0, %v9261_v44  ;;  %v9611_v24 = vld [vmem:[#allocation6 + $0xa4] ss:$16 sps:$4 sm:$0xff]  }
 0x124   :  { %11145 = vst [vmem:[#allocation66_spill] sm:$0xff] %v9344_v42 }
 0x125   :  { %8604 = vpow2.f32 %v7131_v30 }
 0x126   :  { %8606 = vpow2.f32 %v7130_v26 }
 0x12f   :  { %v8605_v22 = vpop.eup %8604 }
 0x130   :  { %v8607_v32 = vpop.eup %8606  ;;  %v618_v41 = vadd.f32 1.0, %v8605_v22 }
 0x131   :  { %v612_v25 = vadd.f32 1.0, %v8607_v32 }
 0x132   :  { %8608 = vrcp.f32 %v618_v41 }
 0x133   :  { %8610 = vrcp.f32 %v612_v25 }
 0x13c   :  { %v8609_v30 = vpop.eup %8608 }
 0x13d   :  { %v8611_v26 = vpop.eup %8610  ;;  %v628_v32 = vmul.f32 0.0, %v8609_v30  ;;  %v8869_v30 = vld [vmem:[#allocation4 + $0x40] ss:$16 sps:$4 sm:$0xff]  }
 0x13f   :  { %v598_v31 = vpop.f32.mrb[20].mxu1 }
 0x140   :  { %v607_v29 = vadd.f32 %v598_v31, %v254_v40  ;;  %v600_v34 = vpop.f32.mrb[21].mxu1  ;;  %v8862_v31 = vld [vmem:[#allocation4 + $0x8] ss:$16 sps:$4 sm:$0xff]  }
 0x141   :  { %v608_v23 = vadd.f32 %v600_v34, %v256_v36  ;;  %v602_v37 = vpop.f32.mrb[22].mxu1  ;;  %v8861_v36 = vld [vmem:[#allocation4] ss:$16 sps:$4 sm:$0xff]   ;;  %v11146_v34 = vmov 0  }
 0x142   :  { %8612 = vtanh.f32 %v607_v29  ;;  %v603_v28 = vpop.f32.mrb[23].mxu1  ;;  %v8863_v29 = vld [vmem:[#allocation4 + $0x24] ss:$16 sps:$4 sm:$0xff]   ;;  %v8866_v37 = vld [vmem:[#allocation4 + $0x28] ss:$16 sps:$4 sm:$0xff]  }
 0x143   :  { %v7132_v38 = vmul.f32 -1.442695, %v608_v23  ;;  %v8865_v23 = vld [vmem:[#allocation4 + $0x20] ss:$16 sps:$4 sm:$0xff]   ;;  %v8867_v28 = vld [vmem:[#allocation4 + $0x44] ss:$16 sps:$4 sm:$0xff]  }
 0x145   :  { %8614 = vpow2.f32 %v7132_v38  ;;  %v8868_v38 = vld [vmem:[#allocation4 + $0x4c] ss:$16 sps:$4 sm:$0xff]  }
 0x14c   :  { %v8613_v22 = vpop.eup %8612 }
 0x14d   :  { %v629_v42 = vmul.f32 %v8613_v22, %v8611_v26  ;;  %v8870_v26 = vld [vmem:[#allocation4 + $0x48] ss:$16 sps:$4 sm:$0xff]   ;;  %v8871_v22 = vld [vmem:[#allocation4 + $0x64] ss:$16 sps:$4 sm:$0xff]  }
 0x14f   :  { %v8615_v0 = vpop.eup %8614  ;;  %v9350_v44 = vadd.f32 %v629_v42, %v628_v32  ;;  %v8864_v42 = vld [vmem:[#allocation4 + $0x2c] ss:$16 sps:$4 sm:$0xff]  }
 0x150   :  { %v625_v35 = vadd.f32 1.0, %v8615_v0  ;;  %v8872_v32 = vld [vmem:[#allocation4 + $0x6c] ss:$16 sps:$4 sm:$0xff]   ;;  %v8873_v0 = vld [vmem:[#allocation4 + $0x60] ss:$16 sps:$4 sm:$0xff]  }
 0x151   :  { %8616 = vtanh.f32 %v9350_v44 }
 0x152   :  { %8618 = vrcp.f32 %v625_v35  ;;  %v8874_v35 = vld [vmem:[#allocation4 + $0x68] ss:$16 sps:$4 sm:$0xff]  }
 0x15b   :  { %v8617_v39 = vpop.eup %8616 }
 0x15c   :  { %v8619_v41 = vpop.eup %8618 }
 0x15d   :  { %v632_v25 = vmul.f32 %v8619_v41, %v8617_v39  ;;  %v8875_v39 = vld [vmem:[#allocation4 + $0x84] ss:$16 sps:$4 sm:$0xff]   ;;  %v8876_v41 = vld [vmem:[#allocation4 + $0x8c] ss:$16 sps:$4 sm:$0xff]  }
 0x15f   :  { %v9353_v40 = vpack.c.bf16 %v632_v25, %v632_v25  ;;  %v8877_v25 = vld [vmem:[#allocation4 + $0x80] ss:$16 sps:$4 sm:$0xff]  }
 0x161   :  { %1073 = vmatmul.mubr.bf16.vlgmr.msra.gmra.mrb[16].mxu0 %v9353_v40  ;;  %1114 = vmatmul.mubr.bf16.vlgmr.msra.gmra.mrb[24].mxu1 %v9353_v40 }
 0x162   :  { %1348 = vmatpush1.bf16.msra.mxu0 %v8861_v36  ;;  %1389 = vmatpush1.bf16.msra.mxu1 %v8862_v31  ;;  %v8878_v36 = vld [vmem:[#allocation4 + $0x88] ss:$16 sps:$4 sm:$0xff]   ;;  %v8879_v31 = vld [vmem:[#allocation4 + $0xa4] ss:$16 sps:$4 sm:$0xff]  }
 0x163   :  { %1349 = vmatprep.subr.bf16.mxu0 %v8863_v29  ;;  %1390 = vmatprep.subr.bf16.mxu1 %v8864_v42  ;;  %v8880_v29 = vld [vmem:[#allocation4 + $0xac] ss:$16 sps:$4 sm:$0xff]   ;;  %v8881_v42 = vld [vmem:[#allocation4 + $0xa0] ss:$16 sps:$4 sm:$0xff]  }
 0x164   :  { %1379 = vmatprep.mubr.bf16.mxu0 %v11146_v34  ;;  %1420 = vmatprep.mubr.bf16.mxu1 %v11146_v34 }
 0x166   :  { %1350 = vmatpush1.bf16.msra.mxu0 %v8865_v23  ;;  %1391 = vmatpush1.bf16.msra.mxu1 %v8866_v37  ;;  %v8882_v23 = vld [vmem:[#allocation4 + $0xa8] ss:$16 sps:$4 sm:$0xff]   ;;  %v8883_v37 = vld [vmem:[#allocation4 + $0xc4] ss:$16 sps:$4 sm:$0xff]  }
 0x167   :  { %1351 = vmatprep.subr.bf16.mxu0 %v8867_v28  ;;  %1392 = vmatprep.subr.bf16.mxu1 %v8868_v38  ;;  %v8884_v28 = vld [vmem:[#allocation4 + $0xcc] ss:$16 sps:$4 sm:$0xff]   ;;  %v8885_v38 = vld [vmem:[#allocation4 + $0xc0] ss:$16 sps:$4 sm:$0xff]  }
 0x16a   :  { %1352 = vmatpush1.bf16.msra.mxu0 %v8869_v30  ;;  %1393 = vmatpush1.bf16.msra.mxu1 %v8870_v26  ;;  %v8886_v30 = vld [vmem:[#allocation4 + $0xc8] ss:$16 sps:$4 sm:$0xff]   ;;  %v8887_v26 = vld [vmem:[#allocation4 + $0xe4] ss:$16 sps:$4 sm:$0xff]  }
 0x16b   :  { %1353 = vmatprep.subr.bf16.mxu0 %v8871_v22  ;;  %1394 = vmatprep.subr.bf16.mxu1 %v8872_v32  ;;  %v8888_v22 = vld [vmem:[#allocation4 + $0xec] ss:$16 sps:$4 sm:$0xff]   ;;  %v8889_v32 = vld [vmem:[#allocation4 + $0xe0] ss:$16 sps:$4 sm:$0xff]  }
 0x16e   :  { %1354 = vmatpush1.bf16.msra.mxu0 %v8873_v0  ;;  %1395 = vmatpush1.bf16.msra.mxu1 %v8874_v35  ;;  %v8890_v0 = vld [vmem:[#allocation4 + $0xe8] ss:$16 sps:$4 sm:$0xff]  }
 0x16f   :  { %1355 = vmatprep.subr.bf16.mxu0 %v8875_v39  ;;  %1396 = vmatprep.subr.bf16.mxu1 %v8876_v41 }
 0x172   :  { %1356 = vmatpush1.bf16.msra.mxu0 %v8877_v25  ;;  %1397 = vmatpush1.bf16.msra.mxu1 %v8878_v36  ;;  %v11174_v36 = vld [vmem:[#allocation36_spill] sm:$0xff] }
 0x173   :  { %1357 = vmatprep.subr.bf16.mxu0 %v8879_v31  ;;  %1398 = vmatprep.subr.bf16.mxu1 %v8880_v29 }
 0x176   :  { %1358 = vmatpush1.bf16.msra.mxu0 %v8881_v42  ;;  %1399 = vmatpush1.bf16.msra.mxu1 %v8882_v23  ;;  %v11175_v42 = vld [vmem:[#allocation35_spill] sm:$0xff] }
 0x177   :  { %1359 = vmatprep.subr.bf16.mxu0 %v8883_v37  ;;  %1400 = vmatprep.subr.bf16.mxu1 %v8884_v28 }
 0x17a   :  { %1360 = vmatpush1.bf16.msra.mxu0 %v8885_v38  ;;  %1401 = vmatpush1.bf16.msra.mxu1 %v8886_v30 }
 0x17b   :  { %1361 = vmatprep.subr.bf16.mxu0 %v8887_v26  ;;  %1402 = vmatprep.subr.bf16.mxu1 %v8888_v22 }
 0x17e   :  { %1362 = vmatpush1.bf16.msra.mxu0 %v8889_v32  ;;  %1403 = vmatpush1.bf16.msra.mxu1 %v8890_v0 }
 0x17f   :  { %1864 = vmatprep.subr.bf16.mxu0 %v9060_v45  ;;  %1905 = vmatprep.subr.bf16.mxu1 %v9062_v46  ;;  %v11147_v45 = vld [vmem:[#allocation10_spill] sm:$0xff]  ;;  %v11148_v46 = vld [vmem:[#allocation11_spill] sm:$0xff] }
 0x181   :  { %1380 = vmatmul.mubr.bf16.vlgmr.msra.gmra.mrb[20].mxu0 %v9353_v40  ;;  %1421 = vmatmul.mubr.bf16.vlgmr.msra.gmra.mrb[28].mxu1 %v9353_v40 }
 0x182   :  { %1865 = vmatpush1.bf16.msra.mxu0 %v9064_v47  ;;  %1906 = vmatpush1.bf16.msra.mxu1 %v9066_v48  ;;  %v11149_v47 = vld [vmem:[#allocation12_spill] sm:$0xff]  ;;  %v11150_v48 = vld [vmem:[#allocation13_spill] sm:$0xff] }
 0x183   :  { %1866 = vmatprep.subr.bf16.mxu0 %v9072_v49  ;;  %1907 = vmatprep.subr.bf16.mxu1 %v9074_v50  ;;  %v11151_v49 = vld [vmem:[#allocation14_spill] sm:$0xff]  ;;  %v11152_v50 = vld [vmem:[#allocation15_spill] sm:$0xff] }
 0x186   :  { %1867 = vmatpush1.bf16.msra.mxu0 %v9076_v51  ;;  %1908 = vmatpush1.bf16.msra.mxu1 %v9078_v52  ;;  %v11153_v51 = vld [vmem:[#allocation16_spill] sm:$0xff]  ;;  %v11154_v52 = vld [vmem:[#allocation17_spill] sm:$0xff] }
 0x187   :  { %1868 = vmatprep.subr.bf16.mxu0 %v9084_v53  ;;  %1909 = vmatprep.subr.bf16.mxu1 %v9086_v54  ;;  %v11155_v53 = vld [vmem:[#allocation18_spill] sm:$0xff]  ;;  %v11156_v54 = vld [vmem:[#allocation19_spill] sm:$0xff] }
 0x18a   :  { %1869 = vmatpush1.bf16.msra.mxu0 %v9088_v55  ;;  %1910 = vmatpush1.bf16.msra.mxu1 %v9090_v56  ;;  %v11157_v55 = vld [vmem:[#allocation20_spill] sm:$0xff]  ;;  %v11158_v56 = vld [vmem:[#allocation21_spill] sm:$0xff] }
 0x18b   :  { %1870 = vmatprep.subr.bf16.mxu0 %v9096_v57  ;;  %1911 = vmatprep.subr.bf16.mxu1 %v9098_v58  ;;  %v11159_v57 = vld [vmem:[#allocation22_spill] sm:$0xff]  ;;  %v11160_v58 = vld [vmem:[#allocation24_spill] sm:$0xff] }
 0x18c   :  { %11193 = vst [vmem:[#allocation24_spill] sm:$0xff] %v9611_v24 }
 0x18e   :  { %1871 = vmatpush1.bf16.msra.mxu0 %v9100_v59  ;;  %1912 = vmatpush1.bf16.msra.mxu1 %v9102_v60  ;;  %v11161_v59 = vld [vmem:[#allocation26_spill] sm:$0xff]  ;;  %v11162_v60 = vld [vmem:[#allocation23_spill] sm:$0xff] }
 0x18f   :  { %1872 = vmatprep.subr.bf16.mxu0 %v9108_v61  ;;  %1913 = vmatprep.subr.bf16.mxu1 %v9110_v62  ;;  %v11163_v61 = vld [vmem:[#allocation25_spill] sm:$0xff]  ;;  %v11164_v62 = vld [vmem:[#allocation27_spill] sm:$0xff]  ;;  %11194 = vst [vmem:[#allocation26_spill] sm:$0xff] %v9613_v27  ;;  %11195 = vst [vmem:[#allocation23_spill] sm:$0xff] %v9615_v33 }
 0x190   :  { %11196 = vst [vmem:[#allocation25_spill] sm:$0xff] %v9617_v21  ;;  %11197 = vst [vmem:[#allocation27_spill] sm:$0xff] %v9623_v43 }
 0x192   :  { %1873 = vmatpush1.bf16.msra.mxu0 %v9112_v63  ;;  %1914 = vmatpush1.bf16.msra.mxu1 %v9114_v1  ;;  %v11165_v63 = vld [vmem:[#allocation28_spill] sm:$0xff]  ;;  %v11166_v1 = vld [vmem:[#allocation29_spill] sm:$0xff] }
 0x193   :  { %1874 = vmatprep.subr.bf16.mxu0 %v9120_v2  ;;  %1915 = vmatprep.subr.bf16.mxu1 %v9122_v3  ;;  %v11167_v2 = vld [vmem:[#allocation30_spill] sm:$0xff]  ;;  %v11168_v3 = vld [vmem:[#allocation31_spill] sm:$0xff] }
 0x196   :  { %1875 = vmatpush1.bf16.msra.mxu0 %v9124_v4  ;;  %1916 = vmatpush1.bf16.msra.mxu1 %v9126_v5  ;;  %v11169_v4 = vld [vmem:[#allocation32_spill] sm:$0xff]  ;;  %v11170_v5 = vld [vmem:[#allocation33_spill] sm:$0xff] }
 0x197   :  { %1876 = vmatprep.subr.bf16.mxu0 %v9132_v6  ;;  %1917 = vmatprep.subr.bf16.mxu1 %v9134_v7  ;;  %v11171_v6 = vld [vmem:[#allocation34_spill] sm:$0xff] }
 0x198   :  { %v9425_v7 = vld [vmem:[#allocation4 + $0x4] ss:$16 sps:$4 sm:$0xff]  }
 0x19a   :  { %1877 = vmatpush1.bf16.msra.mxu0 %v9136_v8  ;;  %1918 = vmatpush1.bf16.msra.mxu1 %v9138_v9  ;;  %v9427_v8 = vld [vmem:[#allocation4 + $0xc] ss:$16 sps:$4 sm:$0xff]   ;;  %v698_v9 = vld [vmem:[%s10871_s5] sm:$0xf] }
 0x19b   :  { %1878 = vmatprep.subr.bf16.mxu0 %v9144_v10  ;;  %1919 = vmatprep.subr.bf16.mxu1 %v9146_v11  ;;  %v11172_v10 = vld [vmem:[#allocation42_spill] sm:$0xff]  ;;  %v715_v31 = vrot.slane %v698_v9, %v11174_v36  ;;  %v711_v23 = vrot.slane %v698_v9, %v11175_v42 }
 0x19c   :  { %v703_v11 = vrot.slane %v698_v9, %v11172_v10 }
 0x19e   :  { %1879 = vmatpush1.bf16.msra.mxu0 %v9148_v12  ;;  %1920 = vmatpush1.bf16.msra.mxu1 %v9150_v13  ;;  %v11173_v12 = vld [vmem:[#allocation44_spill] sm:$0xff] }
 0x19f   :  { %1880 = vmatprep.subr.bf16.mxu0 %v9156_v14  ;;  %1921 = vmatprep.subr.bf16.mxu1 %v9158_v15  ;;  %v707_v13 = vrot.slane %v698_v9, %v11173_v12 }
 0x1a2   :  { %1881 = vmatpush1.bf16.msra.mxu0 %v9160_v16  ;;  %1922 = vmatpush1.bf16.msra.mxu1 %v9162_v17 }
 0x1a3   :  { %1882 = vmatprep.subr.bf16.mxu0 %v9168_v18  ;;  %1923 = vmatprep.subr.bf16.mxu1 %v9170_v19 }
 0x1a6   :  { %1883 = vmatpush1.bf16.msra.mxu0 %v9172_v20  ;;  %1924 = vmatpush1.bf16.msra.mxu1 %v11147_v45 }
 0x1a7   :  { %1884 = vmatprep.subr.bf16.mxu0 %v11148_v46  ;;  %1925 = vmatprep.subr.bf16.mxu1 %v11149_v47 }
 0x1aa   :  { %1885 = vmatpush1.bf16.msra.mxu0 %v11150_v48  ;;  %1926 = vmatpush1.bf16.msra.mxu1 %v11151_v49 }
 0x1ab   :  { %1886 = vmatprep.subr.bf16.mxu0 %v11152_v50  ;;  %1927 = vmatprep.subr.bf16.mxu1 %v11153_v51 }
 0x1ae   :  { %1887 = vmatpush1.bf16.msra.mxu0 %v11154_v52  ;;  %1928 = vmatpush1.bf16.msra.mxu1 %v11155_v53  ;;  %v11176_v53 = vld [vmem:[#allocation46_spill] sm:$0xff] }
 0x1af   :  { %1888 = vmatprep.subr.bf16.mxu0 %v11156_v54  ;;  %1929 = vmatprep.subr.bf16.mxu1 %v11157_v55  ;;  %v11177_v55 = vld [vmem:[#allocation37_spill] sm:$0xff] }
 0x1b2   :  { %1889 = vmatpush1.bf16.msra.mxu0 %v11158_v56  ;;  %1930 = vmatpush1.bf16.msra.mxu1 %v11159_v57 }
 0x1b3   :  { %1890 = vmatprep.subr.bf16.mxu0 %v11160_v58  ;;  %1931 = vmatprep.subr.bf16.mxu1 %v11161_v59  ;;  %v11178_v59 = vld [vmem:[#allocation48_spill] sm:$0xff] }
 0x1b6   :  { %1891 = vmatpush1.bf16.msra.mxu0 %v11162_v60  ;;  %1932 = vmatpush1.bf16.msra.mxu1 %v11163_v61  ;;  %v11179_v61 = vld [vmem:[#allocation38_spill] sm:$0xff] }
 0x1b7   :  { %1892 = vmatprep.subr.bf16.mxu0 %v11164_v62  ;;  %1933 = vmatprep.subr.bf16.mxu1 %v11165_v63 }
 0x1ba   :  { %1893 = vmatpush1.bf16.msra.mxu0 %v11166_v1  ;;  %1934 = vmatpush1.bf16.msra.mxu1 %v11167_v2 }
 0x1bb   :  { %1894 = vmatprep.subr.bf16.mxu0 %v11168_v3  ;;  %1935 = vmatprep.subr.bf16.mxu1 %v11169_v4 }
 0x1be   :  { %1895 = vmatpush1.bf16.msra.mxu0 %v11170_v5  ;;  %1936 = vmatpush1.bf16.msra.mxu1 %v11171_v6 }
 0x1bf   :  { %2172 = vmatprep.subr.bf16.mxu0 %v9425_v7  ;;  %2213 = vmatprep.subr.bf16.mxu1 %v9427_v8 }
 0x234   :  { %v1074_v14 = vpop.f32.mrb[16].mxu0  ;;  %v1115_v15 = vpop.f32.mrb[24].mxu1 }
 0x235   :  { %v1075_v16 = vadd.f32 %v1074_v14, %v703_v11  ;;  %v1076_v17 = vpop.f32.mrb[17].mxu0  ;;  %v1117_v18 = vpop.f32.mrb[25].mxu1  ;;  %v1116_v28 = vadd.f32 %v1115_v15, %v711_v23 }
 0x236   :  { %v1077_v19 = vadd.f32 %v1076_v17, %v707_v13  ;;  %v1078_v20 = vpop.f32.mrb[18].mxu0  ;;  %v1119_v40 = vpop.f32.mrb[26].mxu1  ;;  %v1118_v29 = vadd.f32 %v1117_v18, %v715_v31 }
 0x237   :  { %v7197_v35 = vmul.f32 -1.442695, %v1075_v16  ;;  %v1079_v39 = vpop.f32.mrb[19].mxu0  ;;  %v1120_v41 = vpop.f32.mrb[27].mxu1 }
 0x238   :  { %v7198_v25 = vmul.f32 -1.442695, %v1077_v19  ;;  %v7199_v37 = vmul.f32 -1.442695, %v1118_v29 }
 0x239   :  { %8620 = vpow2.f32 %v7197_v35 }
 0x23a   :  { %8622 = vpow2.f32 %v7198_v25 }
 0x23b   :  { %8624 = vpow2.f32 %v7199_v37 }
 0x23c   :  { %8626 = vtanh.f32 %v1116_v28  ;;  %v9453_v28 = vld [vmem:[#allocation4] ss:$16 sps:$4 sm:$0xff]  }
 0x243   :  { %v8621_v38 = vpop.eup %8620 }
 0x244   :  { %v8623_v30 = vpop.eup %8622  ;;  %v1125_v26 = vadd.f32 1.0, %v8621_v38  ;;  %v9455_v38 = vld [vmem:[#allocation4 + $0x8] ss:$16 sps:$4 sm:$0xff]  }
 0x245   :  { %v1131_v22 = vadd.f32 1.0, %v8623_v30  ;;  %v8625_v32 = vpop.eup %8624 }
 0x246   :  { %8628 = vrcp.f32 %v1125_v26  ;;  %v8627_v0 = vpop.eup %8626  ;;  %v1138_v48 = vadd.f32 1.0, %v8625_v32  ;;  %v9459_v26 = vld [vmem:[#allocation4 + $0x24] ss:$16 sps:$4 sm:$0xff]   ;;  %v9469_v32 = vld [vmem:[#allocation4 + $0x28] ss:$16 sps:$4 sm:$0xff]  }
 0x247   :  { %8630 = vrcp.f32 %v1131_v22  ;;  %v9461_v22 = vld [vmem:[#allocation4 + $0x2c] ss:$16 sps:$4 sm:$0xff]  }
 0x248   :  { %8632 = vrcp.f32 %v1138_v48  ;;  %v9487_v48 = vld [vmem:[#allocation4 + $0x64] ss:$16 sps:$4 sm:$0xff]  }
 0x250   :  { %v8629_v45 = vpop.eup %8628 }
 0x251   :  { %v8631_v46 = vpop.eup %8630  ;;  %v1142_v47 = vmul.f32 %v8629_v45, %v8627_v0  ;;  %v9473_v0 = vld [vmem:[#allocation4 + $0x44] ss:$16 sps:$4 sm:$0xff]   ;;  %v9475_v45 = vld [vmem:[#allocation4 + $0x4c] ss:$16 sps:$4 sm:$0xff]  }
 0x252   :  { %v1141_v49 = vmul.f32 0.0, %v8631_v46  ;;  %v8633_v6 = vpop.eup %8632  ;;  %v9481_v46 = vld [vmem:[#allocation4 + $0x40] ss:$16 sps:$4 sm:$0xff]  }
 0x254   :  { %v9438_v50 = vadd.f32 %v1142_v47, %v1141_v49  ;;  %v1381_v51 = vpop.f32.mrb[20].mxu0  ;;  %v1422_v52 = vpop.f32.mrb[28].mxu1  ;;  %v9483_v47 = vld [vmem:[#allocation4 + $0x48] ss:$16 sps:$4 sm:$0xff]   ;;  %v9489_v49 = vld [vmem:[#allocation4 + $0x6c] ss:$16 sps:$4 sm:$0xff]  }
 0x255   :  { %v1429_v54 = vadd.f32 %v1381_v51, %v11176_v53  ;;  %v1431_v56 = vadd.f32 %v1422_v52, %v11177_v55  ;;  %v1383_v57 = vpop.f32.mrb[21].mxu0  ;;  %v1424_v58 = vpop.f32.mrb[29].mxu1  ;;  %v9493_v51 = vld [vmem:[#allocation4 + $0x60] ss:$16 sps:$4 sm:$0xff]   ;;  %v9495_v52 = vld [vmem:[#allocation4 + $0x68] ss:$16 sps:$4 sm:$0xff]  }
 0x256   :  { %8634 = vtanh.f32 %v9438_v50  ;;  %v1430_v60 = vadd.f32 %v1383_v57, %v11178_v59  ;;  %v1432_v62 = vadd.f32 %v1424_v58, %v11179_v61  ;;  %v1385_v63 = vpop.f32.mrb[22].mxu0  ;;  %v1426_v1 = vpop.f32.mrb[30].mxu1  ;;  %v9499_v53 = vld [vmem:[#allocation4 + $0x84] ss:$16 sps:$4 sm:$0xff]   ;;  %v9505_v55 = vld [vmem:[#allocation4 + $0x80] ss:$16 sps:$4 sm:$0xff]  }
 0x257   :  { %v7232_v2 = vmul.f32 -1.442695, %v1429_v54  ;;  %v1386_v3 = vpop.f32.mrb[23].mxu0  ;;  %v1427_v4 = vpop.f32.mrb[31].mxu1  ;;  %v9501_v54 = vld [vmem:[#allocation4 + $0x8c] ss:$16 sps:$4 sm:$0xff]  }
 0x258   :  { %v7233_v5 = vmul.f32 -1.442695, %v1430_v60  ;;  %v7234_v11 = vmul.f32 -1.442695, %v1432_v62  ;;  %v9511_v57 = vld [vmem:[#allocation4 + $0xa4] ss:$16 sps:$4 sm:$0xff]  }
 0x259   :  { %8636 = vpow2.f32 %v7232_v2  ;;  %v9513_v58 = vld [vmem:[#allocation4 + $0xac] ss:$16 sps:$4 sm:$0xff]   ;;  %v9517_v59 = vld [vmem:[#allocation4 + $0xa0] ss:$16 sps:$4 sm:$0xff]   ;;  %v9519_v60 = vld [vmem:[#allocation4 + $0xa8] ss:$16 sps:$4 sm:$0xff]  }
 0x25a   :  { %8638 = vpow2.f32 %v7233_v5  ;;  %v9523_v61 = vld [vmem:[#allocation4 + $0xc4] ss:$16 sps:$4 sm:$0xff]   ;;  %v9525_v62 = vld [vmem:[#allocation4 + $0xcc] ss:$16 sps:$4 sm:$0xff]   ;;  %v9529_v63 = vld [vmem:[#allocation4 + $0xc0] ss:$16 sps:$4 sm:$0xff]  }
 0x25b   :  { %8640 = vpow2.f32 %v7234_v11  ;;  %v9531_v1 = vld [vmem:[#allocation4 + $0xc8] ss:$16 sps:$4 sm:$0xff]   ;;  %v9535_v2 = vld [vmem:[#allocation4 + $0xe4] ss:$16 sps:$4 sm:$0xff]   ;;  %v9537_v3 = vld [vmem:[#allocation4 + $0xec] ss:$16 sps:$4 sm:$0xff]  }
 0x25c   :  { %8642 = vtanh.f32 %v1431_v56  ;;  %v9507_v56 = vld [vmem:[#allocation4 + $0x88] ss:$16 sps:$4 sm:$0xff]   ;;  %v9541_v4 = vld [vmem:[#allocation4 + $0xe0] ss:$16 sps:$4 sm:$0xff]  }
 0x25d   :  { %v9543_v5 = vld [vmem:[#allocation4 + $0xe8] ss:$16 sps:$4 sm:$0xff]   ;;  %v9555_v11 = vld [vmem:[#allocation6] ss:$16 sps:$4 sm:$0xff]  }
 0x260   :  { %v8635_v9 = vpop.eup %8634 }
 0x261   :  { %v9445_v13 = vmul.f32 %v8635_v9, %v8633_v6  ;;  %v9551_v6 = vld [vmem:[#allocation6 + $0x4] ss:$16 sps:$4 sm:$0xff]   ;;  %v9553_v9 = vld [vmem:[#allocation6 + $0xc] ss:$16 sps:$4 sm:$0xff]  }
 0x263   :  { %11180 = vst [vmem:[#allocation10_spill] sm:$0xff] %v9445_v13  ;;  %v8637_v14 = vpop.eup %8636  ;;  %v1146_v15 = vpack.c.bf16 %v9445_v13, %v9445_v13  ;;  %v9605_v13 = vld [vmem:[#allocation6 + $0x88] ss:$16 sps:$4 sm:$0xff]  }
 0x264   :  { %v8639_v16 = vpop.eup %8638  ;;  %v1436_v17 = vadd.f32 1.0, %v8637_v14  ;;  %v9557_v14 = vld [vmem:[#allocation6 + $0x8] ss:$16 sps:$4 sm:$0xff]   ;;  %11192 = vst [vmem:[#allocation22_spill] sm:$0xff] %v9605_v13 }
 0x265   :  { %v1442_v18 = vadd.f32 1.0, %v8639_v16  ;;  %1896 = vmatprep.mubr.bf16.mxu0 %v1146_v15  ;;  %1937 = vmatprep.mubr.bf16.mxu1 %v1146_v15  ;;  %v8641_v19 = vpop.eup %8640  ;;  %v9563_v15 = vld [vmem:[#allocation6 + $0x24] ss:$16 sps:$4 sm:$0xff]   ;;  %v9565_v16 = vld [vmem:[#allocation6 + $0x2c] ss:$16 sps:$4 sm:$0xff]  }
 0x266   :  { %8644 = vrcp.f32 %v1436_v17  ;;  %v8643_v20 = vpop.eup %8642  ;;  %v1449_v41 = vadd.f32 1.0, %v8641_v19  ;;  %v9567_v17 = vld [vmem:[#allocation6 + $0x20] ss:$16 sps:$4 sm:$0xff]   ;;  %v9575_v19 = vld [vmem:[#allocation6 + $0x44] ss:$16 sps:$4 sm:$0xff]  }
 0x267   :  { %8646 = vrcp.f32 %v1442_v18  ;;  %v9569_v18 = vld [vmem:[#allocation6 + $0x28] ss:$16 sps:$4 sm:$0xff]   ;;  %11181 = vst [vmem:[#allocation11_spill] sm:$0xff] %v9575_v19 }
 0x268   :  { %8648 = vrcp.f32 %v1449_v41  ;;  %v9589_v41 = vld [vmem:[#allocation6 + $0x6c] ss:$16 sps:$4 sm:$0xff]  }
 0x269   :  { %11186 = vst [vmem:[#allocation16_spill] sm:$0xff] %v9589_v41 }
 0x270   :  { %v8645_v40 = vpop.eup %8644 }
 0x271   :  { %v8647_v35 = vpop.eup %8646  ;;  %v1453_v39 = vmul.f32 %v8645_v40, %v8643_v20  ;;  %v9577_v20 = vld [vmem:[#allocation6 + $0x4c] ss:$16 sps:$4 sm:$0xff]   ;;  %v9579_v40 = vld [vmem:[#allocation6 + $0x40] ss:$16 sps:$4 sm:$0xff]  }
 0x272   :  { %v1452_v25 = vmul.f32 %v8647_v35, %v9350_v44  ;;  %v8649_v29 = vpop.eup %8648  ;;  %v9467_v44 = vld [vmem:[#allocation4 + $0x20] ss:$16 sps:$4 sm:$0xff]   ;;  %11182 = vst [vmem:[#allocation12_spill] sm:$0xff] %v9577_v20  ;;  %11183 = vst [vmem:[#allocation13_spill] sm:$0xff] %v9579_v40  ;;  %v9581_v35 = vld [vmem:[#allocation6 + $0x48] ss:$16 sps:$4 sm:$0xff]  }
 0x273   :  { %11184 = vst [vmem:[#allocation14_spill] sm:$0xff] %v9581_v35 }
 0x274   :  { %v9450_v31 = vadd.f32 %v1453_v39, %v1452_v25  ;;  %v9587_v39 = vld [vmem:[#allocation6 + $0x64] ss:$16 sps:$4 sm:$0xff]   ;;  %v9591_v25 = vld [vmem:[#allocation6 + $0x60] ss:$16 sps:$4 sm:$0xff]  }
 0x275   :  { %11185 = vst [vmem:[#allocation15_spill] sm:$0xff] %v9587_v39  ;;  %11187 = vst [vmem:[#allocation17_spill] sm:$0xff] %v9591_v25 }
 0x276   :  { %8650 = vtanh.f32 %v9450_v31 }
 0x280   :  { %v8651_v23 = vpop.eup %8650 }
 0x281   :  { %v1456_v37 = vmul.f32 %v8651_v23, %v8649_v29  ;;  %v9593_v29 = vld [vmem:[#allocation6 + $0x68] ss:$16 sps:$4 sm:$0xff]   ;;  %v9599_v23 = vld [vmem:[#allocation6 + $0x84] ss:$16 sps:$4 sm:$0xff]  }
 0x282   :  { %11188 = vst [vmem:[#allocation18_spill] sm:$0xff] %v9593_v29  ;;  %11189 = vst [vmem:[#allocation19_spill] sm:$0xff] %v9599_v23 }
 0x283   :  { %v9457_v30 = vpack.c.bf16 %v1456_v37, %v1456_v37  ;;  %v9601_v37 = vld [vmem:[#allocation6 + $0x8c] ss:$16 sps:$4 sm:$0xff]  }
 0x284   :  { %11190 = vst [vmem:[#allocation20_spill] sm:$0xff] %v9601_v37 }
 0x285   :  { %1897 = vmatmul.mubr.bf16.vlgmr.msra.gmra.mrb[24].mxu0 %v9457_v30  ;;  %1938 = vmatmul.mubr.bf16.vlgmr.msra.gmra.mrb[32].mxu1 %v9457_v30 }
 0x286   :  { %2173 = vmatpush1.bf16.msra.mxu0 %v9453_v28  ;;  %2214 = vmatpush1.bf16.msra.mxu1 %v9455_v38 }
 0x287   :  { %2174 = vmatprep.subr.bf16.mxu0 %v9459_v26  ;;  %2215 = vmatprep.subr.bf16.mxu1 %v9461_v22 }
 0x288   :  { %2204 = vmatprep.mubr.bf16.mxu0 %v11146_v34  ;;  %2245 = vmatprep.mubr.bf16.mxu1 %v11146_v34 }
 0x28a   :  { %2175 = vmatpush1.bf16.msra.mxu0 %v9467_v44  ;;  %2216 = vmatpush1.bf16.msra.mxu1 %v9469_v32 }
 0x28b   :  { %2176 = vmatprep.subr.bf16.mxu0 %v9473_v0  ;;  %2217 = vmatprep.subr.bf16.mxu1 %v9475_v45 }
 0x28e   :  { %2177 = vmatpush1.bf16.msra.mxu0 %v9481_v46  ;;  %2218 = vmatpush1.bf16.msra.mxu1 %v9483_v47 }
 0x28f   :  { %2178 = vmatprep.subr.bf16.mxu0 %v9487_v48  ;;  %2219 = vmatprep.subr.bf16.mxu1 %v9489_v49 }
 0x292   :  { %2179 = vmatpush1.bf16.msra.mxu0 %v9493_v51  ;;  %2220 = vmatpush1.bf16.msra.mxu1 %v9495_v52 }
 0x293   :  { %2180 = vmatprep.subr.bf16.mxu0 %v9499_v53  ;;  %2221 = vmatprep.subr.bf16.mxu1 %v9501_v54 }
 0x296   :  { %2181 = vmatpush1.bf16.msra.mxu0 %v9505_v55  ;;  %2222 = vmatpush1.bf16.msra.mxu1 %v9507_v56 }
 0x297   :  { %2182 = vmatprep.subr.bf16.mxu0 %v9511_v57  ;;  %2223 = vmatprep.subr.bf16.mxu1 %v9513_v58 }
 0x29a   :  { %2183 = vmatpush1.bf16.msra.mxu0 %v9517_v59  ;;  %2224 = vmatpush1.bf16.msra.mxu1 %v9519_v60 }
 0x29b   :  { %2184 = vmatprep.subr.bf16.mxu0 %v9523_v61  ;;  %2225 = vmatprep.subr.bf16.mxu1 %v9525_v62 }
 0x29e   :  { %2185 = vmatpush1.bf16.msra.mxu0 %v9529_v63  ;;  %2226 = vmatpush1.bf16.msra.mxu1 %v9531_v1 }
 0x29f   :  { %2186 = vmatprep.subr.bf16.mxu0 %v9535_v2  ;;  %2227 = vmatprep.subr.bf16.mxu1 %v9537_v3 }
 0x2a2   :  { %2187 = vmatpush1.bf16.msra.mxu0 %v9541_v4  ;;  %2228 = vmatpush1.bf16.msra.mxu1 %v9543_v5 }
 0x2a3   :  { %2689 = vmatprep.subr.bf16.mxu0 %v9551_v6  ;;  %2730 = vmatprep.subr.bf16.mxu1 %v9553_v9 }
 0x2a5   :  { %2205 = vmatmul.mubr.bf16.vlgmr.msra.gmra.mrb[28].mxu0 %v9457_v30  ;;  %2246 = vmatmul.mubr.bf16.vlgmr.msra.gmra.mrb[36].mxu1 %v9457_v30  ;;  %v9603_v30 = vld [vmem:[#allocation6 + $0x80] ss:$16 sps:$4 sm:$0xff]  }
 0x2a6   :  { %2690 = vmatpush1.bf16.msra.mxu0 %v9555_v11  ;;  %2731 = vmatpush1.bf16.msra.mxu1 %v9557_v14  ;;  %11191 = vst [vmem:[#allocation21_spill] sm:$0xff] %v9603_v30 }
 0x2a7   :  { %2691 = vmatprep.subr.bf16.mxu0 %v9563_v15  ;;  %2732 = vmatprep.subr.bf16.mxu1 %v9565_v16 }
 0x2aa   :  { %2692 = vmatpush1.bf16.msra.mxu0 %v9567_v17  ;;  %2733 = vmatpush1.bf16.msra.mxu1 %v9569_v18 }
 0x2ab   :  { %2693 = vmatprep.subr.bf16.mxu0 %v9575_v19  ;;  %2734 = vmatprep.subr.bf16.mxu1 %v9577_v20 }
 0x2ae   :  { %2694 = vmatpush1.bf16.msra.mxu0 %v9579_v40  ;;  %2735 = vmatpush1.bf16.msra.mxu1 %v9581_v35 }
 0x2af   :  { %2695 = vmatprep.subr.bf16.mxu0 %v9587_v39  ;;  %2736 = vmatprep.subr.bf16.mxu1 %v9589_v41 }
 0x2b2   :  { %2696 = vmatpush1.bf16.msra.mxu0 %v9591_v25  ;;  %2737 = vmatpush1.bf16.msra.mxu1 %v9593_v29 }
 0x2b3   :  { %2697 = vmatprep.subr.bf16.mxu0 %v9599_v23  ;;  %2738 = vmatprep.subr.bf16.mxu1 %v9601_v37  ;;  %v9629_v37 = vld [vmem:[#allocation6 + $0xc8] ss:$16 sps:$4 sm:$0xff]   ;;  %v9705_v23 = vld [vmem:[#allocation6 + $0x1a4] ss:$16 sps:$4 sm:$0xff]  }
 0x2b4   :  { %11200 = vst [vmem:[#allocation30_spill] sm:$0xff] %v9629_v37  ;;  %11225 = vst [vmem:[#allocation81_spill] sm:$0xff] %v9705_v23 }
 0x2b6   :  { %2698 = vmatpush1.bf16.msra.mxu0 %v9603_v30  ;;  %2739 = vmatpush1.bf16.msra.mxu1 %v9605_v13  ;;  %v9625_v30 = vld [vmem:[#allocation6 + $0xcc] ss:$16 sps:$4 sm:$0xff]   ;;  %v9627_v13 = vld [vmem:[#allocation6 + $0xc0] ss:$16 sps:$4 sm:$0xff]  }
 0x2b7   :  { %2699 = vmatprep.subr.bf16.mxu0 %v9611_v24  ;;  %2740 = vmatprep.subr.bf16.mxu1 %v9613_v27  ;;  %11198 = vst [vmem:[#allocation28_spill] sm:$0xff] %v9625_v30  ;;  %11199 = vst [vmem:[#allocation29_spill] sm:$0xff] %v9627_v13  ;;  %v9635_v27 = vld [vmem:[#allocation6 + $0xe4] ss:$16 sps:$4 sm:$0xff]   ;;  %v9641_v24 = vld [vmem:[#allocation6 + $0xe8] ss:$16 sps:$4 sm:$0xff]  }
 0x2b8   :  { %11201 = vst [vmem:[#allocation31_spill] sm:$0xff] %v9635_v27  ;;  %11204 = vst [vmem:[#allocation34_spill] sm:$0xff] %v9641_v24 }
 0x2ba   :  { %2700 = vmatpush1.bf16.msra.mxu0 %v9615_v33  ;;  %2741 = vmatpush1.bf16.msra.mxu1 %v9617_v21  ;;  %v9637_v33 = vld [vmem:[#allocation6 + $0xec] ss:$16 sps:$4 sm:$0xff]   ;;  %v9639_v21 = vld [vmem:[#allocation6 + $0xe0] ss:$16 sps:$4 sm:$0xff]  }
 0x2bb   :  { %2701 = vmatprep.subr.bf16.mxu0 %v9623_v43  ;;  %2742 = vmatprep.subr.bf16.mxu1 %v9625_v30  ;;  %11202 = vst [vmem:[#allocation32_spill] sm:$0xff] %v9637_v33  ;;  %11203 = vst [vmem:[#allocation33_spill] sm:$0xff] %v9639_v21  ;;  %v9647_v30 = vld [vmem:[#allocation6 + $0x104] ss:$16 sps:$4 sm:$0xff]   ;;  %v9653_v43 = vld [vmem:[#allocation6 + $0x108] ss:$16 sps:$4 sm:$0xff]  }
 0x2bc   :  { %11205 = vst [vmem:[#allocation36_spill] sm:$0xff] %v9647_v30  ;;  %11208 = vst [vmem:[#allocation37_spill] sm:$0xff] %v9653_v43 }
 0x2be   :  { %2702 = vmatpush1.bf16.msra.mxu0 %v9627_v13  ;;  %2743 = vmatpush1.bf16.msra.mxu1 %v9629_v37  ;;  %v9649_v13 = vld [vmem:[#allocation6 + $0x10c] ss:$16 sps:$4 sm:$0xff]   ;;  %v9651_v37 = vld [vmem:[#allocation6 + $0x100] ss:$16 sps:$4 sm:$0xff]  }
 0x2bf   :  { %2703 = vmatprep.subr.bf16.mxu0 %v9635_v27  ;;  %2744 = vmatprep.subr.bf16.mxu1 %v9637_v33  ;;  %11206 = vst [vmem:[#allocation35_spill] sm:$0xff] %v9649_v13  ;;  %11207 = vst [vmem:[#allocation46_spill] sm:$0xff] %v9651_v37  ;;  %v9659_v33 = vld [vmem:[#allocation6 + $0x124] ss:$16 sps:$4 sm:$0xff]   ;;  %v9665_v27 = vld [vmem:[#allocation6 + $0x128] ss:$16 sps:$4 sm:$0xff]  }
 0x2c0   :  { %11209 = vst [vmem:[#allocation48_spill] sm:$0xff] %v9659_v33  ;;  %11212 = vst [vmem:[#allocation68_spill] sm:$0xff] %v9665_v27 }
 0x2c2   :  { %2704 = vmatpush1.bf16.msra.mxu0 %v9639_v21  ;;  %2745 = vmatpush1.bf16.msra.mxu1 %v9641_v24  ;;  %v9661_v21 = vld [vmem:[#allocation6 + $0x12c] ss:$16 sps:$4 sm:$0xff]   ;;  %v9663_v24 = vld [vmem:[#allocation6 + $0x120] ss:$16 sps:$4 sm:$0xff]  }
 0x2c3   :  { %2705 = vmatprep.subr.bf16.mxu0 %v9647_v30  ;;  %2746 = vmatprep.subr.bf16.mxu1 %v9649_v13  ;;  %11210 = vst [vmem:[#allocation38_spill] sm:$0xff] %v9661_v21  ;;  %11211 = vst [vmem:[#allocation67_spill] sm:$0xff] %v9663_v24  ;;  %v9671_v13 = vld [vmem:[#allocation6 + $0x144] ss:$16 sps:$4 sm:$0xff]   ;;  %v9677_v30 = vld [vmem:[#allocation6 + $0x148] ss:$16 sps:$4 sm:$0xff]  }
 0x2c4   :  { %11213 = vst [vmem:[#allocation69_spill] sm:$0xff] %v9671_v13  ;;  %11216 = vst [vmem:[#allocation72_spill] sm:$0xff] %v9677_v30 }
 0x2c6   :  { %2706 = vmatpush1.bf16.msra.mxu0 %v9651_v37  ;;  %2747 = vmatpush1.bf16.msra.mxu1 %v9653_v43  ;;  %v9673_v37 = vld [vmem:[#allocation6 + $0x14c] ss:$16 sps:$4 sm:$0xff]   ;;  %v9675_v43 = vld [vmem:[#allocation6 + $0x140] ss:$16 sps:$4 sm:$0xff]  }
 0x2c7   :  { %2707 = vmatprep.subr.bf16.mxu0 %v9659_v33  ;;  %2748 = vmatprep.subr.bf16.mxu1 %v9661_v21  ;;  %11214 = vst [vmem:[#allocation70_spill] sm:$0xff] %v9673_v37  ;;  %11215 = vst [vmem:[#allocation71_spill] sm:$0xff] %v9675_v43  ;;  %v9683_v21 = vld [vmem:[#allocation6 + $0x164] ss:$16 sps:$4 sm:$0xff]   ;;  %v9689_v33 = vld [vmem:[#allocation6 + $0x168] ss:$16 sps:$4 sm:$0xff]  }
 0x2c8   :  { %11217 = vst [vmem:[#allocation73_spill] sm:$0xff] %v9683_v21  ;;  %11220 = vst [vmem:[#allocation76_spill] sm:$0xff] %v9689_v33 }
 0x2ca   :  { %2708 = vmatpush1.bf16.msra.mxu0 %v9663_v24  ;;  %2749 = vmatpush1.bf16.msra.mxu1 %v9665_v27  ;;  %v9685_v24 = vld [vmem:[#allocation6 + $0x16c] ss:$16 sps:$4 sm:$0xff]   ;;  %v9687_v27 = vld [vmem:[#allocation6 + $0x160] ss:$16 sps:$4 sm:$0xff]  }
 0x2cb   :  { %2709 = vmatprep.subr.bf16.mxu0 %v9671_v13  ;;  %2750 = vmatprep.subr.bf16.mxu1 %v9673_v37  ;;  %11218 = vst [vmem:[#allocation74_spill] sm:$0xff] %v9685_v24  ;;  %11219 = vst [vmem:[#allocation75_spill] sm:$0xff] %v9687_v27  ;;  %v9695_v37 = vld [vmem:[#allocation6 + $0x184] ss:$16 sps:$4 sm:$0xff]   ;;  %v9701_v13 = vld [vmem:[#allocation6 + $0x188] ss:$16 sps:$4 sm:$0xff]  }
 0x2cc   :  { %11221 = vst [vmem:[#allocation77_spill] sm:$0xff] %v9695_v37  ;;  %11224 = vst [vmem:[#allocation80_spill] sm:$0xff] %v9701_v13 }
 0x2ce   :  { %2710 = vmatpush1.bf16.msra.mxu0 %v9675_v43  ;;  %2751 = vmatpush1.bf16.msra.mxu1 %v9677_v30  ;;  %v9697_v43 = vld [vmem:[#allocation6 + $0x18c] ss:$16 sps:$4 sm:$0xff]   ;;  %v9699_v30 = vld [vmem:[#allocation6 + $0x180] ss:$16 sps:$4 sm:$0xff]  }
 0x2cf   :  { %2711 = vmatprep.subr.bf16.mxu0 %v9683_v21  ;;  %2752 = vmatprep.subr.bf16.mxu1 %v9685_v24  ;;  %11222 = vst [vmem:[#allocation78_spill] sm:$0xff] %v9697_v43  ;;  %11223 = vst [vmem:[#allocation79_spill] sm:$0xff] %v9699_v30  ;;  %v9707_v21 = vld [vmem:[#allocation6 + $0x1ac] ss:$16 sps:$4 sm:$0xff]   ;;  %v9717_v24 = vld [vmem:[#allocation6 + $0x1c4] ss:$16 sps:$4 sm:$0xff]  }
 0x2d0   :  { %11226 = vst [vmem:[#allocation82_spill] sm:$0xff] %v9707_v21  ;;  %11229 = vst [vmem:[#allocation85_spill] sm:$0xff] %v9717_v24 }
 0x2d2   :  { %2712 = vmatpush1.bf16.msra.mxu0 %v9687_v27  ;;  %2753 = vmatpush1.bf16.msra.mxu1 %v9689_v33  ;;  %v9711_v33 = vld [vmem:[#allocation6 + $0x1a0] ss:$16 sps:$4 sm:$0xff]   ;;  %v9713_v27 = vld [vmem:[#allocation6 + $0x1a8] ss:$16 sps:$4 sm:$0xff]  }
 0x2d3   :  { %2713 = vmatprep.subr.bf16.mxu0 %v9695_v37  ;;  %2754 = vmatprep.subr.bf16.mxu1 %v9697_v43  ;;  %11227 = vst [vmem:[#allocation83_spill] sm:$0xff] %v9711_v33  ;;  %11228 = vst [vmem:[#allocation84_spill] sm:$0xff] %v9713_v27  ;;  %v9719_v37 = vld [vmem:[#allocation6 + $0x1cc] ss:$16 sps:$4 sm:$0xff]   ;;  %v9723_v43 = vld [vmem:[#allocation6 + $0x1c0] ss:$16 sps:$4 sm:$0xff]  }
 0x2d4   :  { %11230 = vst [vmem:[#allocation86_spill] sm:$0xff] %v9719_v37  ;;  %11231 = vst [vmem:[#allocation87_spill] sm:$0xff] %v9723_v43 }
 0x2d6   :  { %2714 = vmatpush1.bf16.msra.mxu0 %v9699_v30  ;;  %2755 = vmatpush1.bf16.msra.mxu1 %v9701_v13  ;;  %v9725_v30 = vld [vmem:[#allocation6 + $0x1c8] ss:$16 sps:$4 sm:$0xff]   ;;  %v9729_v13 = vld [vmem:[#allocation6 + $0x1e4] ss:$16 sps:$4 sm:$0xff]  }
 0x2d7   :  { %2715 = vmatprep.subr.bf16.mxu0 %v9705_v23  ;;  %2756 = vmatprep.subr.bf16.mxu1 %v9707_v21  ;;  %11232 = vst [vmem:[#allocation88_spill] sm:$0xff] %v9725_v30  ;;  %11233 = vst [vmem:[#allocation89_spill] sm:$0xff] %v9729_v13  ;;  %v9731_v23 = vld [vmem:[#allocation6 + $0x1ec] ss:$16 sps:$4 sm:$0xff]   ;;  %v9735_v21 = vld [vmem:[#allocation6 + $0x1e0] ss:$16 sps:$4 sm:$0xff]  }
 0x2d8   :  { %11234 = vst [vmem:[#allocation90_spill] sm:$0xff] %v9731_v23  ;;  %11235 = vst [vmem:[#allocation91_spill] sm:$0xff] %v9735_v21 }
 0x2da   :  { %2716 = vmatpush1.bf16.msra.mxu0 %v9711_v33  ;;  %2757 = vmatpush1.bf16.msra.mxu1 %v9713_v27  ;;  %v9737_v33 = vld [vmem:[#allocation6 + $0x1e8] ss:$16 sps:$4 sm:$0xff]  }
 0x2db   :  { %2717 = vmatprep.subr.bf16.mxu0 %v9717_v24  ;;  %2758 = vmatprep.subr.bf16.mxu1 %v9719_v37  ;;  %11236 = vst [vmem:[#allocation92_spill] sm:$0xff] %v9737_v33 }
 0x2de   :  { %2718 = vmatpush1.bf16.msra.mxu0 %v9723_v43  ;;  %2759 = vmatpush1.bf16.msra.mxu1 %v9725_v30  ;;  %v1522_v30 = vld [vmem:[%s10871_s5] sm:$0xf] }
 0x2df   :  { %2719 = vmatprep.subr.bf16.mxu0 %v9729_v13  ;;  %2760 = vmatprep.subr.bf16.mxu1 %v9731_v23  ;;  %v1527_v43 = vrot.slane %v1522_v30, %v11172_v10  ;;  %v1531_v37 = vrot.slane %v1522_v30, %v11173_v12  ;;  %v1539_v35 = vrot.slane %v1522_v30, %v11174_v36 }
 0x2e0   :  { %v1535_v10 = vrot.slane %v1522_v30, %v11175_v42 }
 0x2e2   :  { %2720 = vmatpush1.bf16.msra.mxu0 %v9735_v21  ;;  %2761 = vmatpush1.bf16.msra.mxu1 %v9737_v33 }
 0x2e3   :  { %2997 = vmatprep.subr.bf16.mxu0 %v9425_v7  ;;  %3038 = vmatprep.subr.bf16.mxu1 %v9427_v8 }
 0x358   :  { %v1898_v24 = vpop.f32.mrb[24].mxu0  ;;  %v1939_v13 = vpop.f32.mrb[32].mxu1 }
 0x359   :  { %v1899_v27 = vadd.f32 %v1898_v24, %v1527_v43  ;;  %v1900_v23 = vpop.f32.mrb[25].mxu0  ;;  %v1941_v29 = vpop.f32.mrb[33].mxu1  ;;  %v1940_v20 = vadd.f32 %v1939_v13, %v1535_v10  ;;  %v11237_v13 = vld [vmem:[#allocation51_spill] sm:$0xff] }
 0x35a   :  { %v1901_v21 = vadd.f32 %v1900_v23, %v1531_v37  ;;  %v1902_v25 = vpop.f32.mrb[26].mxu0  ;;  %v1943_v33 = vpop.f32.mrb[34].mxu1  ;;  %v1942_v40 = vadd.f32 %v1941_v29, %v1539_v35 }
 0x35b   :  { %v7299_v41 = vmul.f32 -1.442695, %v1899_v27  ;;  %v1903_v7 = vpop.f32.mrb[27].mxu0  ;;  %v1944_v39 = vpop.f32.mrb[35].mxu1 }
 0x35c   :  { %v7300_v8 = vmul.f32 -1.442695, %v1901_v21  ;;  %v7301_v12 = vmul.f32 -1.442695, %v1942_v40  ;;  %v11239_v7 = vld [vmem:[#allocation52_spill] sm:$0xff] }
 0x35d   :  { %8652 = vpow2.f32 %v7299_v41 }
 0x35e   :  { %8654 = vpow2.f32 %v7300_v8 }
 0x35f   :  { %8656 = vpow2.f32 %v7301_v12  ;;  %v11238_v12 = vld [vmem:[#allocation39_spill] sm:$0xff] }
 0x360   :  { %8658 = vtanh.f32 %v1940_v20 }
 0x367   :  { %v8653_v19 = vpop.eup %8652 }
 0x368   :  { %v8655_v43 = vpop.eup %8654  ;;  %v1949_v24 = vadd.f32 1.0, %v8653_v19 }
 0x369   :  { %v1955_v25 = vadd.f32 1.0, %v8655_v43  ;;  %v8657_v27 = vpop.eup %8656  ;;  %v11240_v43 = vld [vmem:[#allocation40_spill] sm:$0xff] }
 0x36a   :  { %8660 = vrcp.f32 %v1949_v24  ;;  %v8659_v33 = vpop.eup %8658  ;;  %v1962_v41 = vadd.f32 1.0, %v8657_v27 }
 0x36b   :  { %8662 = vrcp.f32 %v1955_v25 }
 0x36c   :  { %8664 = vrcp.f32 %v1962_v41 }
 0x374   :  { %v8661_v21 = vpop.eup %8660 }
 0x375   :  { %v8663_v39 = vpop.eup %8662  ;;  %v1966_v23 = vmul.f32 %v8661_v21, %v8659_v33 }
 0x376   :  { %v1965_v35 = vmul.f32 %v8663_v39, %v9438_v50 }
 0x378   :  { %v9753_v29 = vadd.f32 %v1966_v23, %v1965_v35  ;;  %v2206_v40 = vpop.f32.mrb[28].mxu0  ;;  %v2247_v10 = vpop.f32.mrb[36].mxu1 }
 0x379   :  { %v2254_v19 = vadd.f32 %v2206_v40, %v11237_v13  ;;  %v2256_v20 = vadd.f32 %v2247_v10, %v11238_v12  ;;  %v2208_v37 = vpop.f32.mrb[29].mxu0  ;;  %v2249_v30 = vpop.f32.mrb[37].mxu1 }
 0x37a   :  { %v2255_v8 = vadd.f32 %v2208_v37, %v11239_v7  ;;  %v2257_v24 = vadd.f32 %v2249_v30, %v11240_v43  ;;  %v2210_v25 = vpop.f32.mrb[30].mxu0  ;;  %v2251_v33 = vpop.f32.mrb[38].mxu1  ;;  %8666 = vtanh.f32 %v9753_v29 }
 0x37b   :  { %v7334_v50 = vmul.f32 -1.442695, %v2254_v19  ;;  %v2211_v27 = vpop.f32.mrb[31].mxu0  ;;  %v2252_v21 = vpop.f32.mrb[39].mxu1 }
 0x37c   :  { %v7335_v39 = vmul.f32 -1.442695, %v2255_v8  ;;  %v8665_v23 = vpop.eup %8664  ;;  %v7336_v35 = vmul.f32 -1.442695, %v2257_v24 }
 0x37d   :  { %8668 = vpow2.f32 %v7334_v50 }
 0x37e   :  { %8670 = vpow2.f32 %v7335_v39 }
 0x37f   :  { %8672 = vpow2.f32 %v7336_v35  ;;  %v11283_v35 = vld [vmem:[#allocation78_spill] sm:$0xff] }
 0x380   :  { %8674 = vtanh.f32 %v2256_v20 }
 0x384   :  { %v8667_v41 = vpop.eup %8666 }
 0x385   :  { %v9760_v40 = vmul.f32 %v8667_v41, %v8665_v23  ;;  %v11281_v23 = vld [vmem:[#allocation76_spill] sm:$0xff]  ;;  %v11282_v41 = vld [vmem:[#allocation77_spill] sm:$0xff] }
 0x387   :  { %11241 = vst [vmem:[#allocation51_spill] sm:$0xff] %v9760_v40  ;;  %v8669_v10 = vpop.eup %8668  ;;  %v1970_v13 = vpack.c.bf16 %v9760_v40, %v9760_v40  ;;  %v10063_v40 = vld [vmem:[#allocation6 + $0xc4] ss:$16 sps:$4 sm:$0xff]  }
 0x388   :  { %v8671_v12 = vpop.eup %8670  ;;  %v2261_v37 = vadd.f32 1.0, %v8669_v10  ;;  %v11284_v10 = vld [vmem:[#allocation79_spill] sm:$0xff] }
 0x389   :  { %v2267_v30 = vadd.f32 1.0, %v8671_v12  ;;  %2721 = vmatprep.mubr.bf16.mxu0 %v1970_v13  ;;  %2762 = vmatprep.mubr.bf16.mxu1 %v1970_v13  ;;  %v8673_v19 = vpop.eup %8672  ;;  %v11285_v13 = vld [vmem:[#allocation80_spill] sm:$0xff]  ;;  %v11286_v12 = vld [vmem:[#allocation81_spill] sm:$0xff] }
 0x38a   :  { %8676 = vrcp.f32 %v2261_v37  ;;  %v8675_v7 = vpop.eup %8674  ;;  %v2274_v25 = vadd.f32 1.0, %v8673_v19  ;;  %v11287_v37 = vld [vmem:[#allocation82_spill] sm:$0xff]  ;;  %v11289_v19 = vld [vmem:[#allocation84_spill] sm:$0xff] }
 0x38b   :  { %8678 = vrcp.f32 %v2267_v30  ;;  %v11288_v30 = vld [vmem:[#allocation83_spill] sm:$0xff] }
 0x38c   :  { %8680 = vrcp.f32 %v2274_v25  ;;  %v11294_v25 = vld [vmem:[#allocation89_spill] sm:$0xff] }
 0x394   :  { %v8677_v8 = vpop.eup %8676 }
 0x395   :  { %v8679_v43 = vpop.eup %8678  ;;  %v2278_v24 = vmul.f32 %v8677_v8, %v8675_v7  ;;  %v11290_v7 = vld [vmem:[#allocation85_spill] sm:$0xff]  ;;  %v11291_v8 = vld [vmem:[#allocation86_spill] sm:$0xff] }
 0x396   :  { %v2277_v33 = vmul.f32 %v8679_v43, %v9450_v31  ;;  %v8681_v27 = vpop.eup %8680  ;;  %v11242_v31 = vld [vmem:[#allocation11_spill] sm:$0xff] }
 0x397   :  { %v11292_v43 = vld [vmem:[#allocation87_spill] sm:$0xff] }
 0x398   :  { %v9765_v50 = vadd.f32 %v2278_v24, %v2277_v33  ;;  %v11293_v24 = vld [vmem:[#allocation88_spill] sm:$0xff]  ;;  %v11295_v33 = vld [vmem:[#allocation90_spill] sm:$0xff] }
 0x39a   :  { %8682 = vtanh.f32 %v9765_v50 }
 0x3a4   :  { %v8683_v20 = vpop.eup %8682 }
 0x3a5   :  { %v2281_v21 = vmul.f32 %v8683_v20, %v8681_v27  ;;  %v11296_v27 = vld [vmem:[#allocation91_spill] sm:$0xff]  ;;  %v11297_v20 = vld [vmem:[#allocation92_spill] sm:$0xff] }
 0x3a7   :  { %v2282_v39 = vpack.c.bf16 %v2281_v21, %v2281_v21  ;;  %v9864_v21 = vld [vmem:[#allocation4 + $0x4] ss:$16 sps:$4 sm:$0xff]  }
 0x3a9   :  { %2722 = vmatmul.mubr.bf16.vlgmr.msra.gmra.mrb[32].mxu0 %v2282_v39  ;;  %2763 = vmatmul.mubr.bf16.vlgmr.msra.gmra.mrb[40].mxu1 %v2282_v39 }
 0x3aa   :  { %2998 = vmatpush1.bf16.msra.mxu0 %v9453_v28  ;;  %3039 = vmatpush1.bf16.msra.mxu1 %v9455_v38  ;;  %v11243_v28 = vld [vmem:[#allocation12_spill] sm:$0xff]  ;;  %v11244_v38 = vld [vmem:[#allocation13_spill] sm:$0xff] }
 0x3ab   :  { %2999 = vmatprep.subr.bf16.mxu0 %v9459_v26  ;;  %3040 = vmatprep.subr.bf16.mxu1 %v9461_v22  ;;  %v11245_v26 = vld [vmem:[#allocation14_spill] sm:$0xff]  ;;  %v11246_v22 = vld [vmem:[#allocation15_spill] sm:$0xff] }
 0x3ac   :  { %3029 = vmatprep.mubr.bf16.mxu0 %v11146_v34  ;;  %3070 = vmatprep.mubr.bf16.mxu1 %v11146_v34 }
 0x3ae   :  { %3000 = vmatpush1.bf16.msra.mxu0 %v9467_v44  ;;  %3041 = vmatpush1.bf16.msra.mxu1 %v9469_v32  ;;  %v11247_v44 = vld [vmem:[#allocation16_spill] sm:$0xff]  ;;  %v11248_v32 = vld [vmem:[#allocation17_spill] sm:$0xff] }
 0x3af   :  { %3001 = vmatprep.subr.bf16.mxu0 %v9473_v0  ;;  %3042 = vmatprep.subr.bf16.mxu1 %v9475_v45  ;;  %v11249_v0 = vld [vmem:[#allocation18_spill] sm:$0xff]  ;;  %v11250_v45 = vld [vmem:[#allocation19_spill] sm:$0xff] }
 0x3b2   :  { %3002 = vmatpush1.bf16.msra.mxu0 %v9481_v46  ;;  %3043 = vmatpush1.bf16.msra.mxu1 %v9483_v47  ;;  %v11251_v46 = vld [vmem:[#allocation20_spill] sm:$0xff]  ;;  %v11252_v47 = vld [vmem:[#allocation21_spill] sm:$0xff] }
 0x3b3   :  { %3003 = vmatprep.subr.bf16.mxu0 %v9487_v48  ;;  %3044 = vmatprep.subr.bf16.mxu1 %v9489_v49  ;;  %v11253_v48 = vld [vmem:[#allocation22_spill] sm:$0xff]  ;;  %v11254_v49 = vld [vmem:[#allocation24_spill] sm:$0xff] }
 0x3b6   :  { %3004 = vmatpush1.bf16.msra.mxu0 %v9493_v51  ;;  %3045 = vmatpush1.bf16.msra.mxu1 %v9495_v52  ;;  %v11255_v51 = vld [vmem:[#allocation26_spill] sm:$0xff]  ;;  %v11256_v52 = vld [vmem:[#allocation23_spill] sm:$0xff] }
 0x3b7   :  { %3005 = vmatprep.subr.bf16.mxu0 %v9499_v53  ;;  %3046 = vmatprep.subr.bf16.mxu1 %v9501_v54  ;;  %v11257_v53 = vld [vmem:[#allocation25_spill] sm:$0xff]  ;;  %v11258_v54 = vld [vmem:[#allocation27_spill] sm:$0xff]  ;;  %11321 = vst [vmem:[#allocation23_spill] sm:$0xff] %v10063_v40 }
 0x3ba   :  { %3006 = vmatpush1.bf16.msra.mxu0 %v9505_v55  ;;  %3047 = vmatpush1.bf16.msra.mxu1 %v9507_v56  ;;  %v11259_v55 = vld [vmem:[#allocation28_spill] sm:$0xff]  ;;  %v11260_v56 = vld [vmem:[#allocation29_spill] sm:$0xff] }
 0x3bb   :  { %3007 = vmatprep.subr.bf16.mxu0 %v9511_v57  ;;  %3048 = vmatprep.subr.bf16.mxu1 %v9513_v58  ;;  %v11261_v57 = vld [vmem:[#allocation30_spill] sm:$0xff]  ;;  %v11262_v58 = vld [vmem:[#allocation31_spill] sm:$0xff] }
 0x3be   :  { %3008 = vmatpush1.bf16.msra.mxu0 %v9517_v59  ;;  %3049 = vmatpush1.bf16.msra.mxu1 %v9519_v60  ;;  %v11263_v59 = vld [vmem:[#allocation32_spill] sm:$0xff]  ;;  %v11264_v60 = vld [vmem:[#allocation33_spill] sm:$0xff] }
 0x3bf   :  { %3009 = vmatprep.subr.bf16.mxu0 %v9523_v61  ;;  %3050 = vmatprep.subr.bf16.mxu1 %v9525_v62  ;;  %v11265_v61 = vld [vmem:[#allocation34_spill] sm:$0xff]  ;;  %v11266_v62 = vld [vmem:[#allocation36_spill] sm:$0xff] }
 0x3c2   :  { %3010 = vmatpush1.bf16.msra.mxu0 %v9529_v63  ;;  %3051 = vmatpush1.bf16.msra.mxu1 %v9531_v1  ;;  %v11267_v63 = vld [vmem:[#allocation35_spill] sm:$0xff]  ;;  %v11268_v1 = vld [vmem:[#allocation46_spill] sm:$0xff] }
 0x3c3   :  { %3011 = vmatprep.subr.bf16.mxu0 %v9535_v2  ;;  %3052 = vmatprep.subr.bf16.mxu1 %v9537_v3  ;;  %v11269_v2 = vld [vmem:[#allocation37_spill] sm:$0xff]  ;;  %v11270_v3 = vld [vmem:[#allocation48_spill] sm:$0xff] }
 0x3c6   :  { %3012 = vmatpush1.bf16.msra.mxu0 %v9541_v4  ;;  %3053 = vmatpush1.bf16.msra.mxu1 %v9543_v5  ;;  %v11271_v4 = vld [vmem:[#allocation38_spill] sm:$0xff]  ;;  %v11272_v5 = vld [vmem:[#allocation67_spill] sm:$0xff] }
 0x3c7   :  { %3514 = vmatprep.subr.bf16.mxu0 %v9551_v6  ;;  %3555 = vmatprep.subr.bf16.mxu1 %v9553_v9  ;;  %v11273_v6 = vld [vmem:[#allocation68_spill] sm:$0xff]  ;;  %v11274_v9 = vld [vmem:[#allocation69_spill] sm:$0xff] }
 0x3c9   :  { %3030 = vmatmul.mubr.bf16.vlgmr.msra.gmra.mrb[36].mxu0 %v2282_v39  ;;  %3071 = vmatmul.mubr.bf16.vlgmr.msra.gmra.mrb[44].mxu1 %v2282_v39  ;;  %v9866_v39 = vld [vmem:[#allocation4 + $0xc] ss:$16 sps:$4 sm:$0xff]  }
 0x3ca   :  { %3515 = vmatpush1.bf16.msra.mxu0 %v9555_v11  ;;  %3556 = vmatpush1.bf16.msra.mxu1 %v9557_v14  ;;  %v11275_v11 = vld [vmem:[#allocation70_spill] sm:$0xff]  ;;  %v11276_v14 = vld [vmem:[#allocation71_spill] sm:$0xff] }
 0x3cb   :  { %3516 = vmatprep.subr.bf16.mxu0 %v9563_v15  ;;  %3557 = vmatprep.subr.bf16.mxu1 %v9565_v16  ;;  %v11277_v15 = vld [vmem:[#allocation72_spill] sm:$0xff]  ;;  %v11278_v16 = vld [vmem:[#allocation73_spill] sm:$0xff] }
 0x3ce   :  { %3517 = vmatpush1.bf16.msra.mxu0 %v9567_v17  ;;  %3558 = vmatpush1.bf16.msra.mxu1 %v9569_v18  ;;  %v11279_v17 = vld [vmem:[#allocation74_spill] sm:$0xff]  ;;  %v11280_v18 = vld [vmem:[#allocation75_spill] sm:$0xff] }
 0x3cf   :  { %3518 = vmatprep.subr.bf16.mxu0 %v11242_v31  ;;  %3559 = vmatprep.subr.bf16.mxu1 %v11243_v28  ;;  %v2347_v31 = vld [vmem:[%s10871_s5] sm:$0xf] }
 0x3d0   :  { %v11298_v28 = vld [vmem:[#allocation42_spill] sm:$0xff] }
 0x3d2   :  { %3519 = vmatpush1.bf16.msra.mxu0 %v11244_v38  ;;  %3560 = vmatpush1.bf16.msra.mxu1 %v11245_v26  ;;  %v2352_v38 = vrot.slane %v2347_v31, %v11298_v28  ;;  %v11299_v26 = vld [vmem:[#allocation44_spill] sm:$0xff] }
 0x3d3   :  { %3520 = vmatprep.subr.bf16.mxu0 %v11246_v22  ;;  %3561 = vmatprep.subr.bf16.mxu1 %v11247_v44  ;;  %v2356_v22 = vrot.slane %v2347_v31, %v11299_v26 }
 0x3d6   :  { %3521 = vmatpush1.bf16.msra.mxu0 %v11248_v32  ;;  %3562 = vmatpush1.bf16.msra.mxu1 %v11249_v0 }
 0x3d7   :  { %3522 = vmatprep.subr.bf16.mxu0 %v11250_v45  ;;  %3563 = vmatprep.subr.bf16.mxu1 %v11251_v46 }
 0x3da   :  { %3523 = vmatpush1.bf16.msra.mxu0 %v11252_v47  ;;  %3564 = vmatpush1.bf16.msra.mxu1 %v11253_v48 }
 0x3db   :  { %3524 = vmatprep.subr.bf16.mxu0 %v11254_v49  ;;  %3565 = vmatprep.subr.bf16.mxu1 %v11255_v51 }
 0x3de   :  { %3525 = vmatpush1.bf16.msra.mxu0 %v11256_v52  ;;  %3566 = vmatpush1.bf16.msra.mxu1 %v11257_v53 }
 0x3df   :  { %3526 = vmatprep.subr.bf16.mxu0 %v11258_v54  ;;  %3567 = vmatprep.subr.bf16.mxu1 %v11259_v55  ;;  %v2364_v55 = vrot.slane %v2347_v31, %v11174_v36 }
 0x3e2   :  { %3527 = vmatpush1.bf16.msra.mxu0 %v11260_v56  ;;  %3568 = vmatpush1.bf16.msra.mxu1 %v11261_v57  ;;  %v2360_v57 = vrot.slane %v2347_v31, %v11175_v42 }
 0x3e3   :  { %3528 = vmatprep.subr.bf16.mxu0 %v11262_v58  ;;  %3569 = vmatprep.subr.bf16.mxu1 %v11263_v59 }
 0x3e6   :  { %3529 = vmatpush1.bf16.msra.mxu0 %v11264_v60  ;;  %3570 = vmatpush1.bf16.msra.mxu1 %v11265_v61 }
 0x3e7   :  { %3530 = vmatprep.subr.bf16.mxu0 %v11266_v62  ;;  %3571 = vmatprep.subr.bf16.mxu1 %v11267_v63 }
 0x3ea   :  { %3531 = vmatpush1.bf16.msra.mxu0 %v11268_v1  ;;  %3572 = vmatpush1.bf16.msra.mxu1 %v11269_v2 }
 0x3eb   :  { %3532 = vmatprep.subr.bf16.mxu0 %v11270_v3  ;;  %3573 = vmatprep.subr.bf16.mxu1 %v11271_v4 }
 0x3ee   :  { %3533 = vmatpush1.bf16.msra.mxu0 %v11272_v5  ;;  %3574 = vmatpush1.bf16.msra.mxu1 %v11273_v6 }
 0x3ef   :  { %3534 = vmatprep.subr.bf16.mxu0 %v11274_v9  ;;  %3575 = vmatprep.subr.bf16.mxu1 %v11275_v11 }
 0x3f2   :  { %3535 = vmatpush1.bf16.msra.mxu0 %v11276_v14  ;;  %3576 = vmatpush1.bf16.msra.mxu1 %v11277_v15 }
 0x3f3   :  { %3536 = vmatprep.subr.bf16.mxu0 %v11278_v16  ;;  %3577 = vmatprep.subr.bf16.mxu1 %v11279_v17  ;;  %v11300_v16 = vld [vmem:[#allocation54_spill] sm:$0xff] }
 0x3f6   :  { %3537 = vmatpush1.bf16.msra.mxu0 %v11280_v18  ;;  %3578 = vmatpush1.bf16.msra.mxu1 %v11281_v23  ;;  %v11301_v18 = vld [vmem:[#allocation41_spill] sm:$0xff] }
 0x3f7   :  { %3538 = vmatprep.subr.bf16.mxu0 %v11282_v41  ;;  %3579 = vmatprep.subr.bf16.mxu1 %v11283_v35 }
 0x3fa   :  { %3539 = vmatpush1.bf16.msra.mxu0 %v11284_v10  ;;  %3580 = vmatpush1.bf16.msra.mxu1 %v11285_v13  ;;  %v11302_v10 = vld [vmem:[#allocation56_spill] sm:$0xff] }
 0x3fb   :  { %3540 = vmatprep.subr.bf16.mxu0 %v11286_v12  ;;  %3581 = vmatprep.subr.bf16.mxu1 %v11287_v37  ;;  %v11303_v12 = vld [vmem:[#allocation43_spill] sm:$0xff] }
 0x3fe   :  { %3541 = vmatpush1.bf16.msra.mxu0 %v11288_v30  ;;  %3582 = vmatpush1.bf16.msra.mxu1 %v11289_v19 }
 0x3ff   :  { %3542 = vmatprep.subr.bf16.mxu0 %v11290_v7  ;;  %3583 = vmatprep.subr.bf16.mxu1 %v11291_v8 }
 0x402   :  { %3543 = vmatpush1.bf16.msra.mxu0 %v11292_v43  ;;  %3584 = vmatpush1.bf16.msra.mxu1 %v11293_v24 }
 0x403   :  { %3544 = vmatprep.subr.bf16.mxu0 %v11294_v25  ;;  %3585 = vmatprep.subr.bf16.mxu1 %v11295_v33 }
 0x406   :  { %3545 = vmatpush1.bf16.msra.mxu0 %v11296_v27  ;;  %3586 = vmatpush1.bf16.msra.mxu1 %v11297_v20 }
 0x407   :  { %3822 = vmatprep.subr.bf16.mxu0 %v9864_v21  ;;  %3863 = vmatprep.subr.bf16.mxu1 %v9866_v39 }
 0x47c   :  { %v2723_v44 = vpop.f32.mrb[32].mxu0  ;;  %v2764_v32 = vpop.f32.mrb[40].mxu1 }
 0x47d   :  { %v2724_v0 = vadd.f32 %v2723_v44, %v2352_v38  ;;  %v2725_v45 = vpop.f32.mrb[33].mxu0  ;;  %v2766_v46 = vpop.f32.mrb[41].mxu1  ;;  %v2765_v59 = vadd.f32 %v2764_v32, %v2360_v57 }
 0x47e   :  { %v2726_v47 = vadd.f32 %v2725_v45, %v2356_v22  ;;  %v2727_v48 = vpop.f32.mrb[34].mxu0  ;;  %v2768_v49 = vpop.f32.mrb[42].mxu1  ;;  %v2767_v56 = vadd.f32 %v2766_v46, %v2364_v55  ;;  %v9893_v55 = vld [vmem:[#allocation4] ss:$16 sps:$4 sm:$0xff]  }
 0x47f   :  { %v7401_v51 = vmul.f32 -1.442695, %v2724_v0  ;;  %v2728_v52 = vpop.f32.mrb[35].mxu0  ;;  %v2769_v53 = vpop.f32.mrb[43].mxu1 }
 0x480   :  { %v7402_v54 = vmul.f32 -1.442695, %v2726_v47  ;;  %v7403_v58 = vmul.f32 -1.442695, %v2767_v56  ;;  %v9895_v56 = vld [vmem:[#allocation4 + $0x8] ss:$16 sps:$4 sm:$0xff]  }
 0x481   :  { %8684 = vpow2.f32 %v7401_v51 }
 0x482   :  { %8686 = vpow2.f32 %v7402_v54 }
 0x483   :  { %8688 = vpow2.f32 %v7403_v58  ;;  %v9899_v58 = vld [vmem:[#allocation4 + $0x24] ss:$16 sps:$4 sm:$0xff]  }
 0x484   :  { %8690 = vtanh.f32 %v2765_v59  ;;  %v9901_v59 = vld [vmem:[#allocation4 + $0x2c] ss:$16 sps:$4 sm:$0xff]  }
 0x48b   :  { %v8685_v60 = vpop.eup %8684 }
 0x48c   :  { %v8687_v61 = vpop.eup %8686  ;;  %v2774_v62 = vadd.f32 1.0, %v8685_v60  ;;  %v9909_v60 = vld [vmem:[#allocation4 + $0x28] ss:$16 sps:$4 sm:$0xff]  }
 0x48d   :  { %v2780_v63 = vadd.f32 1.0, %v8687_v61  ;;  %v8689_v1 = vpop.eup %8688  ;;  %v9913_v61 = vld [vmem:[#allocation4 + $0x44] ss:$16 sps:$4 sm:$0xff]  }
 0x48e   :  { %8692 = vrcp.f32 %v2774_v62  ;;  %v8691_v2 = vpop.eup %8690  ;;  %v2787_v6 = vadd.f32 1.0, %v8689_v1  ;;  %v9915_v62 = vld [vmem:[#allocation4 + $0x4c] ss:$16 sps:$4 sm:$0xff]   ;;  %v9923_v1 = vld [vmem:[#allocation4 + $0x48] ss:$16 sps:$4 sm:$0xff]  }
 0x48f   :  { %8694 = vrcp.f32 %v2780_v63  ;;  %v9921_v63 = vld [vmem:[#allocation4 + $0x40] ss:$16 sps:$4 sm:$0xff]  }
 0x490   :  { %8696 = vrcp.f32 %v2787_v6  ;;  %v9939_v6 = vld [vmem:[#allocation4 + $0x84] ss:$16 sps:$4 sm:$0xff]  }
 0x498   :  { %v8693_v3 = vpop.eup %8692 }
 0x499   :  { %v8695_v4 = vpop.eup %8694  ;;  %v2791_v5 = vmul.f32 %v8693_v3, %v8691_v2  ;;  %v9927_v2 = vld [vmem:[#allocation4 + $0x64] ss:$16 sps:$4 sm:$0xff]   ;;  %v9929_v3 = vld [vmem:[#allocation4 + $0x6c] ss:$16 sps:$4 sm:$0xff]  }
 0x49a   :  { %v2790_v9 = vmul.f32 %v8695_v4, %v9753_v29  ;;  %v8697_v24 = vpop.eup %8696  ;;  %v9933_v4 = vld [vmem:[#allocation4 + $0x60] ss:$16 sps:$4 sm:$0xff]  }
 0x49c   :  { %v9878_v11 = vadd.f32 %v2791_v5, %v2790_v9  ;;  %v3031_v14 = vpop.f32.mrb[36].mxu0  ;;  %v3072_v15 = vpop.f32.mrb[44].mxu1  ;;  %v9935_v5 = vld [vmem:[#allocation4 + $0x68] ss:$16 sps:$4 sm:$0xff]   ;;  %v9941_v9 = vld [vmem:[#allocation4 + $0x8c] ss:$16 sps:$4 sm:$0xff]  }
 0x49d   :  { %v3079_v17 = vadd.f32 %v3031_v14, %v11300_v16  ;;  %v3081_v23 = vadd.f32 %v3072_v15, %v11301_v18  ;;  %v3033_v41 = vpop.f32.mrb[37].mxu0  ;;  %v3074_v35 = vpop.f32.mrb[45].mxu1  ;;  %v9945_v14 = vld [vmem:[#allocation4 + $0x80] ss:$16 sps:$4 sm:$0xff]   ;;  %v9947_v15 = vld [vmem:[#allocation4 + $0x88] ss:$16 sps:$4 sm:$0xff]  }
 0x49e   :  { %v3080_v13 = vadd.f32 %v3033_v41, %v11302_v10  ;;  %v3082_v37 = vadd.f32 %v3074_v35, %v11303_v12  ;;  %v3035_v30 = vpop.f32.mrb[38].mxu0  ;;  %v3076_v19 = vpop.f32.mrb[46].mxu1  ;;  %8698 = vtanh.f32 %v9878_v11  ;;  %v9951_v16 = vld [vmem:[#allocation4 + $0xa4] ss:$16 sps:$4 sm:$0xff]   ;;  %v9957_v18 = vld [vmem:[#allocation4 + $0xa0] ss:$16 sps:$4 sm:$0xff]  }
 0x49f   :  { %v7436_v29 = vmul.f32 -1.442695, %v3079_v17  ;;  %v3036_v7 = vpop.f32.mrb[39].mxu0  ;;  %v3077_v8 = vpop.f32.mrb[47].mxu1  ;;  %v9953_v17 = vld [vmem:[#allocation4 + $0xac] ss:$16 sps:$4 sm:$0xff]  }
 0x4a0   :  { %v7437_v43 = vmul.f32 -1.442695, %v3080_v13  ;;  %v7438_v33 = vmul.f32 -1.442695, %v3082_v37  ;;  %v9963_v41 = vld [vmem:[#allocation4 + $0xc4] ss:$16 sps:$4 sm:$0xff]  }
 0x4a1   :  { %8700 = vpow2.f32 %v7436_v29  ;;  %v9965_v35 = vld [vmem:[#allocation4 + $0xcc] ss:$16 sps:$4 sm:$0xff]   ;;  %v9969_v10 = vld [vmem:[#allocation4 + $0xc0] ss:$16 sps:$4 sm:$0xff]   ;;  %v9971_v13 = vld [vmem:[#allocation4 + $0xc8] ss:$16 sps:$4 sm:$0xff]  }
 0x4a2   :  { %8702 = vpow2.f32 %v7437_v43  ;;  %v9975_v12 = vld [vmem:[#allocation4 + $0xe4] ss:$16 sps:$4 sm:$0xff]   ;;  %v9977_v37 = vld [vmem:[#allocation4 + $0xec] ss:$16 sps:$4 sm:$0xff]   ;;  %v9981_v30 = vld [vmem:[#allocation4 + $0xe0] ss:$16 sps:$4 sm:$0xff]  }
 0x4a3   :  { %8704 = vpow2.f32 %v7438_v33  ;;  %v9983_v19 = vld [vmem:[#allocation4 + $0xe8] ss:$16 sps:$4 sm:$0xff]   ;;  %v9991_v29 = vld [vmem:[#allocation6 + $0x4] ss:$16 sps:$4 sm:$0xff]   ;;  %v9993_v7 = vld [vmem:[#allocation6 + $0xc] ss:$16 sps:$4 sm:$0xff]  }
 0x4a4   :  { %8706 = vtanh.f32 %v3081_v23  ;;  %v9959_v23 = vld [vmem:[#allocation4 + $0xa8] ss:$16 sps:$4 sm:$0xff]   ;;  %v9995_v8 = vld [vmem:[#allocation6] ss:$16 sps:$4 sm:$0xff]  }
 0x4a5   :  { %v9997_v43 = vld [vmem:[#allocation6 + $0x8] ss:$16 sps:$4 sm:$0xff]   ;;  %v10007_v33 = vld [vmem:[#allocation6 + $0x20] ss:$16 sps:$4 sm:$0xff]  }
 0x4a8   :  { %v8699_v25 = vpop.eup %8698 }
 0x4a9   :  { %v9885_v27 = vmul.f32 %v8699_v25, %v8697_v24  ;;  %v10003_v24 = vld [vmem:[#allocation6 + $0x24] ss:$16 sps:$4 sm:$0xff]   ;;  %v10005_v25 = vld [vmem:[#allocation6 + $0x2c] ss:$16 sps:$4 sm:$0xff]  }
 0x4ab   :  { %11304 = vst [vmem:[#allocation39_spill] sm:$0xff] %v9885_v27  ;;  %v8701_v20 = vpop.eup %8700  ;;  %v2795_v31 = vpack.c.bf16 %v9885_v27, %v9885_v27  ;;  %v10057_v27 = vld [vmem:[#allocation6 + $0xa8] ss:$16 sps:$4 sm:$0xff]  }
 0x4ac   :  { %v8703_v38 = vpop.eup %8702  ;;  %v3086_v22 = vadd.f32 1.0, %v8701_v20  ;;  %v10009_v20 = vld [vmem:[#allocation6 + $0x28] ss:$16 sps:$4 sm:$0xff]   ;;  %11320 = vst [vmem:[#allocation26_spill] sm:$0xff] %v10057_v27 }
 0x4ad   :  { %v3092_v44 = vadd.f32 1.0, %v8703_v38  ;;  %3546 = vmatprep.mubr.bf16.mxu0 %v2795_v31  ;;  %3587 = vmatprep.mubr.bf16.mxu1 %v2795_v31  ;;  %v8705_v32 = vpop.eup %8704  ;;  %v10015_v31 = vld [vmem:[#allocation6 + $0x44] ss:$16 sps:$4 sm:$0xff]   ;;  %v10017_v38 = vld [vmem:[#allocation6 + $0x4c] ss:$16 sps:$4 sm:$0xff]  }
 0x4ae   :  { %8708 = vrcp.f32 %v3086_v22  ;;  %v8707_v0 = vpop.eup %8706  ;;  %v3099_v48 = vadd.f32 1.0, %v8705_v32  ;;  %11305 = vst [vmem:[#allocation52_spill] sm:$0xff] %v10015_v31  ;;  %11306 = vst [vmem:[#allocation40_spill] sm:$0xff] %v10017_v38  ;;  %v10019_v22 = vld [vmem:[#allocation6 + $0x40] ss:$16 sps:$4 sm:$0xff]  }
 0x4af   :  { %8710 = vrcp.f32 %v3092_v44  ;;  %11307 = vst [vmem:[#allocation11_spill] sm:$0xff] %v10019_v22  ;;  %v10021_v44 = vld [vmem:[#allocation6 + $0x48] ss:$16 sps:$4 sm:$0xff]   ;;  %v10027_v32 = vld [vmem:[#allocation6 + $0x64] ss:$16 sps:$4 sm:$0xff]  }
 0x4b0   :  { %8712 = vrcp.f32 %v3099_v48  ;;  %11308 = vst [vmem:[#allocation12_spill] sm:$0xff] %v10021_v44  ;;  %11309 = vst [vmem:[#allocation13_spill] sm:$0xff] %v10027_v32  ;;  %v10041_v48 = vld [vmem:[#allocation6 + $0x8c] ss:$16 sps:$4 sm:$0xff]  }
 0x4b1   :  { %11314 = vst [vmem:[#allocation18_spill] sm:$0xff] %v10041_v48 }
 0x4b8   :  { %v8709_v45 = vpop.eup %8708 }
 0x4b9   :  { %v8711_v46 = vpop.eup %8710  ;;  %v3103_v47 = vmul.f32 %v8709_v45, %v8707_v0  ;;  %v10029_v0 = vld [vmem:[#allocation6 + $0x6c] ss:$16 sps:$4 sm:$0xff]   ;;  %v10031_v45 = vld [vmem:[#allocation6 + $0x60] ss:$16 sps:$4 sm:$0xff]  }
 0x4ba   :  { %v3102_v49 = vmul.f32 %v8711_v46, %v9765_v50  ;;  %v8713_v52 = vpop.eup %8712  ;;  %v9907_v50 = vld [vmem:[#allocation4 + $0x20] ss:$16 sps:$4 sm:$0xff]   ;;  %11310 = vst [vmem:[#allocation14_spill] sm:$0xff] %v10029_v0  ;;  %11311 = vst [vmem:[#allocation15_spill] sm:$0xff] %v10031_v45  ;;  %v10033_v46 = vld [vmem:[#allocation6 + $0x68] ss:$16 sps:$4 sm:$0xff]  }
 0x4bb   :  { %11312 = vst [vmem:[#allocation16_spill] sm:$0xff] %v10033_v46 }
 0x4bc   :  { %v9890_v51 = vadd.f32 %v3103_v47, %v3102_v49  ;;  %v10039_v47 = vld [vmem:[#allocation6 + $0x84] ss:$16 sps:$4 sm:$0xff]   ;;  %v10043_v49 = vld [vmem:[#allocation6 + $0x80] ss:$16 sps:$4 sm:$0xff]  }
 0x4bd   :  { %11313 = vst [vmem:[#allocation17_spill] sm:$0xff] %v10039_v47  ;;  %11315 = vst [vmem:[#allocation19_spill] sm:$0xff] %v10043_v49 }
 0x4be   :  { %8714 = vtanh.f32 %v9890_v51 }
 0x4c8   :  { %v8715_v53 = vpop.eup %8714 }
 0x4c9   :  { %v3106_v54 = vmul.f32 %v8715_v53, %v8713_v52  ;;  %v10045_v52 = vld [vmem:[#allocation6 + $0x88] ss:$16 sps:$4 sm:$0xff]   ;;  %v10051_v53 = vld [vmem:[#allocation6 + $0xa4] ss:$16 sps:$4 sm:$0xff]  }
 0x4ca   :  { %11316 = vst [vmem:[#allocation20_spill] sm:$0xff] %v10045_v52  ;;  %11317 = vst [vmem:[#allocation21_spill] sm:$0xff] %v10051_v53 }
 0x4cb   :  { %v9897_v57 = vpack.c.bf16 %v3106_v54, %v3106_v54  ;;  %v10053_v54 = vld [vmem:[#allocation6 + $0xac] ss:$16 sps:$4 sm:$0xff]  }
 0x4cc   :  { %11318 = vst [vmem:[#allocation22_spill] sm:$0xff] %v10053_v54 }
 0x4cd   :  { %3547 = vmatmul.mubr.bf16.vlgmr.msra.gmra.mrb[40].mxu0 %v9897_v57  ;;  %3588 = vmatmul.mubr.bf16.vlgmr.msra.gmra.mrb[48].mxu1 %v9897_v57 }
 0x4ce   :  { %3823 = vmatpush1.bf16.msra.mxu0 %v9893_v55  ;;  %3864 = vmatpush1.bf16.msra.mxu1 %v9895_v56 }
 0x4cf   :  { %3824 = vmatprep.subr.bf16.mxu0 %v9899_v58  ;;  %3865 = vmatprep.subr.bf16.mxu1 %v9901_v59 }
 0x4d0   :  { %3854 = vmatprep.mubr.bf16.mxu0 %v11146_v34  ;;  %3895 = vmatprep.mubr.bf16.mxu1 %v11146_v34 }
 0x4d2   :  { %3825 = vmatpush1.bf16.msra.mxu0 %v9907_v50  ;;  %3866 = vmatpush1.bf16.msra.mxu1 %v9909_v60 }
 0x4d3   :  { %3826 = vmatprep.subr.bf16.mxu0 %v9913_v61  ;;  %3867 = vmatprep.subr.bf16.mxu1 %v9915_v62 }
 0x4d6   :  { %3827 = vmatpush1.bf16.msra.mxu0 %v9921_v63  ;;  %3868 = vmatpush1.bf16.msra.mxu1 %v9923_v1 }
 0x4d7   :  { %3828 = vmatprep.subr.bf16.mxu0 %v9927_v2  ;;  %3869 = vmatprep.subr.bf16.mxu1 %v9929_v3 }
 0x4da   :  { %3829 = vmatpush1.bf16.msra.mxu0 %v9933_v4  ;;  %3870 = vmatpush1.bf16.msra.mxu1 %v9935_v5 }
 0x4db   :  { %3830 = vmatprep.subr.bf16.mxu0 %v9939_v6  ;;  %3871 = vmatprep.subr.bf16.mxu1 %v9941_v9 }
 0x4de   :  { %3831 = vmatpush1.bf16.msra.mxu0 %v9945_v14  ;;  %3872 = vmatpush1.bf16.msra.mxu1 %v9947_v15 }
 0x4df   :  { %3832 = vmatprep.subr.bf16.mxu0 %v9951_v16  ;;  %3873 = vmatprep.subr.bf16.mxu1 %v9953_v17 }
 0x4e2   :  { %3833 = vmatpush1.bf16.msra.mxu0 %v9957_v18  ;;  %3874 = vmatpush1.bf16.msra.mxu1 %v9959_v23 }
 0x4e3   :  { %3834 = vmatprep.subr.bf16.mxu0 %v9963_v41  ;;  %3875 = vmatprep.subr.bf16.mxu1 %v9965_v35 }
 0x4e6   :  { %3835 = vmatpush1.bf16.msra.mxu0 %v9969_v10  ;;  %3876 = vmatpush1.bf16.msra.mxu1 %v9971_v13 }
 0x4e7   :  { %3836 = vmatprep.subr.bf16.mxu0 %v9975_v12  ;;  %3877 = vmatprep.subr.bf16.mxu1 %v9977_v37 }
 0x4ea   :  { %3837 = vmatpush1.bf16.msra.mxu0 %v9981_v30  ;;  %3878 = vmatpush1.bf16.msra.mxu1 %v9983_v19 }
 0x4eb   :  { %4339 = vmatprep.subr.bf16.mxu0 %v9991_v29  ;;  %4380 = vmatprep.subr.bf16.mxu1 %v9993_v7 }
 0x4ed   :  { %3855 = vmatmul.mubr.bf16.vlgmr.msra.gmra.mrb[44].mxu0 %v9897_v57  ;;  %3896 = vmatmul.mubr.bf16.vlgmr.msra.gmra.mrb[52].mxu1 %v9897_v57  ;;  %v10055_v57 = vld [vmem:[#allocation6 + $0xa0] ss:$16 sps:$4 sm:$0xff]  }
 0x4ee   :  { %4340 = vmatpush1.bf16.msra.mxu0 %v9995_v8  ;;  %4381 = vmatpush1.bf16.msra.mxu1 %v9997_v43  ;;  %11319 = vst [vmem:[#allocation24_spill] sm:$0xff] %v10055_v57 }
 0x4ef   :  { %4341 = vmatprep.subr.bf16.mxu0 %v10003_v24  ;;  %4382 = vmatprep.subr.bf16.mxu1 %v10005_v25 }
 0x4f2   :  { %4342 = vmatpush1.bf16.msra.mxu0 %v10007_v33  ;;  %4383 = vmatpush1.bf16.msra.mxu1 %v10009_v20 }
 0x4f3   :  { %4343 = vmatprep.subr.bf16.mxu0 %v10015_v31  ;;  %4384 = vmatprep.subr.bf16.mxu1 %v10017_v38 }
 0x4f6   :  { %4344 = vmatpush1.bf16.msra.mxu0 %v10019_v22  ;;  %4385 = vmatpush1.bf16.msra.mxu1 %v10021_v44 }
 0x4f7   :  { %4345 = vmatprep.subr.bf16.mxu0 %v10027_v32  ;;  %4386 = vmatprep.subr.bf16.mxu1 %v10029_v0 }
 0x4fa   :  { %4346 = vmatpush1.bf16.msra.mxu0 %v10031_v45  ;;  %4387 = vmatpush1.bf16.msra.mxu1 %v10033_v46 }
 0x4fb   :  { %4347 = vmatprep.subr.bf16.mxu0 %v10039_v47  ;;  %4388 = vmatprep.subr.bf16.mxu1 %v10041_v48  ;;  %v10069_v48 = vld [vmem:[#allocation6 + $0xc8] ss:$16 sps:$4 sm:$0xff]   ;;  %v10145_v47 = vld [vmem:[#allocation6 + $0x1a4] ss:$16 sps:$4 sm:$0xff]  }
 0x4fc   :  { %11324 = vst [vmem:[#allocation28_spill] sm:$0xff] %v10069_v48  ;;  %11349 = vst [vmem:[#allocation79_spill] sm:$0xff] %v10145_v47 }
 0x4fe   :  { %4348 = vmatpush1.bf16.msra.mxu0 %v10043_v49  ;;  %4389 = vmatpush1.bf16.msra.mxu1 %v10045_v52  ;;  %v10065_v49 = vld [vmem:[#allocation6 + $0xcc] ss:$16 sps:$4 sm:$0xff]   ;;  %v10067_v52 = vld [vmem:[#allocation6 + $0xc0] ss:$16 sps:$4 sm:$0xff]  }
 0x4ff   :  { %4349 = vmatprep.subr.bf16.mxu0 %v10051_v53  ;;  %4390 = vmatprep.subr.bf16.mxu1 %v10053_v54  ;;  %11322 = vst [vmem:[#allocation25_spill] sm:$0xff] %v10065_v49  ;;  %11323 = vst [vmem:[#allocation27_spill] sm:$0xff] %v10067_v52  ;;  %v10075_v54 = vld [vmem:[#allocation6 + $0xe4] ss:$16 sps:$4 sm:$0xff]   ;;  %v10081_v53 = vld [vmem:[#allocation6 + $0xe8] ss:$16 sps:$4 sm:$0xff]  }
 0x500   :  { %11325 = vst [vmem:[#allocation29_spill] sm:$0xff] %v10075_v54  ;;  %11328 = vst [vmem:[#allocation32_spill] sm:$0xff] %v10081_v53 }
 0x502   :  { %4350 = vmatpush1.bf16.msra.mxu0 %v10055_v57  ;;  %4391 = vmatpush1.bf16.msra.mxu1 %v10057_v27  ;;  %v10077_v57 = vld [vmem:[#allocation6 + $0xec] ss:$16 sps:$4 sm:$0xff]   ;;  %v10079_v27 = vld [vmem:[#allocation6 + $0xe0] ss:$16 sps:$4 sm:$0xff]  }
 0x503   :  { %4351 = vmatprep.subr.bf16.mxu0 %v10063_v40  ;;  %4392 = vmatprep.subr.bf16.mxu1 %v10065_v49  ;;  %11326 = vst [vmem:[#allocation30_spill] sm:$0xff] %v10077_v57  ;;  %11327 = vst [vmem:[#allocation31_spill] sm:$0xff] %v10079_v27  ;;  %v10087_v49 = vld [vmem:[#allocation6 + $0x104] ss:$16 sps:$4 sm:$0xff]   ;;  %v10093_v40 = vld [vmem:[#allocation6 + $0x108] ss:$16 sps:$4 sm:$0xff]  }
 0x504   :  { %11329 = vst [vmem:[#allocation33_spill] sm:$0xff] %v10087_v49  ;;  %11332 = vst [vmem:[#allocation35_spill] sm:$0xff] %v10093_v40 }
 0x506   :  { %4352 = vmatpush1.bf16.msra.mxu0 %v10067_v52  ;;  %4393 = vmatpush1.bf16.msra.mxu1 %v10069_v48  ;;  %v10089_v52 = vld [vmem:[#allocation6 + $0x10c] ss:$16 sps:$4 sm:$0xff]   ;;  %v10091_v48 = vld [vmem:[#allocation6 + $0x100] ss:$16 sps:$4 sm:$0xff]  }
 0x507   :  { %4353 = vmatprep.subr.bf16.mxu0 %v10075_v54  ;;  %4394 = vmatprep.subr.bf16.mxu1 %v10077_v57  ;;  %11330 = vst [vmem:[#allocation34_spill] sm:$0xff] %v10089_v52  ;;  %11331 = vst [vmem:[#allocation36_spill] sm:$0xff] %v10091_v48  ;;  %v10099_v57 = vld [vmem:[#allocation6 + $0x124] ss:$16 sps:$4 sm:$0xff]   ;;  %v10105_v54 = vld [vmem:[#allocation6 + $0x128] ss:$16 sps:$4 sm:$0xff]  }
 0x508   :  { %11333 = vst [vmem:[#allocation46_spill] sm:$0xff] %v10099_v57  ;;  %11336 = vst [vmem:[#allocation38_spill] sm:$0xff] %v10105_v54 }
 0x50a   :  { %4354 = vmatpush1.bf16.msra.mxu0 %v10079_v27  ;;  %4395 = vmatpush1.bf16.msra.mxu1 %v10081_v53  ;;  %v10101_v27 = vld [vmem:[#allocation6 + $0x12c] ss:$16 sps:$4 sm:$0xff]   ;;  %v10103_v53 = vld [vmem:[#allocation6 + $0x120] ss:$16 sps:$4 sm:$0xff]  }
 0x50b   :  { %4355 = vmatprep.subr.bf16.mxu0 %v10087_v49  ;;  %4396 = vmatprep.subr.bf16.mxu1 %v10089_v52  ;;  %11334 = vst [vmem:[#allocation37_spill] sm:$0xff] %v10101_v27  ;;  %11335 = vst [vmem:[#allocation48_spill] sm:$0xff] %v10103_v53  ;;  %v10111_v52 = vld [vmem:[#allocation6 + $0x144] ss:$16 sps:$4 sm:$0xff]   ;;  %v10117_v49 = vld [vmem:[#allocation6 + $0x148] ss:$16 sps:$4 sm:$0xff]  }
 0x50c   :  { %11337 = vst [vmem:[#allocation67_spill] sm:$0xff] %v10111_v52  ;;  %11340 = vst [vmem:[#allocation70_spill] sm:$0xff] %v10117_v49 }
 0x50e   :  { %4356 = vmatpush1.bf16.msra.mxu0 %v10091_v48  ;;  %4397 = vmatpush1.bf16.msra.mxu1 %v10093_v40  ;;  %v10113_v48 = vld [vmem:[#allocation6 + $0x14c] ss:$16 sps:$4 sm:$0xff]   ;;  %v10115_v40 = vld [vmem:[#allocation6 + $0x140] ss:$16 sps:$4 sm:$0xff]  }
 0x50f   :  { %4357 = vmatprep.subr.bf16.mxu0 %v10099_v57  ;;  %4398 = vmatprep.subr.bf16.mxu1 %v10101_v27  ;;  %11338 = vst [vmem:[#allocation68_spill] sm:$0xff] %v10113_v48  ;;  %11339 = vst [vmem:[#allocation69_spill] sm:$0xff] %v10115_v40  ;;  %v10123_v27 = vld [vmem:[#allocation6 + $0x164] ss:$16 sps:$4 sm:$0xff]   ;;  %v10129_v57 = vld [vmem:[#allocation6 + $0x168] ss:$16 sps:$4 sm:$0xff]  }
 0x510   :  { %11341 = vst [vmem:[#allocation71_spill] sm:$0xff] %v10123_v27  ;;  %11344 = vst [vmem:[#allocation74_spill] sm:$0xff] %v10129_v57 }
 0x512   :  { %4358 = vmatpush1.bf16.msra.mxu0 %v10103_v53  ;;  %4399 = vmatpush1.bf16.msra.mxu1 %v10105_v54  ;;  %v10125_v53 = vld [vmem:[#allocation6 + $0x16c] ss:$16 sps:$4 sm:$0xff]   ;;  %v10127_v54 = vld [vmem:[#allocation6 + $0x160] ss:$16 sps:$4 sm:$0xff]  }
 0x513   :  { %4359 = vmatprep.subr.bf16.mxu0 %v10111_v52  ;;  %4400 = vmatprep.subr.bf16.mxu1 %v10113_v48  ;;  %11342 = vst [vmem:[#allocation72_spill] sm:$0xff] %v10125_v53  ;;  %11343 = vst [vmem:[#allocation73_spill] sm:$0xff] %v10127_v54  ;;  %v10135_v48 = vld [vmem:[#allocation6 + $0x184] ss:$16 sps:$4 sm:$0xff]   ;;  %v10141_v52 = vld [vmem:[#allocation6 + $0x188] ss:$16 sps:$4 sm:$0xff]  }
 0x514   :  { %11345 = vst [vmem:[#allocation75_spill] sm:$0xff] %v10135_v48  ;;  %11348 = vst [vmem:[#allocation78_spill] sm:$0xff] %v10141_v52 }
 0x516   :  { %4360 = vmatpush1.bf16.msra.mxu0 %v10115_v40  ;;  %4401 = vmatpush1.bf16.msra.mxu1 %v10117_v49  ;;  %v10137_v40 = vld [vmem:[#allocation6 + $0x18c] ss:$16 sps:$4 sm:$0xff]   ;;  %v10139_v49 = vld [vmem:[#allocation6 + $0x180] ss:$16 sps:$4 sm:$0xff]  }
 0x517   :  { %4361 = vmatprep.subr.bf16.mxu0 %v10123_v27  ;;  %4402 = vmatprep.subr.bf16.mxu1 %v10125_v53  ;;  %11346 = vst [vmem:[#allocation76_spill] sm:$0xff] %v10137_v40  ;;  %11347 = vst [vmem:[#allocation77_spill] sm:$0xff] %v10139_v49  ;;  %v10147_v27 = vld [vmem:[#allocation6 + $0x1ac] ss:$16 sps:$4 sm:$0xff]   ;;  %v10157_v53 = vld [vmem:[#allocation6 + $0x1c4] ss:$16 sps:$4 sm:$0xff]  }
 0x518   :  { %11350 = vst [vmem:[#allocation80_spill] sm:$0xff] %v10147_v27  ;;  %11353 = vst [vmem:[#allocation83_spill] sm:$0xff] %v10157_v53 }
 0x51a   :  { %4362 = vmatpush1.bf16.msra.mxu0 %v10127_v54  ;;  %4403 = vmatpush1.bf16.msra.mxu1 %v10129_v57  ;;  %v10151_v57 = vld [vmem:[#allocation6 + $0x1a0] ss:$16 sps:$4 sm:$0xff]   ;;  %v10153_v54 = vld [vmem:[#allocation6 + $0x1a8] ss:$16 sps:$4 sm:$0xff]  }
 0x51b   :  { %4363 = vmatprep.subr.bf16.mxu0 %v10135_v48  ;;  %4404 = vmatprep.subr.bf16.mxu1 %v10137_v40  ;;  %11351 = vst [vmem:[#allocation81_spill] sm:$0xff] %v10151_v57  ;;  %11352 = vst [vmem:[#allocation82_spill] sm:$0xff] %v10153_v54  ;;  %v10159_v48 = vld [vmem:[#allocation6 + $0x1cc] ss:$16 sps:$4 sm:$0xff]   ;;  %v10163_v40 = vld [vmem:[#allocation6 + $0x1c0] ss:$16 sps:$4 sm:$0xff]  }
 0x51c   :  { %11354 = vst [vmem:[#allocation84_spill] sm:$0xff] %v10159_v48  ;;  %11355 = vst [vmem:[#allocation85_spill] sm:$0xff] %v10163_v40 }
 0x51e   :  { %4364 = vmatpush1.bf16.msra.mxu0 %v10139_v49  ;;  %4405 = vmatpush1.bf16.msra.mxu1 %v10141_v52  ;;  %v10165_v49 = vld [vmem:[#allocation6 + $0x1c8] ss:$16 sps:$4 sm:$0xff]   ;;  %v10169_v52 = vld [vmem:[#allocation6 + $0x1e4] ss:$16 sps:$4 sm:$0xff]  }
 0x51f   :  { %4365 = vmatprep.subr.bf16.mxu0 %v10145_v47  ;;  %4406 = vmatprep.subr.bf16.mxu1 %v10147_v27  ;;  %11356 = vst [vmem:[#allocation86_spill] sm:$0xff] %v10165_v49  ;;  %11357 = vst [vmem:[#allocation87_spill] sm:$0xff] %v10169_v52  ;;  %v10171_v47 = vld [vmem:[#allocation6 + $0x1ec] ss:$16 sps:$4 sm:$0xff]   ;;  %v10175_v27 = vld [vmem:[#allocation6 + $0x1e0] ss:$16 sps:$4 sm:$0xff]  }
 0x520   :  { %11358 = vst [vmem:[#allocation88_spill] sm:$0xff] %v10171_v47  ;;  %11359 = vst [vmem:[#allocation89_spill] sm:$0xff] %v10175_v27 }
 0x522   :  { %4366 = vmatpush1.bf16.msra.mxu0 %v10151_v57  ;;  %4407 = vmatpush1.bf16.msra.mxu1 %v10153_v54  ;;  %v10177_v57 = vld [vmem:[#allocation6 + $0x1e8] ss:$16 sps:$4 sm:$0xff]  }
 0x523   :  { %4367 = vmatprep.subr.bf16.mxu0 %v10157_v53  ;;  %4408 = vmatprep.subr.bf16.mxu1 %v10159_v48  ;;  %11360 = vst [vmem:[#allocation90_spill] sm:$0xff] %v10177_v57 }
 0x526   :  { %4368 = vmatpush1.bf16.msra.mxu0 %v10163_v40  ;;  %4409 = vmatpush1.bf16.msra.mxu1 %v10165_v49  ;;  %v3172_v49 = vld [vmem:[%s10871_s5] sm:$0xf] }
 0x527   :  { %4369 = vmatprep.subr.bf16.mxu0 %v10169_v52  ;;  %4410 = vmatprep.subr.bf16.mxu1 %v10171_v47  ;;  %v3177_v40 = vrot.slane %v3172_v49, %v11298_v28  ;;  %v3181_v48 = vrot.slane %v3172_v49, %v11299_v26  ;;  %v3189_v44 = vrot.slane %v3172_v49, %v11174_v36 }
 0x528   :  { %v3185_v28 = vrot.slane %v3172_v49, %v11175_v42  ;;  %v11361_v49 = vld [vmem:[#allocation59_spill] sm:$0xff] }
 0x52a   :  { %4370 = vmatpush1.bf16.msra.mxu0 %v10175_v27  ;;  %4411 = vmatpush1.bf16.msra.mxu1 %v10177_v57 }
 0x52b   :  { %4647 = vmatprep.subr.bf16.mxu0 %v9864_v21  ;;  %4688 = vmatprep.subr.bf16.mxu1 %v9866_v39 }
 0x5a0   :  { %v3548_v53 = vpop.f32.mrb[40].mxu0  ;;  %v3589_v52 = vpop.f32.mrb[48].mxu1 }
 0x5a1   :  { %v3549_v54 = vadd.f32 %v3548_v53, %v3177_v40  ;;  %v3550_v47 = vpop.f32.mrb[41].mxu0  ;;  %v3591_v46 = vpop.f32.mrb[49].mxu1  ;;  %v3590_v38 = vadd.f32 %v3589_v52, %v3185_v28 }
 0x5a2   :  { %v3551_v27 = vadd.f32 %v3550_v47, %v3181_v48  ;;  %v3552_v45 = vpop.f32.mrb[42].mxu0  ;;  %v3593_v57 = vpop.f32.mrb[50].mxu1  ;;  %v3592_v22 = vadd.f32 %v3591_v46, %v3189_v44 }
 0x5a3   :  { %v7503_v0 = vmul.f32 -1.442695, %v3549_v54  ;;  %v3553_v21 = vpop.f32.mrb[43].mxu0  ;;  %v3594_v32 = vpop.f32.mrb[51].mxu1 }
 0x5a4   :  { %v7504_v39 = vmul.f32 -1.442695, %v3551_v27  ;;  %v7505_v26 = vmul.f32 -1.442695, %v3592_v22  ;;  %v11363_v21 = vld [vmem:[#allocation60_spill] sm:$0xff] }
 0x5a5   :  { %8716 = vpow2.f32 %v7503_v0 }
 0x5a6   :  { %8718 = vpow2.f32 %v7504_v39 }
 0x5a7   :  { %8720 = vpow2.f32 %v7505_v26  ;;  %v11362_v26 = vld [vmem:[#allocation45_spill] sm:$0xff] }
 0x5a8   :  { %8722 = vtanh.f32 %v3590_v38 }
 0x5af   :  { %v8717_v31 = vpop.eup %8716 }
 0x5b0   :  { %v8719_v40 = vpop.eup %8718  ;;  %v3599_v53 = vadd.f32 1.0, %v8717_v31 }
 0x5b1   :  { %v3605_v45 = vadd.f32 1.0, %v8719_v40  ;;  %v8721_v47 = vpop.eup %8720  ;;  %v11364_v40 = vld [vmem:[#allocation47_spill] sm:$0xff] }
 0x5b2   :  { %8724 = vrcp.f32 %v3599_v53  ;;  %v8723_v32 = vpop.eup %8722  ;;  %v3612_v0 = vadd.f32 1.0, %v8721_v47 }
 0x5b3   :  { %8726 = vrcp.f32 %v3605_v45 }
 0x5b4   :  { %8728 = vrcp.f32 %v3612_v0 }
 0x5bc   :  { %v8725_v27 = vpop.eup %8724 }
 0x5bd   :  { %v8727_v48 = vpop.eup %8726  ;;  %v3616_v54 = vmul.f32 %v8725_v27, %v8723_v32 }
 0x5be   :  { %v3615_v44 = vmul.f32 %v8727_v48, %v9878_v11 }
 0x5c0   :  { %v10193_v46 = vadd.f32 %v3616_v54, %v3615_v44  ;;  %v3856_v22 = vpop.f32.mrb[44].mxu0  ;;  %v3897_v28 = vpop.f32.mrb[52].mxu1 }
 0x5c1   :  { %v3904_v31 = vadd.f32 %v3856_v22, %v11361_v49  ;;  %v3906_v38 = vadd.f32 %v3897_v28, %v11362_v26  ;;  %v3858_v52 = vpop.f32.mrb[45].mxu0  ;;  %v3899_v57 = vpop.f32.mrb[53].mxu1 }
 0x5c2   :  { %v3905_v39 = vadd.f32 %v3858_v52, %v11363_v21  ;;  %v3907_v53 = vadd.f32 %v3899_v57, %v11364_v40  ;;  %v3860_v45 = vpop.f32.mrb[46].mxu0  ;;  %v3901_v32 = vpop.f32.mrb[54].mxu1  ;;  %8730 = vtanh.f32 %v10193_v46 }
 0x5c3   :  { %v7538_v11 = vmul.f32 -1.442695, %v3904_v31  ;;  %v3861_v47 = vpop.f32.mrb[47].mxu0  ;;  %v3902_v27 = vpop.f32.mrb[55].mxu1 }
 0x5c4   :  { %v7539_v48 = vmul.f32 -1.442695, %v3905_v39  ;;  %v8729_v54 = vpop.eup %8728  ;;  %v7540_v44 = vmul.f32 -1.442695, %v3907_v53 }
 0x5c5   :  { %8732 = vpow2.f32 %v7538_v11 }
 0x5c6   :  { %8734 = vpow2.f32 %v7539_v48 }
 0x5c7   :  { %8736 = vpow2.f32 %v7540_v44  ;;  %v11407_v44 = vld [vmem:[#allocation76_spill] sm:$0xff] }
 0x5c8   :  { %8738 = vtanh.f32 %v3906_v38 }
 0x5cc   :  { %v8731_v0 = vpop.eup %8730 }
 0x5cd   :  { %v10200_v22 = vmul.f32 %v8731_v0, %v8729_v54  ;;  %v11405_v54 = vld [vmem:[#allocation74_spill] sm:$0xff]  ;;  %v11406_v0 = vld [vmem:[#allocation75_spill] sm:$0xff] }
 0x5cf   :  { %11365 = vst [vmem:[#allocation91_spill] sm:$0xff] %v10200_v22  ;;  %v8733_v28 = vpop.eup %8732  ;;  %v3620_v49 = vpack.c.bf16 %v10200_v22, %v10200_v22  ;;  %v10503_v22 = vld [vmem:[#allocation6 + $0xc4] ss:$16 sps:$4 sm:$0xff]  }
 0x5d0   :  { %v8735_v26 = vpop.eup %8734  ;;  %v3911_v52 = vadd.f32 1.0, %v8733_v28  ;;  %v11408_v28 = vld [vmem:[#allocation77_spill] sm:$0xff] }
 0x5d1   :  { %v3917_v57 = vadd.f32 1.0, %v8735_v26  ;;  %4371 = vmatprep.mubr.bf16.mxu0 %v3620_v49  ;;  %4412 = vmatprep.mubr.bf16.mxu1 %v3620_v49  ;;  %v8737_v31 = vpop.eup %8736  ;;  %v11409_v49 = vld [vmem:[#allocation78_spill] sm:$0xff]  ;;  %v11410_v26 = vld [vmem:[#allocation79_spill] sm:$0xff] }
 0x5d2   :  { %8740 = vrcp.f32 %v3911_v52  ;;  %v8739_v21 = vpop.eup %8738  ;;  %v3924_v45 = vadd.f32 1.0, %v8737_v31  ;;  %v11411_v52 = vld [vmem:[#allocation80_spill] sm:$0xff]  ;;  %v11413_v31 = vld [vmem:[#allocation82_spill] sm:$0xff] }
 0x5d3   :  { %8742 = vrcp.f32 %v3917_v57  ;;  %v11412_v57 = vld [vmem:[#allocation81_spill] sm:$0xff] }
 0x5d4   :  { %8744 = vrcp.f32 %v3924_v45  ;;  %v11418_v45 = vld [vmem:[#allocation87_spill] sm:$0xff] }
 0x5dc   :  { %v8741_v39 = vpop.eup %8740 }
 0x5dd   :  { %v8743_v40 = vpop.eup %8742  ;;  %v3928_v53 = vmul.f32 %v8741_v39, %v8739_v21  ;;  %v11414_v21 = vld [vmem:[#allocation83_spill] sm:$0xff]  ;;  %v11415_v39 = vld [vmem:[#allocation84_spill] sm:$0xff] }
 0x5de   :  { %v3927_v32 = vmul.f32 %v8743_v40, %v9890_v51  ;;  %v8745_v47 = vpop.eup %8744  ;;  %v11366_v51 = vld [vmem:[#allocation52_spill] sm:$0xff]  ;;  %v11416_v40 = vld [vmem:[#allocation85_spill] sm:$0xff] }
 0x5e0   :  { %v10205_v11 = vadd.f32 %v3928_v53, %v3927_v32  ;;  %v11417_v53 = vld [vmem:[#allocation86_spill] sm:$0xff]  ;;  %v11419_v32 = vld [vmem:[#allocation88_spill] sm:$0xff] }
 0x5e2   :  { %8746 = vtanh.f32 %v10205_v11 }
 0x5ec   :  { %v8747_v38 = vpop.eup %8746 }
 0x5ed   :  { %v3931_v27 = vmul.f32 %v8747_v38, %v8745_v47  ;;  %v11420_v47 = vld [vmem:[#allocation89_spill] sm:$0xff]  ;;  %v11421_v38 = vld [vmem:[#allocation90_spill] sm:$0xff] }
 0x5ef   :  { %v3932_v48 = vpack.c.bf16 %v3931_v27, %v3931_v27  ;;  %v10304_v27 = vld [vmem:[#allocation4 + $0x4] ss:$16 sps:$4 sm:$0xff]  }
 0x5f1   :  { %4372 = vmatmul.mubr.bf16.vlgmr.msra.gmra.mrb[48].mxu0 %v3932_v48  ;;  %4413 = vmatmul.mubr.bf16.vlgmr.msra.gmra.mrb[56].mxu1 %v3932_v48 }
 0x5f2   :  { %4648 = vmatpush1.bf16.msra.mxu0 %v9893_v55  ;;  %4689 = vmatpush1.bf16.msra.mxu1 %v9895_v56  ;;  %v11367_v55 = vld [vmem:[#allocation40_spill] sm:$0xff]  ;;  %v11368_v56 = vld [vmem:[#allocation11_spill] sm:$0xff] }
 0x5f3   :  { %4649 = vmatprep.subr.bf16.mxu0 %v9899_v58  ;;  %4690 = vmatprep.subr.bf16.mxu1 %v9901_v59  ;;  %v11369_v58 = vld [vmem:[#allocation12_spill] sm:$0xff]  ;;  %v11370_v59 = vld [vmem:[#allocation13_spill] sm:$0xff] }
 0x5f4   :  { %4679 = vmatprep.mubr.bf16.mxu0 %v11146_v34  ;;  %4720 = vmatprep.mubr.bf16.mxu1 %v11146_v34 }
 0x5f6   :  { %4650 = vmatpush1.bf16.msra.mxu0 %v9907_v50  ;;  %4691 = vmatpush1.bf16.msra.mxu1 %v9909_v60  ;;  %v11371_v50 = vld [vmem:[#allocation14_spill] sm:$0xff]  ;;  %v11372_v60 = vld [vmem:[#allocation15_spill] sm:$0xff] }
 0x5f7   :  { %4651 = vmatprep.subr.bf16.mxu0 %v9913_v61  ;;  %4692 = vmatprep.subr.bf16.mxu1 %v9915_v62  ;;  %v11373_v61 = vld [vmem:[#allocation16_spill] sm:$0xff]  ;;  %v11374_v62 = vld [vmem:[#allocation17_spill] sm:$0xff] }
 0x5f8   :  { %11445 = vst [vmem:[#allocation17_spill] sm:$0xff] %v10503_v22 }
 0x5fa   :  { %4652 = vmatpush1.bf16.msra.mxu0 %v9921_v63  ;;  %4693 = vmatpush1.bf16.msra.mxu1 %v9923_v1  ;;  %v11375_v63 = vld [vmem:[#allocation18_spill] sm:$0xff]  ;;  %v11376_v1 = vld [vmem:[#allocation19_spill] sm:$0xff] }
 0x5fb   :  { %4653 = vmatprep.subr.bf16.mxu0 %v9927_v2  ;;  %4694 = vmatprep.subr.bf16.mxu1 %v9929_v3  ;;  %v11377_v2 = vld [vmem:[#allocation20_spill] sm:$0xff]  ;;  %v11378_v3 = vld [vmem:[#allocation21_spill] sm:$0xff] }
 0x5fe   :  { %4654 = vmatpush1.bf16.msra.mxu0 %v9933_v4  ;;  %4695 = vmatpush1.bf16.msra.mxu1 %v9935_v5  ;;  %v11379_v4 = vld [vmem:[#allocation22_spill] sm:$0xff]  ;;  %v11380_v5 = vld [vmem:[#allocation24_spill] sm:$0xff] }
 0x5ff   :  { %4655 = vmatprep.subr.bf16.mxu0 %v9939_v6  ;;  %4696 = vmatprep.subr.bf16.mxu1 %v9941_v9  ;;  %v11381_v6 = vld [vmem:[#allocation26_spill] sm:$0xff]  ;;  %v11382_v9 = vld [vmem:[#allocation23_spill] sm:$0xff] }
 0x602   :  { %4656 = vmatpush1.bf16.msra.mxu0 %v9945_v14  ;;  %4697 = vmatpush1.bf16.msra.mxu1 %v9947_v15  ;;  %v11383_v14 = vld [vmem:[#allocation25_spill] sm:$0xff]  ;;  %v11384_v15 = vld [vmem:[#allocation27_spill] sm:$0xff] }
 0x603   :  { %4657 = vmatprep.subr.bf16.mxu0 %v9951_v16  ;;  %4698 = vmatprep.subr.bf16.mxu1 %v9953_v17  ;;  %v11385_v16 = vld [vmem:[#allocation28_spill] sm:$0xff]  ;;  %v11386_v17 = vld [vmem:[#allocation29_spill] sm:$0xff] }
 0x606   :  { %4658 = vmatpush1.bf16.msra.mxu0 %v9957_v18  ;;  %4699 = vmatpush1.bf16.msra.mxu1 %v9959_v23  ;;  %v11387_v18 = vld [vmem:[#allocation30_spill] sm:$0xff]  ;;  %v11388_v23 = vld [vmem:[#allocation31_spill] sm:$0xff] }
 0x607   :  { %4659 = vmatprep.subr.bf16.mxu0 %v9963_v41  ;;  %4700 = vmatprep.subr.bf16.mxu1 %v9965_v35  ;;  %v11389_v41 = vld [vmem:[#allocation32_spill] sm:$0xff]  ;;  %v11390_v35 = vld [vmem:[#allocation33_spill] sm:$0xff] }
 0x60a   :  { %4660 = vmatpush1.bf16.msra.mxu0 %v9969_v10  ;;  %4701 = vmatpush1.bf16.msra.mxu1 %v9971_v13  ;;  %v11391_v10 = vld [vmem:[#allocation34_spill] sm:$0xff]  ;;  %v11392_v13 = vld [vmem:[#allocation36_spill] sm:$0xff] }
 0x60b   :  { %4661 = vmatprep.subr.bf16.mxu0 %v9975_v12  ;;  %4702 = vmatprep.subr.bf16.mxu1 %v9977_v37  ;;  %v11393_v12 = vld [vmem:[#allocation35_spill] sm:$0xff]  ;;  %v11394_v37 = vld [vmem:[#allocation46_spill] sm:$0xff] }
 0x60e   :  { %4662 = vmatpush1.bf16.msra.mxu0 %v9981_v30  ;;  %4703 = vmatpush1.bf16.msra.mxu1 %v9983_v19  ;;  %v11395_v30 = vld [vmem:[#allocation37_spill] sm:$0xff]  ;;  %v11396_v19 = vld [vmem:[#allocation48_spill] sm:$0xff] }
 0x60f   :  { %5164 = vmatprep.subr.bf16.mxu0 %v9991_v29  ;;  %5205 = vmatprep.subr.bf16.mxu1 %v9993_v7  ;;  %v11397_v29 = vld [vmem:[#allocation38_spill] sm:$0xff]  ;;  %v11398_v7 = vld [vmem:[#allocation67_spill] sm:$0xff] }
 0x611   :  { %4680 = vmatmul.mubr.bf16.vlgmr.msra.gmra.mrb[52].mxu0 %v3932_v48  ;;  %4721 = vmatmul.mubr.bf16.vlgmr.msra.gmra.mrb[60].mxu1 %v3932_v48  ;;  %v10306_v48 = vld [vmem:[#allocation4 + $0xc] ss:$16 sps:$4 sm:$0xff]  }
 0x612   :  { %5165 = vmatpush1.bf16.msra.mxu0 %v9995_v8  ;;  %5206 = vmatpush1.bf16.msra.mxu1 %v9997_v43  ;;  %v11399_v8 = vld [vmem:[#allocation68_spill] sm:$0xff]  ;;  %v11400_v43 = vld [vmem:[#allocation69_spill] sm:$0xff] }
 0x613   :  { %5166 = vmatprep.subr.bf16.mxu0 %v10003_v24  ;;  %5207 = vmatprep.subr.bf16.mxu1 %v10005_v25  ;;  %v11401_v24 = vld [vmem:[#allocation70_spill] sm:$0xff]  ;;  %v11402_v25 = vld [vmem:[#allocation71_spill] sm:$0xff] }
 0x616   :  { %5167 = vmatpush1.bf16.msra.mxu0 %v10007_v33  ;;  %5208 = vmatpush1.bf16.msra.mxu1 %v10009_v20  ;;  %v11403_v33 = vld [vmem:[#allocation72_spill] sm:$0xff]  ;;  %v11404_v20 = vld [vmem:[#allocation73_spill] sm:$0xff] }
 0x617   :  { %5168 = vmatprep.subr.bf16.mxu0 %v11366_v51  ;;  %5209 = vmatprep.subr.bf16.mxu1 %v11367_v55  ;;  %v3997_v51 = vld [vmem:[%s10871_s5] sm:$0xf] }
 0x618   :  { %v11422_v55 = vld [vmem:[#allocation42_spill] sm:$0xff] }
 0x61a   :  { %5169 = vmatpush1.bf16.msra.mxu0 %v11368_v56  ;;  %5210 = vmatpush1.bf16.msra.mxu1 %v11369_v58  ;;  %v4002_v56 = vrot.slane %v3997_v51, %v11422_v55  ;;  %v11423_v58 = vld [vmem:[#allocation44_spill] sm:$0xff] }
 0x61b   :  { %5170 = vmatprep.subr.bf16.mxu0 %v11370_v59  ;;  %5211 = vmatprep.subr.bf16.mxu1 %v11371_v50  ;;  %v4006_v59 = vrot.slane %v3997_v51, %v11423_v58 }
 0x61e   :  { %5171 = vmatpush1.bf16.msra.mxu0 %v11372_v60  ;;  %5212 = vmatpush1.bf16.msra.mxu1 %v11373_v61 }
 0x61f   :  { %5172 = vmatprep.subr.bf16.mxu0 %v11374_v62  ;;  %5213 = vmatprep.subr.bf16.mxu1 %v11375_v63 }
 0x622   :  { %5173 = vmatpush1.bf16.msra.mxu0 %v11376_v1  ;;  %5214 = vmatpush1.bf16.msra.mxu1 %v11377_v2 }
 0x623   :  { %5174 = vmatprep.subr.bf16.mxu0 %v11378_v3  ;;  %5215 = vmatprep.subr.bf16.mxu1 %v11379_v4 }
 0x626   :  { %5175 = vmatpush1.bf16.msra.mxu0 %v11380_v5  ;;  %5216 = vmatpush1.bf16.msra.mxu1 %v11381_v6 }
 0x627   :  { %5176 = vmatprep.subr.bf16.mxu0 %v11382_v9  ;;  %5217 = vmatprep.subr.bf16.mxu1 %v11383_v14  ;;  %v4014_v14 = vrot.slane %v3997_v51, %v11174_v36 }
 0x62a   :  { %5177 = vmatpush1.bf16.msra.mxu0 %v11384_v15  ;;  %5218 = vmatpush1.bf16.msra.mxu1 %v11385_v16  ;;  %v4010_v16 = vrot.slane %v3997_v51, %v11175_v42 }
 0x62b   :  { %5178 = vmatprep.subr.bf16.mxu0 %v11386_v17  ;;  %5219 = vmatprep.subr.bf16.mxu1 %v11387_v18 }
 0x62e   :  { %5179 = vmatpush1.bf16.msra.mxu0 %v11388_v23  ;;  %5220 = vmatpush1.bf16.msra.mxu1 %v11389_v41 }
 0x62f   :  { %5180 = vmatprep.subr.bf16.mxu0 %v11390_v35  ;;  %5221 = vmatprep.subr.bf16.mxu1 %v11391_v10 }
 0x632   :  { %5181 = vmatpush1.bf16.msra.mxu0 %v11392_v13  ;;  %5222 = vmatpush1.bf16.msra.mxu1 %v11393_v12 }
 0x633   :  { %5182 = vmatprep.subr.bf16.mxu0 %v11394_v37  ;;  %5223 = vmatprep.subr.bf16.mxu1 %v11395_v30 }
 0x636   :  { %5183 = vmatpush1.bf16.msra.mxu0 %v11396_v19  ;;  %5224 = vmatpush1.bf16.msra.mxu1 %v11397_v29 }
 0x637   :  { %5184 = vmatprep.subr.bf16.mxu0 %v11398_v7  ;;  %5225 = vmatprep.subr.bf16.mxu1 %v11399_v8 }
 0x63a   :  { %5185 = vmatpush1.bf16.msra.mxu0 %v11400_v43  ;;  %5226 = vmatpush1.bf16.msra.mxu1 %v11401_v24 }
 0x63b   :  { %5186 = vmatprep.subr.bf16.mxu0 %v11402_v25  ;;  %5227 = vmatprep.subr.bf16.mxu1 %v11403_v33  ;;  %v11424_v25 = vld [vmem:[#allocation61_spill] sm:$0xff] }
 0x63e   :  { %5187 = vmatpush1.bf16.msra.mxu0 %v11404_v20  ;;  %5228 = vmatpush1.bf16.msra.mxu1 %v11405_v54  ;;  %v11425_v20 = vld [vmem:[#allocation49_spill] sm:$0xff] }
 0x63f   :  { %5188 = vmatprep.subr.bf16.mxu0 %v11406_v0  ;;  %5229 = vmatprep.subr.bf16.mxu1 %v11407_v44 }
 0x642   :  { %5189 = vmatpush1.bf16.msra.mxu0 %v11408_v28  ;;  %5230 = vmatpush1.bf16.msra.mxu1 %v11409_v49  ;;  %v11426_v28 = vld [vmem:[#allocation62_spill] sm:$0xff] }
 0x643   :  { %5190 = vmatprep.subr.bf16.mxu0 %v11410_v26  ;;  %5231 = vmatprep.subr.bf16.mxu1 %v11411_v52  ;;  %v11427_v26 = vld [vmem:[#allocation50_spill] sm:$0xff] }
 0x646   :  { %5191 = vmatpush1.bf16.msra.mxu0 %v11412_v57  ;;  %5232 = vmatpush1.bf16.msra.mxu1 %v11413_v31 }
 0x647   :  { %5192 = vmatprep.subr.bf16.mxu0 %v11414_v21  ;;  %5233 = vmatprep.subr.bf16.mxu1 %v11415_v39 }
 0x64a   :  { %5193 = vmatpush1.bf16.msra.mxu0 %v11416_v40  ;;  %5234 = vmatpush1.bf16.msra.mxu1 %v11417_v53 }
 0x64b   :  { %5194 = vmatprep.subr.bf16.mxu0 %v11418_v45  ;;  %5235 = vmatprep.subr.bf16.mxu1 %v11419_v32 }
 0x64e   :  { %5195 = vmatpush1.bf16.msra.mxu0 %v11420_v47  ;;  %5236 = vmatpush1.bf16.msra.mxu1 %v11421_v38 }
 0x64f   :  { %5472 = vmatprep.subr.bf16.mxu0 %v10304_v27  ;;  %5513 = vmatprep.subr.bf16.mxu1 %v10306_v48 }
 0x6c4   :  { %v4373_v50 = vpop.f32.mrb[48].mxu0  ;;  %v4414_v60 = vpop.f32.mrb[56].mxu1 }
 0x6c5   :  { %v4374_v61 = vadd.f32 %v4373_v50, %v4002_v56  ;;  %v4375_v62 = vpop.f32.mrb[49].mxu0  ;;  %v4416_v63 = vpop.f32.mrb[57].mxu1  ;;  %v4415_v18 = vadd.f32 %v4414_v60, %v4010_v16 }
 0x6c6   :  { %v4376_v1 = vadd.f32 %v4375_v62, %v4006_v59  ;;  %v4377_v2 = vpop.f32.mrb[50].mxu0  ;;  %v4418_v3 = vpop.f32.mrb[58].mxu1  ;;  %v4417_v15 = vadd.f32 %v4416_v63, %v4014_v14  ;;  %v10333_v14 = vld [vmem:[#allocation4] ss:$16 sps:$4 sm:$0xff]  }
 0x6c7   :  { %v7605_v4 = vmul.f32 -1.442695, %v4374_v61  ;;  %v4378_v5 = vpop.f32.mrb[51].mxu0  ;;  %v4419_v6 = vpop.f32.mrb[59].mxu1 }
 0x6c8   :  { %v7606_v9 = vmul.f32 -1.442695, %v4376_v1  ;;  %v7607_v17 = vmul.f32 -1.442695, %v4417_v15  ;;  %v10335_v15 = vld [vmem:[#allocation4 + $0x8] ss:$16 sps:$4 sm:$0xff]  }
 0x6c9   :  { %8748 = vpow2.f32 %v7605_v4 }
 0x6ca   :  { %8750 = vpow2.f32 %v7606_v9 }
 0x6cb   :  { %8752 = vpow2.f32 %v7607_v17  ;;  %v10339_v17 = vld [vmem:[#allocation4 + $0x24] ss:$16 sps:$4 sm:$0xff]  }
 0x6cc   :  { %8754 = vtanh.f32 %v4415_v18  ;;  %v10341_v18 = vld [vmem:[#allocation4 + $0x2c] ss:$16 sps:$4 sm:$0xff]  }
 0x6d3   :  { %v8749_v23 = vpop.eup %8748 }
 0x6d4   :  { %v8751_v41 = vpop.eup %8750  ;;  %v4424_v35 = vadd.f32 1.0, %v8749_v23  ;;  %v10349_v23 = vld [vmem:[#allocation4 + $0x28] ss:$16 sps:$4 sm:$0xff]  }
 0x6d5   :  { %v4430_v10 = vadd.f32 1.0, %v8751_v41  ;;  %v8753_v13 = vpop.eup %8752  ;;  %v10353_v41 = vld [vmem:[#allocation4 + $0x44] ss:$16 sps:$4 sm:$0xff]  }
 0x6d6   :  { %8756 = vrcp.f32 %v4424_v35  ;;  %v8755_v12 = vpop.eup %8754  ;;  %v4437_v29 = vadd.f32 1.0, %v8753_v13  ;;  %v10355_v35 = vld [vmem:[#allocation4 + $0x4c] ss:$16 sps:$4 sm:$0xff]   ;;  %v10363_v13 = vld [vmem:[#allocation4 + $0x48] ss:$16 sps:$4 sm:$0xff]  }
 0x6d7   :  { %8758 = vrcp.f32 %v4430_v10  ;;  %v10361_v10 = vld [vmem:[#allocation4 + $0x40] ss:$16 sps:$4 sm:$0xff]  }
 0x6d8   :  { %8760 = vrcp.f32 %v4437_v29  ;;  %v10379_v29 = vld [vmem:[#allocation4 + $0x84] ss:$16 sps:$4 sm:$0xff]  }
 0x6e0   :  { %v8757_v37 = vpop.eup %8756 }
 0x6e1   :  { %v8759_v30 = vpop.eup %8758  ;;  %v4441_v19 = vmul.f32 %v8757_v37, %v8755_v12  ;;  %v10367_v12 = vld [vmem:[#allocation4 + $0x64] ss:$16 sps:$4 sm:$0xff]   ;;  %v10369_v37 = vld [vmem:[#allocation4 + $0x6c] ss:$16 sps:$4 sm:$0xff]  }
 0x6e2   :  { %v4440_v7 = vmul.f32 %v8759_v30, %v10193_v46  ;;  %v8761_v53 = vpop.eup %8760  ;;  %v10373_v30 = vld [vmem:[#allocation4 + $0x60] ss:$16 sps:$4 sm:$0xff]  }
 0x6e4   :  { %v10318_v8 = vadd.f32 %v4441_v19, %v4440_v7  ;;  %v4681_v43 = vpop.f32.mrb[52].mxu0  ;;  %v4722_v24 = vpop.f32.mrb[60].mxu1  ;;  %v10375_v19 = vld [vmem:[#allocation4 + $0x68] ss:$16 sps:$4 sm:$0xff]   ;;  %v10381_v7 = vld [vmem:[#allocation4 + $0x8c] ss:$16 sps:$4 sm:$0xff]  }
 0x6e5   :  { %v4729_v33 = vadd.f32 %v4681_v43, %v11424_v25  ;;  %v4731_v54 = vadd.f32 %v4722_v24, %v11425_v20  ;;  %v4683_v0 = vpop.f32.mrb[53].mxu0  ;;  %v4724_v44 = vpop.f32.mrb[61].mxu1  ;;  %v10385_v43 = vld [vmem:[#allocation4 + $0x80] ss:$16 sps:$4 sm:$0xff]   ;;  %v10387_v24 = vld [vmem:[#allocation4 + $0x88] ss:$16 sps:$4 sm:$0xff]  }
 0x6e6   :  { %v4730_v49 = vadd.f32 %v4683_v0, %v11426_v28  ;;  %v4732_v52 = vadd.f32 %v4724_v44, %v11427_v26  ;;  %v4685_v57 = vpop.f32.mrb[54].mxu0  ;;  %v4726_v31 = vpop.f32.mrb[62].mxu1  ;;  %8762 = vtanh.f32 %v10318_v8  ;;  %v10391_v25 = vld [vmem:[#allocation4 + $0xa4] ss:$16 sps:$4 sm:$0xff]   ;;  %v10397_v20 = vld [vmem:[#allocation4 + $0xa0] ss:$16 sps:$4 sm:$0xff]  }
 0x6e7   :  { %v7640_v46 = vmul.f32 -1.442695, %v4729_v33  ;;  %v4686_v21 = vpop.f32.mrb[55].mxu0  ;;  %v4727_v39 = vpop.f32.mrb[63].mxu1  ;;  %v10393_v33 = vld [vmem:[#allocation4 + $0xac] ss:$16 sps:$4 sm:$0xff]  }
 0x6e8   :  { %v7641_v40 = vmul.f32 -1.442695, %v4730_v49  ;;  %v7642_v32 = vmul.f32 -1.442695, %v4732_v52  ;;  %v10403_v0 = vld [vmem:[#allocation4 + $0xc4] ss:$16 sps:$4 sm:$0xff]  }
 0x6e9   :  { %8764 = vpow2.f32 %v7640_v46  ;;  %v10405_v44 = vld [vmem:[#allocation4 + $0xcc] ss:$16 sps:$4 sm:$0xff]   ;;  %v10409_v28 = vld [vmem:[#allocation4 + $0xc0] ss:$16 sps:$4 sm:$0xff]   ;;  %v10411_v49 = vld [vmem:[#allocation4 + $0xc8] ss:$16 sps:$4 sm:$0xff]  }
 0x6ea   :  { %8766 = vpow2.f32 %v7641_v40  ;;  %v10415_v26 = vld [vmem:[#allocation4 + $0xe4] ss:$16 sps:$4 sm:$0xff]   ;;  %v10417_v52 = vld [vmem:[#allocation4 + $0xec] ss:$16 sps:$4 sm:$0xff]   ;;  %v10421_v57 = vld [vmem:[#allocation4 + $0xe0] ss:$16 sps:$4 sm:$0xff]  }
 0x6eb   :  { %8768 = vpow2.f32 %v7642_v32  ;;  %v10423_v31 = vld [vmem:[#allocation4 + $0xe8] ss:$16 sps:$4 sm:$0xff]   ;;  %v10431_v46 = vld [vmem:[#allocation6 + $0x4] ss:$16 sps:$4 sm:$0xff]   ;;  %v10433_v21 = vld [vmem:[#allocation6 + $0xc] ss:$16 sps:$4 sm:$0xff]  }
 0x6ec   :  { %8770 = vtanh.f32 %v4731_v54  ;;  %v10399_v54 = vld [vmem:[#allocation4 + $0xa8] ss:$16 sps:$4 sm:$0xff]   ;;  %v10435_v39 = vld [vmem:[#allocation6] ss:$16 sps:$4 sm:$0xff]  }
 0x6ed   :  { %v10437_v40 = vld [vmem:[#allocation6 + $0x8] ss:$16 sps:$4 sm:$0xff]   ;;  %v10447_v32 = vld [vmem:[#allocation6 + $0x20] ss:$16 sps:$4 sm:$0xff]  }
 0x6f0   :  { %v8763_v45 = vpop.eup %8762 }
 0x6f1   :  { %v10325_v47 = vmul.f32 %v8763_v45, %v8761_v53  ;;  %v10443_v53 = vld [vmem:[#allocation6 + $0x24] ss:$16 sps:$4 sm:$0xff]   ;;  %v10445_v45 = vld [vmem:[#allocation6 + $0x2c] ss:$16 sps:$4 sm:$0xff]  }
 0x6f3   :  { %11428 = vst [vmem:[#allocation92_spill] sm:$0xff] %v10325_v47  ;;  %v8765_v38 = vpop.eup %8764  ;;  %v4445_v51 = vpack.c.bf16 %v10325_v47, %v10325_v47  ;;  %v10497_v47 = vld [vmem:[#allocation6 + $0xa8] ss:$16 sps:$4 sm:$0xff]  }
 0x6f4   :  { %v8767_v56 = vpop.eup %8766  ;;  %v4736_v59 = vadd.f32 1.0, %v8765_v38  ;;  %v10449_v38 = vld [vmem:[#allocation6 + $0x28] ss:$16 sps:$4 sm:$0xff]   ;;  %11444 = vst [vmem:[#allocation16_spill] sm:$0xff] %v10497_v47 }
 0x6f5   :  { %v4742_v50 = vadd.f32 1.0, %v8767_v56  ;;  %5196 = vmatprep.mubr.bf16.mxu0 %v4445_v51  ;;  %5237 = vmatprep.mubr.bf16.mxu1 %v4445_v51  ;;  %v8769_v60 = vpop.eup %8768  ;;  %v10455_v51 = vld [vmem:[#allocation6 + $0x44] ss:$16 sps:$4 sm:$0xff]   ;;  %v10457_v56 = vld [vmem:[#allocation6 + $0x4c] ss:$16 sps:$4 sm:$0xff]  }
 0x6f6   :  { %8772 = vrcp.f32 %v4736_v59  ;;  %v8771_v61 = vpop.eup %8770  ;;  %v4749_v2 = vadd.f32 1.0, %v8769_v60  ;;  %11429 = vst [vmem:[#allocation54_spill] sm:$0xff] %v10455_v51  ;;  %11430 = vst [vmem:[#allocation41_spill] sm:$0xff] %v10457_v56  ;;  %v10459_v59 = vld [vmem:[#allocation6 + $0x40] ss:$16 sps:$4 sm:$0xff]  }
 0x6f7   :  { %8774 = vrcp.f32 %v4742_v50  ;;  %11431 = vst [vmem:[#allocation56_spill] sm:$0xff] %v10459_v59  ;;  %v10461_v50 = vld [vmem:[#allocation6 + $0x48] ss:$16 sps:$4 sm:$0xff]   ;;  %v10467_v60 = vld [vmem:[#allocation6 + $0x64] ss:$16 sps:$4 sm:$0xff]  }
 0x6f8   :  { %8776 = vrcp.f32 %v4749_v2  ;;  %11432 = vst [vmem:[#allocation43_spill] sm:$0xff] %v10461_v50  ;;  %11433 = vst [vmem:[#allocation59_spill] sm:$0xff] %v10467_v60  ;;  %v10481_v2 = vld [vmem:[#allocation6 + $0x8c] ss:$16 sps:$4 sm:$0xff]  }
 0x6f9   :  { %11438 = vst [vmem:[#allocation40_spill] sm:$0xff] %v10481_v2 }
 0x700   :  { %v8773_v62 = vpop.eup %8772 }
 0x701   :  { %v8775_v63 = vpop.eup %8774  ;;  %v4753_v1 = vmul.f32 %v8773_v62, %v8771_v61  ;;  %v10469_v61 = vld [vmem:[#allocation6 + $0x6c] ss:$16 sps:$4 sm:$0xff]   ;;  %v10471_v62 = vld [vmem:[#allocation6 + $0x60] ss:$16 sps:$4 sm:$0xff]  }
 0x702   :  { %v4752_v3 = vmul.f32 %v8775_v63, %v10205_v11  ;;  %v8777_v5 = vpop.eup %8776  ;;  %v10347_v11 = vld [vmem:[#allocation4 + $0x20] ss:$16 sps:$4 sm:$0xff]   ;;  %11434 = vst [vmem:[#allocation45_spill] sm:$0xff] %v10469_v61  ;;  %11435 = vst [vmem:[#allocation60_spill] sm:$0xff] %v10471_v62  ;;  %v10473_v63 = vld [vmem:[#allocation6 + $0x68] ss:$16 sps:$4 sm:$0xff]  }
 0x703   :  { %11436 = vst [vmem:[#allocation47_spill] sm:$0xff] %v10473_v63 }
 0x704   :  { %v10330_v4 = vadd.f32 %v4753_v1, %v4752_v3  ;;  %v10479_v1 = vld [vmem:[#allocation6 + $0x84] ss:$16 sps:$4 sm:$0xff]   ;;  %v10483_v3 = vld [vmem:[#allocation6 + $0x80] ss:$16 sps:$4 sm:$0xff]  }
 0x705   :  { %11437 = vst [vmem:[#allocation52_spill] sm:$0xff] %v10479_v1  ;;  %11439 = vst [vmem:[#allocation11_spill] sm:$0xff] %v10483_v3 }
 0x706   :  { %8778 = vtanh.f32 %v10330_v4 }
 0x710   :  { %v8779_v6 = vpop.eup %8778 }
 0x711   :  { %v4756_v9 = vmul.f32 %v8779_v6, %v8777_v5  ;;  %v10485_v5 = vld [vmem:[#allocation6 + $0x88] ss:$16 sps:$4 sm:$0xff]   ;;  %v10491_v6 = vld [vmem:[#allocation6 + $0xa4] ss:$16 sps:$4 sm:$0xff]  }
 0x712   :  { %11440 = vst [vmem:[#allocation12_spill] sm:$0xff] %v10485_v5  ;;  %11441 = vst [vmem:[#allocation13_spill] sm:$0xff] %v10491_v6 }
 0x713   :  { %v10337_v16 = vpack.c.bf16 %v4756_v9, %v4756_v9  ;;  %v10493_v9 = vld [vmem:[#allocation6 + $0xac] ss:$16 sps:$4 sm:$0xff]  }
 0x714   :  { %11442 = vst [vmem:[#allocation14_spill] sm:$0xff] %v10493_v9 }
 0x715   :  { %5197 = vmatmul.mubr.bf16.vlgmr.msra.gmra.mrb[56].mxu0 %v10337_v16  ;;  %5238 = vmatmul.mubr.bf16.vlgmr.msra.gmra.mrb[64].mxu1 %v10337_v16 }
 0x716   :  { %5473 = vmatpush1.bf16.msra.mxu0 %v10333_v14  ;;  %5514 = vmatpush1.bf16.msra.mxu1 %v10335_v15 }
 0x717   :  { %5474 = vmatprep.subr.bf16.mxu0 %v10339_v17  ;;  %5515 = vmatprep.subr.bf16.mxu1 %v10341_v18 }
 0x718   :  { %5504 = vmatprep.mubr.bf16.mxu0 %v11146_v34  ;;  %5545 = vmatprep.mubr.bf16.mxu1 %v11146_v34 }
 0x71a   :  { %5475 = vmatpush1.bf16.msra.mxu0 %v10347_v11  ;;  %5516 = vmatpush1.bf16.msra.mxu1 %v10349_v23 }
 0x71b   :  { %5476 = vmatprep.subr.bf16.mxu0 %v10353_v41  ;;  %5517 = vmatprep.subr.bf16.mxu1 %v10355_v35 }
 0x71e   :  { %5477 = vmatpush1.bf16.msra.mxu0 %v10361_v10  ;;  %5518 = vmatpush1.bf16.msra.mxu1 %v10363_v13 }
 0x71f   :  { %5478 = vmatprep.subr.bf16.mxu0 %v10367_v12  ;;  %5519 = vmatprep.subr.bf16.mxu1 %v10369_v37 }
 0x722   :  { %5479 = vmatpush1.bf16.msra.mxu0 %v10373_v30  ;;  %5520 = vmatpush1.bf16.msra.mxu1 %v10375_v19 }
 0x723   :  { %5480 = vmatprep.subr.bf16.mxu0 %v10379_v29  ;;  %5521 = vmatprep.subr.bf16.mxu1 %v10381_v7 }
 0x726   :  { %5481 = vmatpush1.bf16.msra.mxu0 %v10385_v43  ;;  %5522 = vmatpush1.bf16.msra.mxu1 %v10387_v24 }
 0x727   :  { %5482 = vmatprep.subr.bf16.mxu0 %v10391_v25  ;;  %5523 = vmatprep.subr.bf16.mxu1 %v10393_v33 }
 0x72a   :  { %5483 = vmatpush1.bf16.msra.mxu0 %v10397_v20  ;;  %5524 = vmatpush1.bf16.msra.mxu1 %v10399_v54 }
 0x72b   :  { %5484 = vmatprep.subr.bf16.mxu0 %v10403_v0  ;;  %5525 = vmatprep.subr.bf16.mxu1 %v10405_v44 }
 0x72e   :  { %5485 = vmatpush1.bf16.msra.mxu0 %v10409_v28  ;;  %5526 = vmatpush1.bf16.msra.mxu1 %v10411_v49 }
 0x72f   :  { %5486 = vmatprep.subr.bf16.mxu0 %v10415_v26  ;;  %5527 = vmatprep.subr.bf16.mxu1 %v10417_v52 }
 0x732   :  { %5487 = vmatpush1.bf16.msra.mxu0 %v10421_v57  ;;  %5528 = vmatpush1.bf16.msra.mxu1 %v10423_v31 }
 0x733   :  { %5989 = vmatprep.subr.bf16.mxu0 %v10431_v46  ;;  %6030 = vmatprep.subr.bf16.mxu1 %v10433_v21 }
 0x735   :  { %5505 = vmatmul.mubr.bf16.vlgmr.msra.gmra.mrb[60].mxu0 %v10337_v16  ;;  %5546 = vmatmul.mubr.bf16.vlgmr.msra.gmra.mrb[68].mxu1 %v10337_v16  ;;  %v10495_v16 = vld [vmem:[#allocation6 + $0xa0] ss:$16 sps:$4 sm:$0xff]  }
 0x736   :  { %5990 = vmatpush1.bf16.msra.mxu0 %v10435_v39  ;;  %6031 = vmatpush1.bf16.msra.mxu1 %v10437_v40  ;;  %11443 = vst [vmem:[#allocation15_spill] sm:$0xff] %v10495_v16 }
 0x737   :  { %5991 = vmatprep.subr.bf16.mxu0 %v10443_v53  ;;  %6032 = vmatprep.subr.bf16.mxu1 %v10445_v45 }
 0x73a   :  { %5992 = vmatpush1.bf16.msra.mxu0 %v10447_v32  ;;  %6033 = vmatpush1.bf16.msra.mxu1 %v10449_v38 }
 0x73b   :  { %5993 = vmatprep.subr.bf16.mxu0 %v10455_v51  ;;  %6034 = vmatprep.subr.bf16.mxu1 %v10457_v56 }
 0x73e   :  { %5994 = vmatpush1.bf16.msra.mxu0 %v10459_v59  ;;  %6035 = vmatpush1.bf16.msra.mxu1 %v10461_v50 }
 0x73f   :  { %5995 = vmatprep.subr.bf16.mxu0 %v10467_v60  ;;  %6036 = vmatprep.subr.bf16.mxu1 %v10469_v61 }
 0x742   :  { %5996 = vmatpush1.bf16.msra.mxu0 %v10471_v62  ;;  %6037 = vmatpush1.bf16.msra.mxu1 %v10473_v63 }
 0x743   :  { %5997 = vmatprep.subr.bf16.mxu0 %v10479_v1  ;;  %6038 = vmatprep.subr.bf16.mxu1 %v10481_v2  ;;  %v10509_v2 = vld [vmem:[#allocation6 + $0xc8] ss:$16 sps:$4 sm:$0xff]   ;;  %v10585_v1 = vld [vmem:[#allocation6 + $0x1a4] ss:$16 sps:$4 sm:$0xff]  }
 0x744   :  { %11448 = vst [vmem:[#allocation20_spill] sm:$0xff] %v10509_v2  ;;  %11473 = vst [vmem:[#allocation71_spill] sm:$0xff] %v10585_v1 }
 0x746   :  { %5998 = vmatpush1.bf16.msra.mxu0 %v10483_v3  ;;  %6039 = vmatpush1.bf16.msra.mxu1 %v10485_v5  ;;  %v10505_v3 = vld [vmem:[#allocation6 + $0xcc] ss:$16 sps:$4 sm:$0xff]   ;;  %v10507_v5 = vld [vmem:[#allocation6 + $0xc0] ss:$16 sps:$4 sm:$0xff]  }
 0x747   :  { %5999 = vmatprep.subr.bf16.mxu0 %v10491_v6  ;;  %6040 = vmatprep.subr.bf16.mxu1 %v10493_v9  ;;  %11446 = vst [vmem:[#allocation18_spill] sm:$0xff] %v10505_v3  ;;  %11447 = vst [vmem:[#allocation19_spill] sm:$0xff] %v10507_v5  ;;  %v10515_v9 = vld [vmem:[#allocation6 + $0xe4] ss:$16 sps:$4 sm:$0xff]   ;;  %v10521_v6 = vld [vmem:[#allocation6 + $0xe8] ss:$16 sps:$4 sm:$0xff]  }
 0x748   :  { %11449 = vst [vmem:[#allocation21_spill] sm:$0xff] %v10515_v9  ;;  %11452 = vst [vmem:[#allocation26_spill] sm:$0xff] %v10521_v6 }
 0x74a   :  { %6000 = vmatpush1.bf16.msra.mxu0 %v10495_v16  ;;  %6041 = vmatpush1.bf16.msra.mxu1 %v10497_v47  ;;  %v10517_v16 = vld [vmem:[#allocation6 + $0xec] ss:$16 sps:$4 sm:$0xff]   ;;  %v10519_v47 = vld [vmem:[#allocation6 + $0xe0] ss:$16 sps:$4 sm:$0xff]  }
 0x74b   :  { %6001 = vmatprep.subr.bf16.mxu0 %v10503_v22  ;;  %6042 = vmatprep.subr.bf16.mxu1 %v10505_v3  ;;  %11450 = vst [vmem:[#allocation22_spill] sm:$0xff] %v10517_v16  ;;  %11451 = vst [vmem:[#allocation24_spill] sm:$0xff] %v10519_v47  ;;  %v10527_v3 = vld [vmem:[#allocation6 + $0x104] ss:$16 sps:$4 sm:$0xff]   ;;  %v10533_v22 = vld [vmem:[#allocation6 + $0x108] ss:$16 sps:$4 sm:$0xff]  }
 0x74c   :  { %11453 = vst [vmem:[#allocation23_spill] sm:$0xff] %v10527_v3  ;;  %11456 = vst [vmem:[#allocation28_spill] sm:$0xff] %v10533_v22 }
 0x74e   :  { %6002 = vmatpush1.bf16.msra.mxu0 %v10507_v5  ;;  %6043 = vmatpush1.bf16.msra.mxu1 %v10509_v2  ;;  %v10529_v5 = vld [vmem:[#allocation6 + $0x10c] ss:$16 sps:$4 sm:$0xff]   ;;  %v10531_v2 = vld [vmem:[#allocation6 + $0x100] ss:$16 sps:$4 sm:$0xff]  }
 0x74f   :  { %6003 = vmatprep.subr.bf16.mxu0 %v10515_v9  ;;  %6044 = vmatprep.subr.bf16.mxu1 %v10517_v16  ;;  %11454 = vst [vmem:[#allocation25_spill] sm:$0xff] %v10529_v5  ;;  %11455 = vst [vmem:[#allocation27_spill] sm:$0xff] %v10531_v2  ;;  %v10539_v16 = vld [vmem:[#allocation6 + $0x124] ss:$16 sps:$4 sm:$0xff]   ;;  %v10545_v9 = vld [vmem:[#allocation6 + $0x128] ss:$16 sps:$4 sm:$0xff]  }
 0x750   :  { %11457 = vst [vmem:[#allocation29_spill] sm:$0xff] %v10539_v16  ;;  %11460 = vst [vmem:[#allocation32_spill] sm:$0xff] %v10545_v9 }
 0x752   :  { %6004 = vmatpush1.bf16.msra.mxu0 %v10519_v47  ;;  %6045 = vmatpush1.bf16.msra.mxu1 %v10521_v6  ;;  %v10541_v47 = vld [vmem:[#allocation6 + $0x12c] ss:$16 sps:$4 sm:$0xff]   ;;  %v10543_v6 = vld [vmem:[#allocation6 + $0x120] ss:$16 sps:$4 sm:$0xff]  }
 0x753   :  { %6005 = vmatprep.subr.bf16.mxu0 %v10527_v3  ;;  %6046 = vmatprep.subr.bf16.mxu1 %v10529_v5  ;;  %11458 = vst [vmem:[#allocation30_spill] sm:$0xff] %v10541_v47  ;;  %11459 = vst [vmem:[#allocation31_spill] sm:$0xff] %v10543_v6  ;;  %v10551_v5 = vld [vmem:[#allocation6 + $0x144] ss:$16 sps:$4 sm:$0xff]   ;;  %v10557_v3 = vld [vmem:[#allocation6 + $0x148] ss:$16 sps:$4 sm:$0xff]  }
 0x754   :  { %11461 = vst [vmem:[#allocation33_spill] sm:$0xff] %v10551_v5  ;;  %11464 = vst [vmem:[#allocation35_spill] sm:$0xff] %v10557_v3 }
 0x756   :  { %6006 = vmatpush1.bf16.msra.mxu0 %v10531_v2  ;;  %6047 = vmatpush1.bf16.msra.mxu1 %v10533_v22  ;;  %v10553_v2 = vld [vmem:[#allocation6 + $0x14c] ss:$16 sps:$4 sm:$0xff]   ;;  %v10555_v22 = vld [vmem:[#allocation6 + $0x140] ss:$16 sps:$4 sm:$0xff]  }
 0x757   :  { %6007 = vmatprep.subr.bf16.mxu0 %v10539_v16  ;;  %6048 = vmatprep.subr.bf16.mxu1 %v10541_v47  ;;  %11462 = vst [vmem:[#allocation34_spill] sm:$0xff] %v10553_v2  ;;  %11463 = vst [vmem:[#allocation36_spill] sm:$0xff] %v10555_v22  ;;  %v10563_v47 = vld [vmem:[#allocation6 + $0x164] ss:$16 sps:$4 sm:$0xff]   ;;  %v10569_v16 = vld [vmem:[#allocation6 + $0x168] ss:$16 sps:$4 sm:$0xff]  }
 0x758   :  { %11465 = vst [vmem:[#allocation46_spill] sm:$0xff] %v10563_v47  ;;  %11468 = vst [vmem:[#allocation38_spill] sm:$0xff] %v10569_v16 }
 0x75a   :  { %6008 = vmatpush1.bf16.msra.mxu0 %v10543_v6  ;;  %6049 = vmatpush1.bf16.msra.mxu1 %v10545_v9  ;;  %v10565_v6 = vld [vmem:[#allocation6 + $0x16c] ss:$16 sps:$4 sm:$0xff]   ;;  %v10567_v9 = vld [vmem:[#allocation6 + $0x160] ss:$16 sps:$4 sm:$0xff]  }
 0x75b   :  { %6009 = vmatprep.subr.bf16.mxu0 %v10551_v5  ;;  %6050 = vmatprep.subr.bf16.mxu1 %v10553_v2  ;;  %11466 = vst [vmem:[#allocation37_spill] sm:$0xff] %v10565_v6  ;;  %11467 = vst [vmem:[#allocation48_spill] sm:$0xff] %v10567_v9  ;;  %v10575_v2 = vld [vmem:[#allocation6 + $0x184] ss:$16 sps:$4 sm:$0xff]   ;;  %v10581_v5 = vld [vmem:[#allocation6 + $0x188] ss:$16 sps:$4 sm:$0xff]  }
 0x75c   :  { %11469 = vst [vmem:[#allocation67_spill] sm:$0xff] %v10575_v2  ;;  %11472 = vst [vmem:[#allocation70_spill] sm:$0xff] %v10581_v5 }
 0x75e   :  { %6010 = vmatpush1.bf16.msra.mxu0 %v10555_v22  ;;  %6051 = vmatpush1.bf16.msra.mxu1 %v10557_v3  ;;  %v10577_v22 = vld [vmem:[#allocation6 + $0x18c] ss:$16 sps:$4 sm:$0xff]   ;;  %v10579_v3 = vld [vmem:[#allocation6 + $0x180] ss:$16 sps:$4 sm:$0xff]  }
 0x75f   :  { %6011 = vmatprep.subr.bf16.mxu0 %v10563_v47  ;;  %6052 = vmatprep.subr.bf16.mxu1 %v10565_v6  ;;  %11470 = vst [vmem:[#allocation68_spill] sm:$0xff] %v10577_v22  ;;  %11471 = vst [vmem:[#allocation69_spill] sm:$0xff] %v10579_v3  ;;  %v10587_v47 = vld [vmem:[#allocation6 + $0x1ac] ss:$16 sps:$4 sm:$0xff]   ;;  %v10597_v6 = vld [vmem:[#allocation6 + $0x1c4] ss:$16 sps:$4 sm:$0xff]  }
 0x760   :  { %11474 = vst [vmem:[#allocation72_spill] sm:$0xff] %v10587_v47  ;;  %11477 = vst [vmem:[#allocation75_spill] sm:$0xff] %v10597_v6 }
 0x762   :  { %6012 = vmatpush1.bf16.msra.mxu0 %v10567_v9  ;;  %6053 = vmatpush1.bf16.msra.mxu1 %v10569_v16  ;;  %v10591_v16 = vld [vmem:[#allocation6 + $0x1a0] ss:$16 sps:$4 sm:$0xff]   ;;  %v10593_v9 = vld [vmem:[#allocation6 + $0x1a8] ss:$16 sps:$4 sm:$0xff]  }
 0x763   :  { %6013 = vmatprep.subr.bf16.mxu0 %v10575_v2  ;;  %6054 = vmatprep.subr.bf16.mxu1 %v10577_v22  ;;  %11475 = vst [vmem:[#allocation73_spill] sm:$0xff] %v10591_v16  ;;  %11476 = vst [vmem:[#allocation74_spill] sm:$0xff] %v10593_v9  ;;  %v10599_v2 = vld [vmem:[#allocation6 + $0x1cc] ss:$16 sps:$4 sm:$0xff]   ;;  %v10603_v22 = vld [vmem:[#allocation6 + $0x1c0] ss:$16 sps:$4 sm:$0xff]  }
 0x764   :  { %11478 = vst [vmem:[#allocation76_spill] sm:$0xff] %v10599_v2  ;;  %11479 = vst [vmem:[#allocation77_spill] sm:$0xff] %v10603_v22 }
 0x766   :  { %6014 = vmatpush1.bf16.msra.mxu0 %v10579_v3  ;;  %6055 = vmatpush1.bf16.msra.mxu1 %v10581_v5  ;;  %v10605_v3 = vld [vmem:[#allocation6 + $0x1c8] ss:$16 sps:$4 sm:$0xff]   ;;  %v10609_v5 = vld [vmem:[#allocation6 + $0x1e4] ss:$16 sps:$4 sm:$0xff]  }
 0x767   :  { %6015 = vmatprep.subr.bf16.mxu0 %v10585_v1  ;;  %6056 = vmatprep.subr.bf16.mxu1 %v10587_v47  ;;  %11480 = vst [vmem:[#allocation78_spill] sm:$0xff] %v10605_v3  ;;  %11481 = vst [vmem:[#allocation79_spill] sm:$0xff] %v10609_v5  ;;  %v10611_v1 = vld [vmem:[#allocation6 + $0x1ec] ss:$16 sps:$4 sm:$0xff]   ;;  %v10615_v47 = vld [vmem:[#allocation6 + $0x1e0] ss:$16 sps:$4 sm:$0xff]  }
 0x768   :  { %11482 = vst [vmem:[#allocation80_spill] sm:$0xff] %v10611_v1  ;;  %11483 = vst [vmem:[#allocation81_spill] sm:$0xff] %v10615_v47 }
 0x76a   :  { %6016 = vmatpush1.bf16.msra.mxu0 %v10591_v16  ;;  %6057 = vmatpush1.bf16.msra.mxu1 %v10593_v9  ;;  %v10617_v16 = vld [vmem:[#allocation6 + $0x1e8] ss:$16 sps:$4 sm:$0xff]  }
 0x76b   :  { %6017 = vmatprep.subr.bf16.mxu0 %v10597_v6  ;;  %6058 = vmatprep.subr.bf16.mxu1 %v10599_v2  ;;  %11484 = vst [vmem:[#allocation82_spill] sm:$0xff] %v10617_v16 }
 0x76e   :  { %6018 = vmatpush1.bf16.msra.mxu0 %v10603_v22  ;;  %6059 = vmatpush1.bf16.msra.mxu1 %v10605_v3  ;;  %v4822_v3 = vld [vmem:[%s10871_s5] sm:$0xf] }
 0x76f   :  { %6019 = vmatprep.subr.bf16.mxu0 %v10609_v5  ;;  %6060 = vmatprep.subr.bf16.mxu1 %v10611_v1  ;;  %v4827_v22 = vrot.slane %v4822_v3, %v11422_v55  ;;  %v4831_v2 = vrot.slane %v4822_v3, %v11423_v58  ;;  %v4839_v50 = vrot.slane %v4822_v3, %v11174_v36 }
 0x770   :  { %v4835_v55 = vrot.slane %v4822_v3, %v11175_v42  ;;  %v11485_v3 = vld [vmem:[#allocation63_spill] sm:$0xff] }
 0x772   :  { %6020 = vmatpush1.bf16.msra.mxu0 %v10615_v47  ;;  %6061 = vmatpush1.bf16.msra.mxu1 %v10617_v16 }
 0x773   :  { %6297 = vmatprep.subr.bf16.mxu0 %v10304_v27  ;;  %6338 = vmatprep.subr.bf16.mxu1 %v10306_v48 }
 0x7e8   :  { %v5198_v6 = vpop.f32.mrb[56].mxu0  ;;  %v5239_v5 = vpop.f32.mrb[64].mxu1 }
 0x7e9   :  { %v5199_v9 = vadd.f32 %v5198_v6, %v4827_v22  ;;  %v5200_v1 = vpop.f32.mrb[57].mxu0  ;;  %v5241_v63 = vpop.f32.mrb[65].mxu1  ;;  %v5240_v56 = vadd.f32 %v5239_v5, %v4835_v55 }
 0x7ea   :  { %v5201_v47 = vadd.f32 %v5200_v1, %v4831_v2  ;;  %v5202_v62 = vpop.f32.mrb[58].mxu0  ;;  %v5243_v16 = vpop.f32.mrb[66].mxu1  ;;  %v5242_v59 = vadd.f32 %v5241_v63, %v4839_v50 }
 0x7eb   :  { %v7707_v61 = vmul.f32 -1.442695, %v5199_v9  ;;  %v5203_v27 = vpop.f32.mrb[59].mxu0  ;;  %v5244_v60 = vpop.f32.mrb[67].mxu1 }
 0x7ec   :  { %v7708_v48 = vmul.f32 -1.442695, %v5201_v47  ;;  %v7709_v58 = vmul.f32 -1.442695, %v5242_v59  ;;  %v11487_v27 = vld [vmem:[#allocation64_spill] sm:$0xff] }
 0x7ed   :  { %8780 = vpow2.f32 %v7707_v61 }
 0x7ee   :  { %8782 = vpow2.f32 %v7708_v48 }
 0x7ef   :  { %8784 = vpow2.f32 %v7709_v58  ;;  %v11486_v58 = vld [vmem:[#allocation53_spill] sm:$0xff] }
 0x7f0   :  { %8786 = vtanh.f32 %v5240_v56 }
 0x7f7   :  { %v8781_v51 = vpop.eup %8780 }
 0x7f8   :  { %v8783_v22 = vpop.eup %8782  ;;  %v5249_v6 = vadd.f32 1.0, %v8781_v51 }
 0x7f9   :  { %v5255_v62 = vadd.f32 1.0, %v8783_v22  ;;  %v8785_v1 = vpop.eup %8784  ;;  %v11488_v22 = vld [vmem:[#allocation55_spill] sm:$0xff] }
 0x7fa   :  { %8788 = vrcp.f32 %v5249_v6  ;;  %v8787_v60 = vpop.eup %8786  ;;  %v5262_v61 = vadd.f32 1.0, %v8785_v1 }
 0x7fb   :  { %8790 = vrcp.f32 %v5255_v62 }
 0x7fc   :  { %8792 = vrcp.f32 %v5262_v61 }
 0x804   :  { %v8789_v47 = vpop.eup %8788 }
 0x805   :  { %v8791_v2 = vpop.eup %8790  ;;  %v5266_v9 = vmul.f32 %v8789_v47, %v8787_v60 }
 0x806   :  { %v5265_v50 = vmul.f32 %v8791_v2, %v10318_v8 }
 0x808   :  { %v10633_v63 = vadd.f32 %v5266_v9, %v5265_v50  ;;  %v5506_v59 = vpop.f32.mrb[60].mxu0  ;;  %v5547_v55 = vpop.f32.mrb[68].mxu1 }
 0x809   :  { %v5554_v51 = vadd.f32 %v5506_v59, %v11485_v3  ;;  %v5556_v56 = vadd.f32 %v5547_v55, %v11486_v58  ;;  %v5508_v5 = vpop.f32.mrb[61].mxu0  ;;  %v5549_v16 = vpop.f32.mrb[69].mxu1 }
 0x80a   :  { %v5555_v48 = vadd.f32 %v5508_v5, %v11487_v27  ;;  %v5557_v6 = vadd.f32 %v5549_v16, %v11488_v22  ;;  %v5510_v62 = vpop.f32.mrb[62].mxu0  ;;  %v5551_v60 = vpop.f32.mrb[70].mxu1  ;;  %8794 = vtanh.f32 %v10633_v63 }
 0x80b   :  { %v7742_v8 = vmul.f32 -1.442695, %v5554_v51  ;;  %v5511_v1 = vpop.f32.mrb[63].mxu0  ;;  %v5552_v47 = vpop.f32.mrb[71].mxu1 }
 0x80c   :  { %v7743_v2 = vmul.f32 -1.442695, %v5555_v48  ;;  %v8793_v9 = vpop.eup %8792  ;;  %v7744_v50 = vmul.f32 -1.442695, %v5557_v6 }
 0x80d   :  { %8796 = vpow2.f32 %v7742_v8 }
 0x80e   :  { %8798 = vpow2.f32 %v7743_v2 }
 0x80f   :  { %8800 = vpow2.f32 %v7744_v50  ;;  %v11531_v50 = vld [vmem:[#allocation69_spill] sm:$0xff] }
 0x810   :  { %8802 = vtanh.f32 %v5556_v56 }
 0x814   :  { %v8795_v61 = vpop.eup %8794 }
 0x815   :  { %v10640_v59 = vmul.f32 %v8795_v61, %v8793_v9  ;;  %v11529_v9 = vld [vmem:[#allocation67_spill] sm:$0xff]  ;;  %v11530_v61 = vld [vmem:[#allocation68_spill] sm:$0xff] }
 0x817   :  { %v8797_v55 = vpop.eup %8796  ;;  %v5270_v3 = vpack.c.bf16 %v10640_v59, %v10640_v59 }
 0x818   :  { %v8799_v58 = vpop.eup %8798  ;;  %v5561_v5 = vadd.f32 1.0, %v8797_v55  ;;  %v11532_v55 = vld [vmem:[#allocation70_spill] sm:$0xff] }
 0x819   :  { %v5567_v16 = vadd.f32 1.0, %v8799_v58  ;;  %6021 = vmatprep.mubr.bf16.mxu0 %v5270_v3  ;;  %6062 = vmatprep.mubr.bf16.mxu1 %v5270_v3  ;;  %v8801_v51 = vpop.eup %8800  ;;  %v11533_v3 = vld [vmem:[#allocation71_spill] sm:$0xff]  ;;  %v11534_v58 = vld [vmem:[#allocation72_spill] sm:$0xff] }
 0x81a   :  { %8804 = vrcp.f32 %v5561_v5  ;;  %v8803_v27 = vpop.eup %8802  ;;  %v5574_v62 = vadd.f32 1.0, %v8801_v51  ;;  %v11535_v5 = vld [vmem:[#allocation73_spill] sm:$0xff]  ;;  %v11537_v51 = vld [vmem:[#allocation75_spill] sm:$0xff] }
 0x81b   :  { %8806 = vrcp.f32 %v5567_v16  ;;  %v11536_v16 = vld [vmem:[#allocation74_spill] sm:$0xff] }
 0x81c   :  { %8808 = vrcp.f32 %v5574_v62  ;;  %v11542_v62 = vld [vmem:[#allocation80_spill] sm:$0xff] }
 0x824   :  { %v8805_v48 = vpop.eup %8804 }
 0x825   :  { %v8807_v22 = vpop.eup %8806  ;;  %v5578_v6 = vmul.f32 %v8805_v48, %v8803_v27  ;;  %v11538_v27 = vld [vmem:[#allocation76_spill] sm:$0xff]  ;;  %v11539_v48 = vld [vmem:[#allocation77_spill] sm:$0xff] }
 0x826   :  { %v5577_v60 = vmul.f32 %v8807_v22, %v10330_v4  ;;  %v8809_v1 = vpop.eup %8808  ;;  %v11490_v4 = vld [vmem:[#allocation41_spill] sm:$0xff]  ;;  %v11540_v22 = vld [vmem:[#allocation78_spill] sm:$0xff] }
 0x828   :  { %v10645_v8 = vadd.f32 %v5578_v6, %v5577_v60  ;;  %v11541_v6 = vld [vmem:[#allocation79_spill] sm:$0xff]  ;;  %v11543_v60 = vld [vmem:[#allocation81_spill] sm:$0xff] }
 0x82a   :  { %8810 = vtanh.f32 %v10645_v8 }
 0x834   :  { %v8811_v56 = vpop.eup %8810 }
 0x835   :  { %v5581_v47 = vmul.f32 %v8811_v56, %v8809_v1  ;;  %v11544_v1 = vld [vmem:[#allocation82_spill] sm:$0xff] }
 0x836   :  { %v6930_v56 = vld [vmem:[%s10872_s6] sm:$0xff] }
 0x837   :  { %v5582_v2 = vpack.c.bf16 %v5581_v47, %v5581_v47  ;;  %v6931_v47 = vld [vmem:[%s10872_s6 + $0x8] sm:$0xff] }
 0x839   :  { %6022 = vmatmul.mubr.bf16.vlgmr.msra.gmra.mrb[64].mxu0 %v5582_v2  ;;  %6063 = vmatmul.mubr.bf16.vlgmr.msra.gmra.mrb[72].mxu1 %v5582_v2 }
 0x83a   :  { %6298 = vmatpush1.bf16.msra.mxu0 %v10333_v14  ;;  %6339 = vmatpush1.bf16.msra.mxu1 %v10335_v15  ;;  %v11491_v14 = vld [vmem:[#allocation56_spill] sm:$0xff]  ;;  %v11492_v15 = vld [vmem:[#allocation43_spill] sm:$0xff] }
 0x83b   :  { %6299 = vmatprep.subr.bf16.mxu0 %v10339_v17  ;;  %6340 = vmatprep.subr.bf16.mxu1 %v10341_v18  ;;  %v11493_v17 = vld [vmem:[#allocation59_spill] sm:$0xff]  ;;  %v11494_v18 = vld [vmem:[#allocation45_spill] sm:$0xff] }
 0x83c   :  { %6329 = vmatprep.mubr.bf16.mxu0 %v11146_v34  ;;  %6370 = vmatprep.mubr.bf16.mxu1 %v11146_v34  ;;  %v11489_v34 = vld [vmem:[#allocation54_spill] sm:$0xff] }
 0x83e   :  { %6300 = vmatpush1.bf16.msra.mxu0 %v10347_v11  ;;  %6341 = vmatpush1.bf16.msra.mxu1 %v10349_v23  ;;  %v11495_v11 = vld [vmem:[#allocation60_spill] sm:$0xff]  ;;  %v11496_v23 = vld [vmem:[#allocation47_spill] sm:$0xff] }
 0x83f   :  { %6301 = vmatprep.subr.bf16.mxu0 %v10353_v41  ;;  %6342 = vmatprep.subr.bf16.mxu1 %v10355_v35  ;;  %v11497_v41 = vld [vmem:[#allocation52_spill] sm:$0xff] }
 0x840   :  { %v11498_v35 = vld [vmem:[#allocation40_spill] sm:$0xff] }
 0x842   :  { %6302 = vmatpush1.bf16.msra.mxu0 %v10361_v10  ;;  %6343 = vmatpush1.bf16.msra.mxu1 %v10363_v13  ;;  %v11499_v10 = vld [vmem:[#allocation11_spill] sm:$0xff]  ;;  %v11500_v13 = vld [vmem:[#allocation12_spill] sm:$0xff] }
 0x843   :  { %6303 = vmatprep.subr.bf16.mxu0 %v10367_v12  ;;  %6344 = vmatprep.subr.bf16.mxu1 %v10369_v37  ;;  %v11501_v12 = vld [vmem:[#allocation13_spill] sm:$0xff]  ;;  %v11502_v37 = vld [vmem:[#allocation14_spill] sm:$0xff] }
 0x846   :  { %6304 = vmatpush1.bf16.msra.mxu0 %v10373_v30  ;;  %6345 = vmatpush1.bf16.msra.mxu1 %v10375_v19  ;;  %v11503_v30 = vld [vmem:[#allocation15_spill] sm:$0xff]  ;;  %v11504_v19 = vld [vmem:[#allocation16_spill] sm:$0xff] }
 0x847   :  { %6305 = vmatprep.subr.bf16.mxu0 %v10379_v29  ;;  %6346 = vmatprep.subr.bf16.mxu1 %v10381_v7  ;;  %v11505_v29 = vld [vmem:[#allocation17_spill] sm:$0xff]  ;;  %v11506_v7 = vld [vmem:[#allocation18_spill] sm:$0xff] }
 0x84a   :  { %6306 = vmatpush1.bf16.msra.mxu0 %v10385_v43  ;;  %6347 = vmatpush1.bf16.msra.mxu1 %v10387_v24  ;;  %v11507_v43 = vld [vmem:[#allocation19_spill] sm:$0xff]  ;;  %v11508_v24 = vld [vmem:[#allocation20_spill] sm:$0xff] }
 0x84b   :  { %6307 = vmatprep.subr.bf16.mxu0 %v10391_v25  ;;  %6348 = vmatprep.subr.bf16.mxu1 %v10393_v33  ;;  %v11509_v25 = vld [vmem:[#allocation21_spill] sm:$0xff]  ;;  %v11510_v33 = vld [vmem:[#allocation22_spill] sm:$0xff] }
 0x84e   :  { %6308 = vmatpush1.bf16.msra.mxu0 %v10397_v20  ;;  %6349 = vmatpush1.bf16.msra.mxu1 %v10399_v54  ;;  %v11511_v20 = vld [vmem:[#allocation24_spill] sm:$0xff]  ;;  %v11512_v54 = vld [vmem:[#allocation26_spill] sm:$0xff] }
 0x84f   :  { %6309 = vmatprep.subr.bf16.mxu0 %v10403_v0  ;;  %6350 = vmatprep.subr.bf16.mxu1 %v10405_v44  ;;  %v11513_v0 = vld [vmem:[#allocation23_spill] sm:$0xff]  ;;  %v11514_v44 = vld [vmem:[#allocation25_spill] sm:$0xff] }
 0x852   :  { %6310 = vmatpush1.bf16.msra.mxu0 %v10409_v28  ;;  %6351 = vmatpush1.bf16.msra.mxu1 %v10411_v49  ;;  %v11515_v28 = vld [vmem:[#allocation27_spill] sm:$0xff]  ;;  %v11516_v49 = vld [vmem:[#allocation28_spill] sm:$0xff] }
 0x853   :  { %6311 = vmatprep.subr.bf16.mxu0 %v10415_v26  ;;  %6352 = vmatprep.subr.bf16.mxu1 %v10417_v52  ;;  %v11517_v26 = vld [vmem:[#allocation29_spill] sm:$0xff]  ;;  %v11518_v52 = vld [vmem:[#allocation30_spill] sm:$0xff] }
 0x856   :  { %6312 = vmatpush1.bf16.msra.mxu0 %v10421_v57  ;;  %6353 = vmatpush1.bf16.msra.mxu1 %v10423_v31  ;;  %v11519_v57 = vld [vmem:[#allocation31_spill] sm:$0xff]  ;;  %v11520_v31 = vld [vmem:[#allocation32_spill] sm:$0xff] }
 0x857   :  { %6814 = vmatprep.subr.bf16.mxu0 %v10431_v46  ;;  %6855 = vmatprep.subr.bf16.mxu1 %v10433_v21  ;;  %v11521_v46 = vld [vmem:[#allocation33_spill] sm:$0xff]  ;;  %v11522_v21 = vld [vmem:[#allocation34_spill] sm:$0xff] }
 0x859   :  { %6330 = vmatmul.mubr.bf16.vlgmr.msra.gmra.mrb[68].mxu0 %v5582_v2  ;;  %6371 = vmatmul.mubr.bf16.vlgmr.msra.gmra.mrb[76].mxu1 %v5582_v2  ;;  %v10750_v2 = vpack.c.bf16 %v6931_v47, %v6930_v56 }
 0x85a   :  { %6815 = vmatpush1.bf16.msra.mxu0 %v10435_v39  ;;  %6856 = vmatpush1.bf16.msra.mxu1 %v10437_v40  ;;  %v11523_v39 = vld [vmem:[#allocation36_spill] sm:$0xff]  ;;  %v11524_v40 = vld [vmem:[#allocation35_spill] sm:$0xff] }
 0x85b   :  { %6816 = vmatprep.subr.bf16.mxu0 %v10443_v53  ;;  %6857 = vmatprep.subr.bf16.mxu1 %v10445_v45  ;;  %v11525_v53 = vld [vmem:[#allocation46_spill] sm:$0xff]  ;;  %v11526_v45 = vld [vmem:[#allocation37_spill] sm:$0xff] }
 0x85e   :  { %6817 = vmatpush1.bf16.msra.mxu0 %v10447_v32  ;;  %6858 = vmatpush1.bf16.msra.mxu1 %v10449_v38  ;;  %v11527_v32 = vld [vmem:[#allocation48_spill] sm:$0xff]  ;;  %v11528_v38 = vld [vmem:[#allocation38_spill] sm:$0xff] }
 0x85f   :  { %6818 = vmatprep.subr.bf16.mxu0 %v11489_v34  ;;  %6859 = vmatprep.subr.bf16.mxu1 %v11490_v4  ;;  %v5647_v34 = vld [vmem:[%s10871_s5] sm:$0xf] }
 0x860   :  { %v11545_v4 = vld [vmem:[#allocation42_spill] sm:$0xff] }
 0x862   :  { %6819 = vmatpush1.bf16.msra.mxu0 %v11491_v14  ;;  %6860 = vmatpush1.bf16.msra.mxu1 %v11492_v15  ;;  %v5652_v14 = vrot.slane %v5647_v34, %v11545_v4  ;;  %v11546_v15 = vld [vmem:[#allocation44_spill] sm:$0xff] }
 0x863   :  { %6820 = vmatprep.subr.bf16.mxu0 %v11493_v17  ;;  %6861 = vmatprep.subr.bf16.mxu1 %v11494_v18  ;;  %v5656_v17 = vrot.slane %v5647_v34, %v11546_v15 }
 0x866   :  { %6821 = vmatpush1.bf16.msra.mxu0 %v11495_v11  ;;  %6862 = vmatpush1.bf16.msra.mxu1 %v11496_v23 }
 0x867   :  { %6822 = vmatprep.subr.bf16.mxu0 %v11497_v41  ;;  %6863 = vmatprep.subr.bf16.mxu1 %v11498_v35 }
 0x86a   :  { %6823 = vmatpush1.bf16.msra.mxu0 %v11499_v10  ;;  %6864 = vmatpush1.bf16.msra.mxu1 %v11500_v13 }
 0x86b   :  { %6824 = vmatprep.subr.bf16.mxu0 %v11501_v12  ;;  %6865 = vmatprep.subr.bf16.mxu1 %v11502_v37 }
 0x86e   :  { %6825 = vmatpush1.bf16.msra.mxu0 %v11503_v30  ;;  %6866 = vmatpush1.bf16.msra.mxu1 %v11504_v19 }
 0x86f   :  { %6826 = vmatprep.subr.bf16.mxu0 %v11505_v29  ;;  %6867 = vmatprep.subr.bf16.mxu1 %v11506_v7  ;;  %v5664_v7 = vrot.slane %v5647_v34, %v11174_v36 }
 0x872   :  { %6827 = vmatpush1.bf16.msra.mxu0 %v11507_v43  ;;  %6868 = vmatpush1.bf16.msra.mxu1 %v11508_v24  ;;  %v5660_v24 = vrot.slane %v5647_v34, %v11175_v42 }
 0x873   :  { %6828 = vmatprep.subr.bf16.mxu0 %v11509_v25  ;;  %6869 = vmatprep.subr.bf16.mxu1 %v11510_v33 }
 0x876   :  { %6829 = vmatpush1.bf16.msra.mxu0 %v11511_v20  ;;  %6870 = vmatpush1.bf16.msra.mxu1 %v11512_v54 }
 0x877   :  { %6830 = vmatprep.subr.bf16.mxu0 %v11513_v0  ;;  %6871 = vmatprep.subr.bf16.mxu1 %v11514_v44 }
 0x87a   :  { %6831 = vmatpush1.bf16.msra.mxu0 %v11515_v28  ;;  %6872 = vmatpush1.bf16.msra.mxu1 %v11516_v49 }
 0x87b   :  { %6832 = vmatprep.subr.bf16.mxu0 %v11517_v26  ;;  %6873 = vmatprep.subr.bf16.mxu1 %v11518_v52 }
 0x87e   :  { %6833 = vmatpush1.bf16.msra.mxu0 %v11519_v57  ;;  %6874 = vmatpush1.bf16.msra.mxu1 %v11520_v31 }
 0x87f   :  { %6834 = vmatprep.subr.bf16.mxu0 %v11521_v46  ;;  %6875 = vmatprep.subr.bf16.mxu1 %v11522_v21 }
 0x882   :  { %6835 = vmatpush1.bf16.msra.mxu0 %v11523_v39  ;;  %6876 = vmatpush1.bf16.msra.mxu1 %v11524_v40 }
 0x883   :  { %6836 = vmatprep.subr.bf16.mxu0 %v11525_v53  ;;  %6877 = vmatprep.subr.bf16.mxu1 %v11526_v45  ;;  %v11547_v53 = vld [vmem:[#allocation65_spill] sm:$0xff] }
 0x886   :  { %6837 = vmatpush1.bf16.msra.mxu0 %v11527_v32  ;;  %6878 = vmatpush1.bf16.msra.mxu1 %v11528_v38  ;;  %v11548_v32 = vld [vmem:[#allocation57_spill] sm:$0xff] }
 0x887   :  { %6838 = vmatprep.subr.bf16.mxu0 %v11529_v9  ;;  %6879 = vmatprep.subr.bf16.mxu1 %v11530_v61 }
 0x88a   :  { %6839 = vmatpush1.bf16.msra.mxu0 %v11531_v50  ;;  %6880 = vmatpush1.bf16.msra.mxu1 %v11532_v55  ;;  %v11549_v50 = vld [vmem:[#allocation66_spill] sm:$0xff] }
 0x88b   :  { %6840 = vmatprep.subr.bf16.mxu0 %v11533_v3  ;;  %6881 = vmatprep.subr.bf16.mxu1 %v11534_v58  ;;  %v11550_v3 = vld [vmem:[#allocation58_spill] sm:$0xff] }
 0x88e   :  { %6841 = vmatpush1.bf16.msra.mxu0 %v11535_v5  ;;  %6882 = vmatpush1.bf16.msra.mxu1 %v11536_v16 }
 0x88f   :  { %6842 = vmatprep.subr.bf16.mxu0 %v11537_v51  ;;  %6883 = vmatprep.subr.bf16.mxu1 %v11538_v27 }
 0x892   :  { %6843 = vmatpush1.bf16.msra.mxu0 %v11539_v48  ;;  %6884 = vmatpush1.bf16.msra.mxu1 %v11540_v22 }
 0x893   :  { %6844 = vmatprep.subr.bf16.mxu0 %v11541_v6  ;;  %6885 = vmatprep.subr.bf16.mxu1 %v11542_v62 }
 0x896   :  { %6845 = vmatpush1.bf16.msra.mxu0 %v11543_v60  ;;  %6886 = vmatpush1.bf16.msra.mxu1 %v11544_v1 }
 0x897   :  { %7984 = vmatprep.subr.bf16.mxu0 %v10750_v2 }
 0x90c   :  { %v6023_v18 = vpop.f32.mrb[64].mxu0  ;;  %v6064_v11 = vpop.f32.mrb[72].mxu1 }
 0x90d   :  { %v6024_v23 = vadd.f32 %v6023_v18, %v5652_v14  ;;  %v6025_v41 = vpop.f32.mrb[65].mxu0  ;;  %v6066_v35 = vpop.f32.mrb[73].mxu1  ;;  %v6065_v33 = vadd.f32 %v6064_v11, %v5660_v24  ;;  %v6935_v24 = vld [vmem:[%s10872_s6 + $0x28] sm:$0xff] }
 0x90e   :  { %v6026_v10 = vadd.f32 %v6025_v41, %v5656_v17  ;;  %v6027_v13 = vpop.f32.mrb[66].mxu0  ;;  %v6068_v12 = vpop.f32.mrb[74].mxu1  ;;  %v6067_v43 = vadd.f32 %v6066_v35, %v5664_v7 }
 0x90f   :  { %v7809_v37 = vmul.f32 -1.442695, %v6024_v23  ;;  %v6028_v30 = vpop.f32.mrb[67].mxu0  ;;  %v6069_v19 = vpop.f32.mrb[75].mxu1 }
 0x910   :  { %v7810_v29 = vmul.f32 -1.442695, %v6026_v10  ;;  %v7811_v25 = vmul.f32 -1.442695, %v6067_v43  ;;  %v6932_v30 = vld [vmem:[%s10872_s6 + $0x10] sm:$0xff]  ;;  %v6933_v19 = vld [vmem:[%s10872_s6 + $0x18] sm:$0xff] }
 0x911   :  { %8812 = vpow2.f32 %v7809_v37  ;;  %v7987_v43 = vpack.c.bf16 %v6933_v19, %v6932_v30 }
 0x912   :  { %8814 = vpow2.f32 %v7810_v29 }
 0x913   :  { %8816 = vpow2.f32 %v7811_v25  ;;  %v11551_v25 = vld [vmem:[#allocation10_spill] sm:$0xff] }
 0x914   :  { %8818 = vtanh.f32 %v6065_v33 }
 0x91b   :  { %v8813_v20 = vpop.eup %8812 }
 0x91c   :  { %v8815_v54 = vpop.eup %8814  ;;  %v6074_v0 = vadd.f32 1.0, %v8813_v20  ;;  %v6936_v20 = vld [vmem:[%s10872_s6 + $0x30] sm:$0xff] }
 0x91d   :  { %v6080_v44 = vadd.f32 1.0, %v8815_v54  ;;  %v8817_v28 = vpop.eup %8816  ;;  %v6937_v54 = vld [vmem:[%s10872_s6 + $0x38] sm:$0xff] }
 0x91e   :  { %8820 = vrcp.f32 %v6074_v0  ;;  %v8819_v49 = vpop.eup %8818  ;;  %v6087_v31 = vadd.f32 1.0, %v8817_v28  ;;  %v7995_v0 = vpack.c.bf16 %v6937_v54, %v6936_v20 }
 0x91f   :  { %8822 = vrcp.f32 %v6080_v44  ;;  %v6938_v44 = vld [vmem:[%s10872_s6 + $0x40] sm:$0xff] }
 0x920   :  { %8824 = vrcp.f32 %v6087_v31  ;;  %v6943_v31 = vld [vmem:[%s10872_s6 + $0x68] sm:$0xff] }
 0x928   :  { %v8821_v26 = vpop.eup %8820 }
 0x929   :  { %v8823_v52 = vpop.eup %8822  ;;  %v6091_v57 = vmul.f32 %v8821_v26, %v8819_v49  ;;  %v6940_v49 = vld [vmem:[%s10872_s6 + $0x50] sm:$0xff]  ;;  %v6941_v26 = vld [vmem:[%s10872_s6 + $0x58] sm:$0xff] }
 0x92a   :  { %v6090_v46 = vmul.f32 %v8823_v52, %v10633_v63  ;;  %v8825_v22 = vpop.eup %8824  ;;  %v8003_v52 = vpack.c.bf16 %v6941_v26, %v6940_v49 }
 0x92c   :  { %v10761_v21 = vadd.f32 %v6091_v57, %v6090_v46  ;;  %v6331_v39 = vpop.f32.mrb[68].mxu0  ;;  %v6372_v40 = vpop.f32.mrb[76].mxu1  ;;  %v6942_v57 = vld [vmem:[%s10872_s6 + $0x60] sm:$0xff] }
 0x92d   :  { %v6379_v45 = vadd.f32 %v6331_v39, %v11547_v53  ;;  %v6381_v38 = vadd.f32 %v6372_v40, %v11548_v32  ;;  %v6333_v9 = vpop.f32.mrb[69].mxu0  ;;  %v6374_v61 = vpop.f32.mrb[77].mxu1  ;;  %v8007_v46 = vpack.c.bf16 %v6943_v31, %v6942_v57  ;;  %v6944_v39 = vld [vmem:[%s10872_s6 + $0x70] sm:$0xff]  ;;  %v6945_v40 = vld [vmem:[%s10872_s6 + $0x78] sm:$0xff]  ;;  %v11553_v32 = vld [vmem:[#allocation39_spill] sm:$0xff] }
 0x92e   :  { %v6380_v55 = vadd.f32 %v6333_v9, %v11549_v50  ;;  %v6382_v58 = vadd.f32 %v6374_v61, %v11550_v3  ;;  %v6335_v5 = vpop.f32.mrb[70].mxu0  ;;  %v6376_v16 = vpop.f32.mrb[78].mxu1  ;;  %8826 = vtanh.f32 %v10761_v21  ;;  %v8011_v53 = vpack.c.bf16 %v6945_v40, %v6944_v39  ;;  %v11555_v9 = vld [vmem:[#allocation92_spill] sm:$0xff]  ;;  %v6472_v61 = vld [vmem:[%s10871_s5] sm:$0xf] }
 0x92f   :  { %v7844_v63 = vmul.f32 -1.442695, %v6379_v45  ;;  %v6336_v51 = vpop.f32.mrb[71].mxu0  ;;  %v6377_v27 = vpop.f32.mrb[79].mxu1  ;;  %v11552_v45 = vld [vmem:[#allocation51_spill] sm:$0xff]  ;;  %v6477_v50 = vrot.slane %v6472_v61, %v11545_v4  ;;  %v6485_v4 = vrot.slane %v6472_v61, %v11175_v42 }
 0x930   :  { %v7845_v48 = vmul.f32 -1.442695, %v6380_v55  ;;  %v7846_v62 = vmul.f32 -1.442695, %v6382_v58  ;;  %v6481_v55 = vrot.slane %v6472_v61, %v11546_v15  ;;  %v7914_v42 = vld [vmem:[%s10873_s7] ss:$0 sm:$0xff] }
 0x931   :  { %8828 = vpow2.f32 %v7844_v63 }
 0x932   :  { %8830 = vpow2.f32 %v7845_v48 }
 0x933   :  { %8832 = vpow2.f32 %v7846_v62 }
 0x934   :  { %8834 = vtanh.f32 %v6381_v38  ;;  %v11554_v38 = vld [vmem:[#allocation91_spill] sm:$0xff] }
 0x938   :  { %v8827_v6 = vpop.eup %8826 }
 0x939   :  { %v10768_v60 = vmul.f32 %v8827_v6, %v8825_v22 }
 0x93b   :  { %v8829_v1 = vpop.eup %8828  ;;  %v6095_v56 = vpack.c.bf16 %v10768_v60, %v10768_v60 }
 0x93c   :  { %v8831_v47 = vpop.eup %8830  ;;  %v6386_v34 = vadd.f32 1.0, %v8829_v1 }
 0x93d   :  { %v6392_v14 = vadd.f32 1.0, %v8831_v47  ;;  %6846 = vmatprep.mubr.bf16.mxu0 %v6095_v56  ;;  %6887 = vmatprep.mubr.bf16.mxu1 %v6095_v56  ;;  %v8833_v17 = vpop.eup %8832 }
 0x93e   :  { %8836 = vrcp.f32 %v6386_v34  ;;  %v8835_v18 = vpop.eup %8834  ;;  %v6399_v35 = vadd.f32 1.0, %v8833_v17 }
 0x93f   :  { %8838 = vrcp.f32 %v6392_v14 }
 0x940   :  { %8840 = vrcp.f32 %v6399_v35 }
 0x948   :  { %v8837_v11 = vpop.eup %8836 }
 0x949   :  { %v8839_v23 = vpop.eup %8838  ;;  %v6403_v41 = vmul.f32 %v8837_v11, %v8835_v18 }
 0x94a   :  { %v6402_v10 = vmul.f32 %v8839_v23, %v10645_v8  ;;  %v8841_v12 = vpop.eup %8840  ;;  %v6934_v8 = vld [vmem:[%s10872_s6 + $0x20] sm:$0xff] }
 0x94b   :  { %v7991_v33 = vpack.c.bf16 %v6935_v24, %v6934_v8 }
 0x94c   :  { %v6404_v13 = vadd.f32 %v6403_v41, %v6402_v10 }
 0x94e   :  { %8842 = vtanh.f32 %v6404_v13 }
 0x958   :  { %v8843_v37 = vpop.eup %8842 }
 0x959   :  { %v6406_v29 = vmul.f32 %v8843_v37, %v8841_v12 }
 0x95b   :  { %v6407_v7 = vpack.c.bf16 %v6406_v29, %v6406_v29 }
 0x95d   :  { %6847 = vmatmul.mubr.bf16.vlgmr.msra.gmra.mrb[72].mxu0 %v6407_v7  ;;  %6888 = vmatmul.mubr.bf16.vlgmr.msra.gmra.mrb[80].mxu1 %v6407_v7 }
 0x95e   :  { %7986 = vmatpush3.bf16.msra.mxu0 %v10750_v2  ;;  %7971 = vmatprep.mubr.f32.mxu0 %v11551_v25  ;;  %v6939_v2 = vld [vmem:[%s10872_s6 + $0x48] sm:$0xff] }
 0x95f   :  { %7988 = vmatprep.subr.bf16.mxu0 %v7987_v43  ;;  %v7999_v28 = vpack.c.bf16 %v6939_v2, %v6938_v44 }
 0x962   :  { %7990 = vmatpush3.bf16.msra.mxu0 %v7987_v43 }
 0x963   :  { %7992 = vmatprep.subr.bf16.mxu0 %v7991_v33 }
 0x966   :  { %7994 = vmatpush3.bf16.msra.mxu0 %v7991_v33 }
 0x967   :  { %7996 = vmatprep.subr.bf16.mxu0 %v7995_v0 }
 0x96a   :  { %7998 = vmatpush3.bf16.msra.mxu0 %v7995_v0 }
 0x96b   :  { %8000 = vmatprep.subr.bf16.mxu0 %v7999_v28 }
 0x96e   :  { %8002 = vmatpush3.bf16.msra.mxu0 %v7999_v28 }
 0x96f   :  { %8004 = vmatprep.subr.bf16.mxu0 %v8003_v52 }
 0x972   :  { %8006 = vmatpush3.bf16.msra.mxu0 %v8003_v52 }
 0x973   :  { %8008 = vmatprep.subr.bf16.mxu0 %v8007_v46 }
 0x976   :  { %8010 = vmatpush3.bf16.msra.mxu0 %v8007_v46 }
 0x977   :  { %8012 = vmatprep.subr.bf16.mxu0 %v8011_v53 }
 0x97a   :  { %8014 = vmatpush3.bf16.msra.mxu0 %v8011_v53 }
 0x97d   :  { %7972 = vmatmul.mubr.f32.vlgmr.msra.gmra.mrb[76].mxu0 %v11552_v45 }
 0x97e   :  { %7974 = vmatprep.mubr.f32.mxu0 %v11553_v32 }
 0x981   :  { %7975 = vmatmul.mubr.f32.gmra.mrb[78].mxu0 %v11554_v38 }
 0x982   :  { %7977 = vmatprep.mubr.f32.mxu0 %v11555_v9 }
 0x985   :  { %7978 = vmatmul.mubr.f32.gmra.mrb[80].mxu0 %v10640_v59 }
 0x986   :  { %7980 = vmatprep.mubr.f32.mxu0 %v10768_v60  ;;  %v6489_v60 = vrot.slane %v6472_v61, %v11174_v36 }
 0xa30   :  { %v6848_v3 = vpop.f32.mrb[72].mxu0  ;;  %v6889_v58 = vpop.f32.mrb[80].mxu1 }
 0xa31   :  { %v6849_v5 = vadd.f32 %v6848_v3, %v6477_v50  ;;  %v6850_v16 = vpop.f32.mrb[73].mxu0  ;;  %v6891_v63 = vpop.f32.mrb[81].mxu1  ;;  %v6890_v56 = vadd.f32 %v6889_v58, %v6485_v4 }
 0xa32   :  { %v6851_v51 = vadd.f32 %v6850_v16, %v6481_v55  ;;  %v6852_v27 = vpop.f32.mrb[74].mxu0  ;;  %v6893_v48 = vpop.f32.mrb[82].mxu1  ;;  %v6892_v1 = vadd.f32 %v6891_v63, %v6489_v60 }
 0xa33   :  { %v7911_v22 = vmul.f32 -1.442695, %v6849_v5  ;;  %v6853_v59 = vpop.f32.mrb[75].mxu0  ;;  %v6894_v6 = vpop.f32.mrb[83].mxu1 }
 0xa34   :  { %v7912_v62 = vmul.f32 -1.442695, %v6851_v51  ;;  %v7913_v15 = vmul.f32 -1.442695, %v6892_v1 }
 0xa35   :  { %8844 = vpow2.f32 %v7911_v22 }
 0xa36   :  { %8846 = vpow2.f32 %v7912_v62 }
 0xa37   :  { %8848 = vpow2.f32 %v7913_v15 }
 0xa38   :  { %8850 = vtanh.f32 %v6890_v56 }
 0xa3f   :  { %v8845_v47 = vpop.eup %8844 }
 0xa40   :  { %v8847_v34 = vpop.eup %8846  ;;  %v6899_v14 = vadd.f32 1.0, %v8845_v47 }
 0xa41   :  { %v6905_v17 = vadd.f32 1.0, %v8847_v34  ;;  %v8849_v18 = vpop.eup %8848 }
 0xa42   :  { %8852 = vrcp.f32 %v6899_v14  ;;  %v8851_v11 = vpop.eup %8850  ;;  %v6912_v35 = vadd.f32 1.0, %v8849_v18 }
 0xa43   :  { %8854 = vrcp.f32 %v6905_v17 }
 0xa44   :  { %8856 = vrcp.f32 %v6912_v35 }
 0xa4c   :  { %v8853_v23 = vpop.eup %8852 }
 0xa4d   :  { %v8855_v41 = vpop.eup %8854  ;;  %v6916_v36 = vmul.f32 %v8853_v23, %v8851_v11 }
 0xa4e   :  { %v6915_v10 = vmul.f32 %v8855_v41, %v10761_v21  ;;  %v8857_v20 = vpop.eup %8856 }
 0xa50   :  { %v7973_v13 = vpop.f32.mrb[76].mxu0  ;;  %v6917_v12 = vadd.f32 %v6916_v36, %v6915_v10 }
 0xa51   :  { %v7025_v37 = vadd.f32 %v7973_v13, %v7914_v42  ;;  %v7019_v30 = vpop.f32.mrb[77].mxu0 }
 0xa52   :  { %v7020_v19 = vadd.f32 %v7914_v42, %v7019_v30  ;;  %8858 = vtanh.f32 %v6917_v12 }
 0xa53   :  { %7060 = vst.msk [vmem:[%s10874_s8 + $0x8] sm:$0xff] %vm7058_vm2, %v7025_v37 }
 0xa54   :  { %7059 = vst.msk [vmem:[%s10874_s8] sm:$0xff] %vm7058_vm2, %v7020_v19  ;;  %v7976_v21 = vpop.f32.mrb[78].mxu0 }
 0xa55   :  { %v7035_v29 = vadd.f32 %v7976_v21, %v7914_v42  ;;  %v7029_v7 = vpop.f32.mrb[79].mxu0 }
 0xa56   :  { %v7030_v43 = vadd.f32 %v7914_v42, %v7029_v7 }
 0xa57   :  { %7062 = vst.msk [vmem:[%s10874_s8 + $0x18] sm:$0xff] %vm7058_vm2, %v7035_v29 }
 0xa58   :  { %7061 = vst.msk [vmem:[%s10874_s8 + $0x10] sm:$0xff] %vm7058_vm2, %v7030_v43  ;;  %v7979_v8 = vpop.f32.mrb[80].mxu0 }
 0xa59   :  { %v7045_v24 = vadd.f32 %v7979_v8, %v7914_v42  ;;  %v7039_v25 = vpop.f32.mrb[81].mxu0 }
 0xa5a   :  { %v7040_v33 = vadd.f32 %v7914_v42, %v7039_v25 }
 0xa5b   :  { %7064 = vst.msk [vmem:[%s10874_s8 + $0x28] sm:$0xff] %vm7058_vm2, %v7045_v24 }
 0xa5c   :  { %v8859_v54 = vpop.eup %8858  ;;  %7063 = vst.msk [vmem:[%s10874_s8 + $0x20] sm:$0xff] %vm7058_vm2, %v7040_v33 }
 0xa5d   :  { %v6919_v0 = vmul.f32 %v8859_v54, %v8857_v20 }
 0xa5f   :  { %7981 = vmatmul.mubr.f32.gmra.mrb[82].mxu0 %v6919_v0 }
 0xb32   :  { %v7982_v44 = vpop.f32.mrb[82].mxu0 }
 0xb33   :  { %v7055_v2 = vadd.f32 %v7982_v44, %v7914_v42  ;;  %v7049_v28 = vpop.f32.mrb[83].mxu0 }
 0xb34   :  { %v7050_v49 = vadd.f32 %v7914_v42, %v7049_v28 }
 0xb35   :  { %7066 = vst.msk [vmem:[%s10874_s8 + $0x38] sm:$0xff] %vm7058_vm2, %v7055_v2 }
 0xb36   :  { %7065 = vst.msk [vmem:[%s10874_s8 + $0x30] sm:$0xff] %vm7058_vm2, %v7050_v49 }
 0xb37   :  { %7071 = vsyncpa [#allocation5], 1 }
 0xb38   :  { %7072 = vsyncpa [#allocation7], 1 }

</bundles_post_ra>
